<compile_context>
chip_gen: v7x
topology: tpu7x:2x2x1
jax: 0.10.0
libtpu: 0.0.40
codegen_flags: <defaults>
</compile_context>

<pallas_src>
import functools

import numpy as np
import jax
import jax.numpy as jnp
from jax import lax
from jax.experimental import pallas as pl
from jax.experimental.pallas import tpu as pltpu


def _corr_select_kernel(thresh_ref, ovl_ref, idx_ref,
                        ref_out, src_out, ovl_out, cnt_out):
    """Threshold + stable stream compaction (purely scalar, SMEM).

    thresh_ref : (1,)  f32 SMEM  score threshold (runtime input, no recompile)
    ovl_ref    : (N,)  f32 SMEM  correspondence scores / overlaps
    idx_ref    : (2N,) i32 SMEM  flattened (ref, src) index pairs
    ref_out    : (N,)  i32 SMEM  compacted ref indices   (tail uninitialized)
    src_out    : (N,)  i32 SMEM  compacted src indices   (tail uninitialized)
    ovl_out    : (N,)  f32 SMEM  compacted scores        (tail uninitialized)
    cnt_out    : (1,)  i32 SMEM  number of valid (compacted) entries

    Notes (perf-review items applied):
      * no sentinel-init loop: consumers only ever read entries < cnt_out[0],
        so initializing the padded tail would be N wasted scalar stores on the
        2-slot scalar ALU;
      * the counter lives in a register (loop carry), not in SMEM, removing
        the per-iteration sst->sld round trip; cnt_out is written once;
      * the loop is fully unrolled at trace time (N is small and static),
        giving the scheduler visibility to co-issue neighbouring iterations'
        loads/compares on the two scalar slots.  This trace-time unroll is the
        safe equivalent of lax.fori_loop(..., unroll=True) (no reliance on
        scan-unroll support in the Mosaic lowering).
    """
    n = ovl_ref.shape[0]
    thresh = thresh_ref[0]

    c = 0  # compaction counter, carried in a scalar register
    for i in range(n):  # full trace-time unroll (N small & static)
        ov = ovl_ref[i]
        keep = ov > thresh

        @pl.when(keep)
        def _(c=c, i=i, ov=ov):
            ref_out[c] = idx_ref[2 * i]
            src_out[c] = idx_ref[2 * i + 1]
            ovl_out[c] = ov

        c = c + keep.astype(jnp.int32)

    cnt_out[0] = c

    # TODO(synk): for N >> ~1K, pass the scores through VMEM, do the threshold
    # test on the VPU (1024 elems/vreg) and only run the scalar compaction over
    # blocks with a nonzero survivor count; at N=64 the scalar path wins.


@functools.partial(jax.jit, static_argnames=("max_num_corr",))
def _select_correspondences(corr_indices, corr_scores, threshold, rng_key, *,
                            max_num_corr):
    """Threshold+compact (Pallas) then random subsample w/o replacement (on-device)."""
    n = corr_scores.shape[0]
    scores = corr_scores.astype(jnp.float32)
    # Keep the flattened (2N,) int32 SMEM layout: a 2D (N, 2) SMEM ref would
    # pad its last dim to 128 words (64x blowup).
    idx_flat = corr_indices.astype(jnp.int32).reshape(2 * n)
    thresh = jnp.asarray(threshold, jnp.float32).reshape(1)

    smem = pl.BlockSpec(memory_space=pltpu.MemorySpace.SMEM)
    ref_pad, src_pad, ovl_pad, cnt = pl.pallas_call(
        _corr_select_kernel,
        out_shape=(
            jax.ShapeDtypeStruct((n,), jnp.int32),    # compacted ref indices
            jax.ShapeDtypeStruct((n,), jnp.int32),    # compacted src indices
            jax.ShapeDtypeStruct((n,), jnp.float32),  # compacted scores
            jax.ShapeDtypeStruct((1,), jnp.int32),    # valid count
        ),
        in_specs=[smem, smem, smem],
        out_specs=(smem, smem, smem, smem),
    )(thresh, scores, idx_flat)

    count = cnt[0]
    k = min(max_num_corr, n)  # static

    # Uniform random subsample without replacement over the compacted prefix,
    # fused on-device: random priority per slot, +inf for the padded tail, keep
    # the k smallest.  Sorting the chosen positions preserves the stable
    # compaction order whenever count <= max_num_corr (all survivors, in order).
    prio = jax.random.uniform(rng_key, (n,), dtype=jnp.float32)
    prio = jnp.where(jnp.arange(n, dtype=jnp.int32) < count, prio, jnp.inf)
    _, sel = lax.top_k(-prio, k)
    sel = jnp.sort(sel)
    return ref_pad[sel], src_pad[sel], ovl_pad[sel], count


class InstanceAwareCorrSelector:
    """Pallas-accelerated correspondence selection used by InstanceAwarePointMatching.

    Keeps correspondences whose score exceeds `threshold` (stable order) and,
    if more than `max_num_corr` survive, returns a uniform random subset of
    `max_num_corr` of them without replacement (mirroring the module's
    `threshold` gating and the `max_num_corr` random subsample).
    """

    def __init__(self, max_num_corr, threshold=0.1, seed=0):
        self.max_num_corr = max_num_corr
        self.threshold = threshold
        # TODO(synk): PyTorch relies on python/np global RNG state; here we use
        # a deterministic jax.random key chain instead.
        self._key = jax.random.PRNGKey(seed)

    def __call__(self, corr_indices, corr_scores):
        self._key, sub = jax.random.split(self._key)
        ref_sel, src_sel, score_sel, count = _select_correspondences(
            jnp.asarray(corr_indices), jnp.asarray(corr_scores),
            float(self.threshold), sub, max_num_corr=self.max_num_corr)
        # Single scalar D2H to resolve the dynamic length; the payload arrays
        # stay on device and are only statically sliced (no H2D re-upload).
        m = min(int(jax.device_get(count)), self.max_num_corr)
        return ref_sel[:m], src_sel[:m], score_sel[:m]


if __name__ == "__main__":
    key = jax.random.PRNGKey(0)
    k_idx, k_scr = jax.random.split(key)

    N = 64              # candidate correspondences
    MAX_NUM_CORR = 16   # subsample bound
    THRESH = 0.1

    corr_indices = jax.random.randint(k_idx, (N, 2), 0, 32, dtype=jnp.int32)
    corr_scores = jax.random.uniform(k_scr, (N,), dtype=jnp.float32)

    selector = InstanceAwareCorrSelector(MAX_NUM_CORR, threshold=THRESH, seed=0)
    ref_idx, src_idx, scores = selector(corr_indices, corr_scores)
    jax.block_until_ready((ref_idx, src_idx, scores))

    # ---- reference check (pure numpy, same selection semantics) ----
    np_idx = np.asarray(corr_indices)
    np_scr = np.asarray(corr_scores)
    mask = np_scr > THRESH
    valid_idx = np_idx[mask]
    valid_scr = np_scr[mask]
    n_valid = valid_scr.shape[0]

    expected_len = min(n_valid, MAX_NUM_CORR)
    assert ref_idx.shape == (expected_len,)
    assert src_idx.shape == (expected_len,)
    assert scores.shape == (expected_len,)
    assert np.all(np.asarray(scores) > THRESH)

    # every returned (ref, src, score) triple must be one of the valid ones
    valid_set = {(int(r), int(s), np.float32(o))
                 for (r, s), o in zip(valid_idx, valid_scr)}
    out = list(zip(np.asarray(ref_idx).tolist(),
                   np.asarray(src_idx).tolist(),
                   np.asarray(scores).tolist()))
    for r, s, o in out:
        assert (int(r), int(s), np.float32(o)) in valid_set
    # sampling without replacement over distinct positions -> no duplicates
    assert len(set(out)) == expected_len

    print("KERNEL_OK")
</pallas_src>

<mosaic_0001>
module attributes {stable_mosaic.version = 11 : i64} {
  func.func @_corr_select_kernel(%arg0: memref<1xf32, #tpu.memory_space<smem>>, %arg1: memref<64xf32, #tpu.memory_space<smem>>, %arg2: memref<128xi32, #tpu.memory_space<smem>>, %arg3: memref<64xi32, #tpu.memory_space<smem>>, %arg4: memref<64xi32, #tpu.memory_space<smem>>, %arg5: memref<64xf32, #tpu.memory_space<smem>>, %arg6: memref<1xi32, #tpu.memory_space<smem>>) attributes {dimension_semantics = [], scalar_prefetch = 0 : i64, scratch_operands = 0 : i64, tpu.core_type = #tpu.core_type<tc>} {
    %c0 = arith.constant 0 : index
    %0 = memref.load %arg0[%c0] : memref<1xf32, #tpu.memory_space<smem>>
    %c0_0 = arith.constant 0 : index
    %1 = memref.load %arg1[%c0_0] : memref<64xf32, #tpu.memory_space<smem>>
    %2 = arith.cmpf ogt, %1, %0 : f32
    %3 = arith.extui %2 : i1 to i32
    %c0_i32 = arith.constant 0 : i32
    %4 = arith.cmpi ne, %3, %c0_i32 : i32
    scf.if %4 {
      %c0_66 = arith.constant 0 : index
      %386 = memref.load %arg2[%c0_66] : memref<128xi32, #tpu.memory_space<smem>>
      %c0_67 = arith.constant 0 : index
      %387 = memref.load %arg3[%c0_67] : memref<64xi32, #tpu.memory_space<smem>>
      memref.store %386, %arg3[%c0_67] : memref<64xi32, #tpu.memory_space<smem>>
      %c1_68 = arith.constant 1 : index
      %388 = memref.load %arg2[%c1_68] : memref<128xi32, #tpu.memory_space<smem>>
      %c0_69 = arith.constant 0 : index
      %389 = memref.load %arg4[%c0_69] : memref<64xi32, #tpu.memory_space<smem>>
      memref.store %388, %arg4[%c0_69] : memref<64xi32, #tpu.memory_space<smem>>
      %c0_70 = arith.constant 0 : index
      %390 = memref.load %arg5[%c0_70] : memref<64xf32, #tpu.memory_space<smem>>
      memref.store %1, %arg5[%c0_70] : memref<64xf32, #tpu.memory_space<smem>>
    } else {
    }
    %5 = arith.extui %2 : i1 to i32
    %c0_i32_1 = arith.constant 0 : i32
    %6 = arith.addi %c0_i32_1, %5 : i32
    %c1 = arith.constant 1 : index
    %7 = memref.load %arg1[%c1] : memref<64xf32, #tpu.memory_space<smem>>
    %8 = arith.cmpf ogt, %7, %0 : f32
    %9 = arith.extui %8 : i1 to i32
    %c0_i32_2 = arith.constant 0 : i32
    %10 = arith.cmpi ne, %9, %c0_i32_2 : i32
    scf.if %10 {
      %c2_66 = arith.constant 2 : index
      %386 = memref.load %arg2[%c2_66] : memref<128xi32, #tpu.memory_space<smem>>
      %387 = arith.index_cast %6 : i32 to index
      %388 = memref.load %arg3[%387] : memref<64xi32, #tpu.memory_space<smem>>
      memref.store %386, %arg3[%387] : memref<64xi32, #tpu.memory_space<smem>>
      %c3_67 = arith.constant 3 : index
      %389 = memref.load %arg2[%c3_67] : memref<128xi32, #tpu.memory_space<smem>>
      %390 = arith.index_cast %6 : i32 to index
      %391 = memref.load %arg4[%390] : memref<64xi32, #tpu.memory_space<smem>>
      memref.store %389, %arg4[%390] : memref<64xi32, #tpu.memory_space<smem>>
      %392 = arith.index_cast %6 : i32 to index
      %393 = memref.load %arg5[%392] : memref<64xf32, #tpu.memory_space<smem>>
      memref.store %7, %arg5[%392] : memref<64xf32, #tpu.memory_space<smem>>
    } else {
    }
    %11 = arith.extui %8 : i1 to i32
    %12 = arith.addi %6, %11 : i32
    %c2 = arith.constant 2 : index
    %13 = memref.load %arg1[%c2] : memref<64xf32, #tpu.memory_space<smem>>
    %14 = arith.cmpf ogt, %13, %0 : f32
    %15 = arith.extui %14 : i1 to i32
    %c0_i32_3 = arith.constant 0 : i32
    %16 = arith.cmpi ne, %15, %c0_i32_3 : i32
    scf.if %16 {
      %c4_66 = arith.constant 4 : index
      %386 = memref.load %arg2[%c4_66] : memref<128xi32, #tpu.memory_space<smem>>
      %387 = arith.index_cast %12 : i32 to index
      %388 = memref.load %arg3[%387] : memref<64xi32, #tpu.memory_space<smem>>
      memref.store %386, %arg3[%387] : memref<64xi32, #tpu.memory_space<smem>>
      %c5_67 = arith.constant 5 : index
      %389 = memref.load %arg2[%c5_67] : memref<128xi32, #tpu.memory_space<smem>>
      %390 = arith.index_cast %12 : i32 to index
      %391 = memref.load %arg4[%390] : memref<64xi32, #tpu.memory_space<smem>>
      memref.store %389, %arg4[%390] : memref<64xi32, #tpu.memory_space<smem>>
      %392 = arith.index_cast %12 : i32 to index
      %393 = memref.load %arg5[%392] : memref<64xf32, #tpu.memory_space<smem>>
      memref.store %13, %arg5[%392] : memref<64xf32, #tpu.memory_space<smem>>
    } else {
    }
    %17 = arith.extui %14 : i1 to i32
    %18 = arith.addi %12, %17 : i32
    %c3 = arith.constant 3 : index
    %19 = memref.load %arg1[%c3] : memref<64xf32, #tpu.memory_space<smem>>
    %20 = arith.cmpf ogt, %19, %0 : f32
    %21 = arith.extui %20 : i1 to i32
    %c0_i32_4 = arith.constant 0 : i32
    %22 = arith.cmpi ne, %21, %c0_i32_4 : i32
    scf.if %22 {
      %c6_66 = arith.constant 6 : index
      %386 = memref.load %arg2[%c6_66] : memref<128xi32, #tpu.memory_space<smem>>
      %387 = arith.index_cast %18 : i32 to index
      %388 = memref.load %arg3[%387] : memref<64xi32, #tpu.memory_space<smem>>
      memref.store %386, %arg3[%387] : memref<64xi32, #tpu.memory_space<smem>>
      %c7_67 = arith.constant 7 : index
      %389 = memref.load %arg2[%c7_67] : memref<128xi32, #tpu.memory_space<smem>>
      %390 = arith.index_cast %18 : i32 to index
      %391 = memref.load %arg4[%390] : memref<64xi32, #tpu.memory_space<smem>>
      memref.store %389, %arg4[%390] : memref<64xi32, #tpu.memory_space<smem>>
      %392 = arith.index_cast %18 : i32 to index
      %393 = memref.load %arg5[%392] : memref<64xf32, #tpu.memory_space<smem>>
      memref.store %19, %arg5[%392] : memref<64xf32, #tpu.memory_space<smem>>
    } else {
    }
    %23 = arith.extui %20 : i1 to i32
    %24 = arith.addi %18, %23 : i32
    %c4 = arith.constant 4 : index
    %25 = memref.load %arg1[%c4] : memref<64xf32, #tpu.memory_space<smem>>
    %26 = arith.cmpf ogt, %25, %0 : f32
    %27 = arith.extui %26 : i1 to i32
    %c0_i32_5 = arith.constant 0 : i32
    %28 = arith.cmpi ne, %27, %c0_i32_5 : i32
    scf.if %28 {
      %c8_66 = arith.constant 8 : index
      %386 = memref.load %arg2[%c8_66] : memref<128xi32, #tpu.memory_space<smem>>
      %387 = arith.index_cast %24 : i32 to index
      %388 = memref.load %arg3[%387] : memref<64xi32, #tpu.memory_space<smem>>
      memref.store %386, %arg3[%387] : memref<64xi32, #tpu.memory_space<smem>>
      %c9_67 = arith.constant 9 : index
      %389 = memref.load %arg2[%c9_67] : memref<128xi32, #tpu.memory_space<smem>>
      %390 = arith.index_cast %24 : i32 to index
      %391 = memref.load %arg4[%390] : memref<64xi32, #tpu.memory_space<smem>>
      memref.store %389, %arg4[%390] : memref<64xi32, #tpu.memory_space<smem>>
      %392 = arith.index_cast %24 : i32 to index
      %393 = memref.load %arg5[%392] : memref<64xf32, #tpu.memory_space<smem>>
      memref.store %25, %arg5[%392] : memref<64xf32, #tpu.memory_space<smem>>
    } else {
    }
    %29 = arith.extui %26 : i1 to i32
    %30 = arith.addi %24, %29 : i32
    %c5 = arith.constant 5 : index
    %31 = memref.load %arg1[%c5] : memref<64xf32, #tpu.memory_space<smem>>
    %32 = arith.cmpf ogt, %31, %0 : f32
    %33 = arith.extui %32 : i1 to i32
    %c0_i32_6 = arith.constant 0 : i32
    %34 = arith.cmpi ne, %33, %c0_i32_6 : i32
    scf.if %34 {
      %c10_66 = arith.constant 10 : index
      %386 = memref.load %arg2[%c10_66] : memref<128xi32, #tpu.memory_space<smem>>
      %387 = arith.index_cast %30 : i32 to index
      %388 = memref.load %arg3[%387] : memref<64xi32, #tpu.memory_space<smem>>
      memref.store %386, %arg3[%387] : memref<64xi32, #tpu.memory_space<smem>>
      %c11_67 = arith.constant 11 : index
      %389 = memref.load %arg2[%c11_67] : memref<128xi32, #tpu.memory_space<smem>>
      %390 = arith.index_cast %30 : i32 to index
      %391 = memref.load %arg4[%390] : memref<64xi32, #tpu.memory_space<smem>>
      memref.store %389, %arg4[%390] : memref<64xi32, #tpu.memory_space<smem>>
      %392 = arith.index_cast %30 : i32 to index
      %393 = memref.load %arg5[%392] : memref<64xf32, #tpu.memory_space<smem>>
      memref.store %31, %arg5[%392] : memref<64xf32, #tpu.memory_space<smem>>
    } else {
    }
    %35 = arith.extui %32 : i1 to i32
    %36 = arith.addi %30, %35 : i32
    %c6 = arith.constant 6 : index
    %37 = memref.load %arg1[%c6] : memref<64xf32, #tpu.memory_space<smem>>
    %38 = arith.cmpf ogt, %37, %0 : f32
    %39 = arith.extui %38 : i1 to i32
    %c0_i32_7 = arith.constant 0 : i32
    %40 = arith.cmpi ne, %39, %c0_i32_7 : i32
    scf.if %40 {
      %c12_66 = arith.constant 12 : index
      %386 = memref.load %arg2[%c12_66] : memref<128xi32, #tpu.memory_space<smem>>
      %387 = arith.index_cast %36 : i32 to index
      %388 = memref.load %arg3[%387] : memref<64xi32, #tpu.memory_space<smem>>
      memref.store %386, %arg3[%387] : memref<64xi32, #tpu.memory_space<smem>>
      %c13_67 = arith.constant 13 : index
      %389 = memref.load %arg2[%c13_67] : memref<128xi32, #tpu.memory_space<smem>>
      %390 = arith.index_cast %36 : i32 to index
      %391 = memref.load %arg4[%390] : memref<64xi32, #tpu.memory_space<smem>>
      memref.store %389, %arg4[%390] : memref<64xi32, #tpu.memory_space<smem>>
      %392 = arith.index_cast %36 : i32 to index
      %393 = memref.load %arg5[%392] : memref<64xf32, #tpu.memory_space<smem>>
      memref.store %37, %arg5[%392] : memref<64xf32, #tpu.memory_space<smem>>
    } else {
    }
    %41 = arith.extui %38 : i1 to i32
    %42 = arith.addi %36, %41 : i32
    %c7 = arith.constant 7 : index
    %43 = memref.load %arg1[%c7] : memref<64xf32, #tpu.memory_space<smem>>
    %44 = arith.cmpf ogt, %43, %0 : f32
    %45 = arith.extui %44 : i1 to i32
    %c0_i32_8 = arith.constant 0 : i32
    %46 = arith.cmpi ne, %45, %c0_i32_8 : i32
    scf.if %46 {
      %c14_66 = arith.constant 14 : index
      %386 = memref.load %arg2[%c14_66] : memref<128xi32, #tpu.memory_space<smem>>
      %387 = arith.index_cast %42 : i32 to index
      %388 = memref.load %arg3[%387] : memref<64xi32, #tpu.memory_space<smem>>
      memref.store %386, %arg3[%387] : memref<64xi32, #tpu.memory_space<smem>>
      %c15_67 = arith.constant 15 : index
      %389 = memref.load %arg2[%c15_67] : memref<128xi32, #tpu.memory_space<smem>>
      %390 = arith.index_cast %42 : i32 to index
      %391 = memref.load %arg4[%390] : memref<64xi32, #tpu.memory_space<smem>>
      memref.store %389, %arg4[%390] : memref<64xi32, #tpu.memory_space<smem>>
      %392 = arith.index_cast %42 : i32 to index
      %393 = memref.load %arg5[%392] : memref<64xf32, #tpu.memory_space<smem>>
      memref.store %43, %arg5[%392] : memref<64xf32, #tpu.memory_space<smem>>
    } else {
    }
    %47 = arith.extui %44 : i1 to i32
    %48 = arith.addi %42, %47 : i32
    %c8 = arith.constant 8 : index
    %49 = memref.load %arg1[%c8] : memref<64xf32, #tpu.memory_space<smem>>
    %50 = arith.cmpf ogt, %49, %0 : f32
    %51 = arith.extui %50 : i1 to i32
    %c0_i32_9 = arith.constant 0 : i32
    %52 = arith.cmpi ne, %51, %c0_i32_9 : i32
    scf.if %52 {
      %c16_66 = arith.constant 16 : index
      %386 = memref.load %arg2[%c16_66] : memref<128xi32, #tpu.memory_space<smem>>
      %387 = arith.index_cast %48 : i32 to index
      %388 = memref.load %arg3[%387] : memref<64xi32, #tpu.memory_space<smem>>
      memref.store %386, %arg3[%387] : memref<64xi32, #tpu.memory_space<smem>>
      %c17_67 = arith.constant 17 : index
      %389 = memref.load %arg2[%c17_67] : memref<128xi32, #tpu.memory_space<smem>>
      %390 = arith.index_cast %48 : i32 to index
      %391 = memref.load %arg4[%390] : memref<64xi32, #tpu.memory_space<smem>>
      memref.store %389, %arg4[%390] : memref<64xi32, #tpu.memory_space<smem>>
      %392 = arith.index_cast %48 : i32 to index
      %393 = memref.load %arg5[%392] : memref<64xf32, #tpu.memory_space<smem>>
      memref.store %49, %arg5[%392] : memref<64xf32, #tpu.memory_space<smem>>
    } else {
    }
    %53 = arith.extui %50 : i1 to i32
    %54 = arith.addi %48, %53 : i32
    %c9 = arith.constant 9 : index
    %55 = memref.load %arg1[%c9] : memref<64xf32, #tpu.memory_space<smem>>
    %56 = arith.cmpf ogt, %55, %0 : f32
    %57 = arith.extui %56 : i1 to i32
    %c0_i32_10 = arith.constant 0 : i32
    %58 = arith.cmpi ne, %57, %c0_i32_10 : i32
    scf.if %58 {
      %c18_66 = arith.constant 18 : index
      %386 = memref.load %arg2[%c18_66] : memref<128xi32, #tpu.memory_space<smem>>
      %387 = arith.index_cast %54 : i32 to index
      %388 = memref.load %arg3[%387] : memref<64xi32, #tpu.memory_space<smem>>
      memref.store %386, %arg3[%387] : memref<64xi32, #tpu.memory_space<smem>>
      %c19_67 = arith.constant 19 : index
      %389 = memref.load %arg2[%c19_67] : memref<128xi32, #tpu.memory_space<smem>>
      %390 = arith.index_cast %54 : i32 to index
      %391 = memref.load %arg4[%390] : memref<64xi32, #tpu.memory_space<smem>>
      memref.store %389, %arg4[%390] : memref<64xi32, #tpu.memory_space<smem>>
      %392 = arith.index_cast %54 : i32 to index
      %393 = memref.load %arg5[%392] : memref<64xf32, #tpu.memory_space<smem>>
      memref.store %55, %arg5[%392] : memref<64xf32, #tpu.memory_space<smem>>
    } else {
    }
    %59 = arith.extui %56 : i1 to i32
    %60 = arith.addi %54, %59 : i32
    %c10 = arith.constant 10 : index
    %61 = memref.load %arg1[%c10] : memref<64xf32, #tpu.memory_space<smem>>
    %62 = arith.cmpf ogt, %61, %0 : f32
    %63 = arith.extui %62 : i1 to i32
    %c0_i32_11 = arith.constant 0 : i32
    %64 = arith.cmpi ne, %63, %c0_i32_11 : i32
    scf.if %64 {
      %c20_66 = arith.constant 20 : index
      %386 = memref.load %arg2[%c20_66] : memref<128xi32, #tpu.memory_space<smem>>
      %387 = arith.index_cast %60 : i32 to index
      %388 = memref.load %arg3[%387] : memref<64xi32, #tpu.memory_space<smem>>
      memref.store %386, %arg3[%387] : memref<64xi32, #tpu.memory_space<smem>>
      %c21_67 = arith.constant 21 : index
      %389 = memref.load %arg2[%c21_67] : memref<128xi32, #tpu.memory_space<smem>>
      %390 = arith.index_cast %60 : i32 to index
      %391 = memref.load %arg4[%390] : memref<64xi32, #tpu.memory_space<smem>>
      memref.store %389, %arg4[%390] : memref<64xi32, #tpu.memory_space<smem>>
      %392 = arith.index_cast %60 : i32 to index
      %393 = memref.load %arg5[%392] : memref<64xf32, #tpu.memory_space<smem>>
      memref.store %61, %arg5[%392] : memref<64xf32, #tpu.memory_space<smem>>
    } else {
    }
    %65 = arith.extui %62 : i1 to i32
    %66 = arith.addi %60, %65 : i32
    %c11 = arith.constant 11 : index
    %67 = memref.load %arg1[%c11] : memref<64xf32, #tpu.memory_space<smem>>
    %68 = arith.cmpf ogt, %67, %0 : f32
    %69 = arith.extui %68 : i1 to i32
    %c0_i32_12 = arith.constant 0 : i32
    %70 = arith.cmpi ne, %69, %c0_i32_12 : i32
    scf.if %70 {
      %c22_66 = arith.constant 22 : index
      %386 = memref.load %arg2[%c22_66] : memref<128xi32, #tpu.memory_space<smem>>
      %387 = arith.index_cast %66 : i32 to index
      %388 = memref.load %arg3[%387] : memref<64xi32, #tpu.memory_space<smem>>
      memref.store %386, %arg3[%387] : memref<64xi32, #tpu.memory_space<smem>>
      %c23_67 = arith.constant 23 : index
      %389 = memref.load %arg2[%c23_67] : memref<128xi32, #tpu.memory_space<smem>>
      %390 = arith.index_cast %66 : i32 to index
      %391 = memref.load %arg4[%390] : memref<64xi32, #tpu.memory_space<smem>>
      memref.store %389, %arg4[%390] : memref<64xi32, #tpu.memory_space<smem>>
      %392 = arith.index_cast %66 : i32 to index
      %393 = memref.load %arg5[%392] : memref<64xf32, #tpu.memory_space<smem>>
      memref.store %67, %arg5[%392] : memref<64xf32, #tpu.memory_space<smem>>
    } else {
    }
    %71 = arith.extui %68 : i1 to i32
    %72 = arith.addi %66, %71 : i32
    %c12 = arith.constant 12 : index
    %73 = memref.load %arg1[%c12] : memref<64xf32, #tpu.memory_space<smem>>
    %74 = arith.cmpf ogt, %73, %0 : f32
    %75 = arith.extui %74 : i1 to i32
    %c0_i32_13 = arith.constant 0 : i32
    %76 = arith.cmpi ne, %75, %c0_i32_13 : i32
    scf.if %76 {
      %c24_66 = arith.constant 24 : index
      %386 = memref.load %arg2[%c24_66] : memref<128xi32, #tpu.memory_space<smem>>
      %387 = arith.index_cast %72 : i32 to index
      %388 = memref.load %arg3[%387] : memref<64xi32, #tpu.memory_space<smem>>
      memref.store %386, %arg3[%387] : memref<64xi32, #tpu.memory_space<smem>>
      %c25_67 = arith.constant 25 : index
      %389 = memref.load %arg2[%c25_67] : memref<128xi32, #tpu.memory_space<smem>>
      %390 = arith.index_cast %72 : i32 to index
      %391 = memref.load %arg4[%390] : memref<64xi32, #tpu.memory_space<smem>>
      memref.store %389, %arg4[%390] : memref<64xi32, #tpu.memory_space<smem>>
      %392 = arith.index_cast %72 : i32 to index
      %393 = memref.load %arg5[%392] : memref<64xf32, #tpu.memory_space<smem>>
      memref.store %73, %arg5[%392] : memref<64xf32, #tpu.memory_space<smem>>
    } else {
    }
    %77 = arith.extui %74 : i1 to i32
    %78 = arith.addi %72, %77 : i32
    %c13 = arith.constant 13 : index
    %79 = memref.load %arg1[%c13] : memref<64xf32, #tpu.memory_space<smem>>
    %80 = arith.cmpf ogt, %79, %0 : f32
    %81 = arith.extui %80 : i1 to i32
    %c0_i32_14 = arith.constant 0 : i32
    %82 = arith.cmpi ne, %81, %c0_i32_14 : i32
    scf.if %82 {
      %c26_66 = arith.constant 26 : index
      %386 = memref.load %arg2[%c26_66] : memref<128xi32, #tpu.memory_space<smem>>
      %387 = arith.index_cast %78 : i32 to index
      %388 = memref.load %arg3[%387] : memref<64xi32, #tpu.memory_space<smem>>
      memref.store %386, %arg3[%387] : memref<64xi32, #tpu.memory_space<smem>>
      %c27_67 = arith.constant 27 : index
      %389 = memref.load %arg2[%c27_67] : memref<128xi32, #tpu.memory_space<smem>>
      %390 = arith.index_cast %78 : i32 to index
      %391 = memref.load %arg4[%390] : memref<64xi32, #tpu.memory_space<smem>>
      memref.store %389, %arg4[%390] : memref<64xi32, #tpu.memory_space<smem>>
      %392 = arith.index_cast %78 : i32 to index
      %393 = memref.load %arg5[%392] : memref<64xf32, #tpu.memory_space<smem>>
      memref.store %79, %arg5[%392] : memref<64xf32, #tpu.memory_space<smem>>
    } else {
    }
    %83 = arith.extui %80 : i1 to i32
    %84 = arith.addi %78, %83 : i32
    %c14 = arith.constant 14 : index
    %85 = memref.load %arg1[%c14] : memref<64xf32, #tpu.memory_space<smem>>
    %86 = arith.cmpf ogt, %85, %0 : f32
    %87 = arith.extui %86 : i1 to i32
    %c0_i32_15 = arith.constant 0 : i32
    %88 = arith.cmpi ne, %87, %c0_i32_15 : i32
    scf.if %88 {
      %c28_66 = arith.constant 28 : index
      %386 = memref.load %arg2[%c28_66] : memref<128xi32, #tpu.memory_space<smem>>
      %387 = arith.index_cast %84 : i32 to index
      %388 = memref.load %arg3[%387] : memref<64xi32, #tpu.memory_space<smem>>
      memref.store %386, %arg3[%387] : memref<64xi32, #tpu.memory_space<smem>>
      %c29_67 = arith.constant 29 : index
      %389 = memref.load %arg2[%c29_67] : memref<128xi32, #tpu.memory_space<smem>>
      %390 = arith.index_cast %84 : i32 to index
      %391 = memref.load %arg4[%390] : memref<64xi32, #tpu.memory_space<smem>>
      memref.store %389, %arg4[%390] : memref<64xi32, #tpu.memory_space<smem>>
      %392 = arith.index_cast %84 : i32 to index
      %393 = memref.load %arg5[%392] : memref<64xf32, #tpu.memory_space<smem>>
      memref.store %85, %arg5[%392] : memref<64xf32, #tpu.memory_space<smem>>
    } else {
    }
    %89 = arith.extui %86 : i1 to i32
    %90 = arith.addi %84, %89 : i32
    %c15 = arith.constant 15 : index
    %91 = memref.load %arg1[%c15] : memref<64xf32, #tpu.memory_space<smem>>
    %92 = arith.cmpf ogt, %91, %0 : f32
    %93 = arith.extui %92 : i1 to i32
    %c0_i32_16 = arith.constant 0 : i32
    %94 = arith.cmpi ne, %93, %c0_i32_16 : i32
    scf.if %94 {
      %c30_66 = arith.constant 30 : index
      %386 = memref.load %arg2[%c30_66] : memref<128xi32, #tpu.memory_space<smem>>
      %387 = arith.index_cast %90 : i32 to index
      %388 = memref.load %arg3[%387] : memref<64xi32, #tpu.memory_space<smem>>
      memref.store %386, %arg3[%387] : memref<64xi32, #tpu.memory_space<smem>>
      %c31_67 = arith.constant 31 : index
      %389 = memref.load %arg2[%c31_67] : memref<128xi32, #tpu.memory_space<smem>>
      %390 = arith.index_cast %90 : i32 to index
      %391 = memref.load %arg4[%390] : memref<64xi32, #tpu.memory_space<smem>>
      memref.store %389, %arg4[%390] : memref<64xi32, #tpu.memory_space<smem>>
      %392 = arith.index_cast %90 : i32 to index
      %393 = memref.load %arg5[%392] : memref<64xf32, #tpu.memory_space<smem>>
      memref.store %91, %arg5[%392] : memref<64xf32, #tpu.memory_space<smem>>
    } else {
    }
    %95 = arith.extui %92 : i1 to i32
    %96 = arith.addi %90, %95 : i32
    %c16 = arith.constant 16 : index
    %97 = memref.load %arg1[%c16] : memref<64xf32, #tpu.memory_space<smem>>
    %98 = arith.cmpf ogt, %97, %0 : f32
    %99 = arith.extui %98 : i1 to i32
    %c0_i32_17 = arith.constant 0 : i32
    %100 = arith.cmpi ne, %99, %c0_i32_17 : i32
    scf.if %100 {
      %c32_66 = arith.constant 32 : index
      %386 = memref.load %arg2[%c32_66] : memref<128xi32, #tpu.memory_space<smem>>
      %387 = arith.index_cast %96 : i32 to index
      %388 = memref.load %arg3[%387] : memref<64xi32, #tpu.memory_space<smem>>
      memref.store %386, %arg3[%387] : memref<64xi32, #tpu.memory_space<smem>>
      %c33_67 = arith.constant 33 : index
      %389 = memref.load %arg2[%c33_67] : memref<128xi32, #tpu.memory_space<smem>>
      %390 = arith.index_cast %96 : i32 to index
      %391 = memref.load %arg4[%390] : memref<64xi32, #tpu.memory_space<smem>>
      memref.store %389, %arg4[%390] : memref<64xi32, #tpu.memory_space<smem>>
      %392 = arith.index_cast %96 : i32 to index
      %393 = memref.load %arg5[%392] : memref<64xf32, #tpu.memory_space<smem>>
      memref.store %97, %arg5[%392] : memref<64xf32, #tpu.memory_space<smem>>
    } else {
    }
    %101 = arith.extui %98 : i1 to i32
    %102 = arith.addi %96, %101 : i32
    %c17 = arith.constant 17 : index
    %103 = memref.load %arg1[%c17] : memref<64xf32, #tpu.memory_space<smem>>
    %104 = arith.cmpf ogt, %103, %0 : f32
    %105 = arith.extui %104 : i1 to i32
    %c0_i32_18 = arith.constant 0 : i32
    %106 = arith.cmpi ne, %105, %c0_i32_18 : i32
    scf.if %106 {
      %c34_66 = arith.constant 34 : index
      %386 = memref.load %arg2[%c34_66] : memref<128xi32, #tpu.memory_space<smem>>
      %387 = arith.index_cast %102 : i32 to index
      %388 = memref.load %arg3[%387] : memref<64xi32, #tpu.memory_space<smem>>
      memref.store %386, %arg3[%387] : memref<64xi32, #tpu.memory_space<smem>>
      %c35_67 = arith.constant 35 : index
      %389 = memref.load %arg2[%c35_67] : memref<128xi32, #tpu.memory_space<smem>>
      %390 = arith.index_cast %102 : i32 to index
      %391 = memref.load %arg4[%390] : memref<64xi32, #tpu.memory_space<smem>>
      memref.store %389, %arg4[%390] : memref<64xi32, #tpu.memory_space<smem>>
      %392 = arith.index_cast %102 : i32 to index
      %393 = memref.load %arg5[%392] : memref<64xf32, #tpu.memory_space<smem>>
      memref.store %103, %arg5[%392] : memref<64xf32, #tpu.memory_space<smem>>
    } else {
    }
    %107 = arith.extui %104 : i1 to i32
    %108 = arith.addi %102, %107 : i32
    %c18 = arith.constant 18 : index
    %109 = memref.load %arg1[%c18] : memref<64xf32, #tpu.memory_space<smem>>
    %110 = arith.cmpf ogt, %109, %0 : f32
    %111 = arith.extui %110 : i1 to i32
    %c0_i32_19 = arith.constant 0 : i32
    %112 = arith.cmpi ne, %111, %c0_i32_19 : i32
    scf.if %112 {
      %c36_66 = arith.constant 36 : index
      %386 = memref.load %arg2[%c36_66] : memref<128xi32, #tpu.memory_space<smem>>
      %387 = arith.index_cast %108 : i32 to index
      %388 = memref.load %arg3[%387] : memref<64xi32, #tpu.memory_space<smem>>
      memref.store %386, %arg3[%387] : memref<64xi32, #tpu.memory_space<smem>>
      %c37_67 = arith.constant 37 : index
      %389 = memref.load %arg2[%c37_67] : memref<128xi32, #tpu.memory_space<smem>>
      %390 = arith.index_cast %108 : i32 to index
      %391 = memref.load %arg4[%390] : memref<64xi32, #tpu.memory_space<smem>>
      memref.store %389, %arg4[%390] : memref<64xi32, #tpu.memory_space<smem>>
      %392 = arith.index_cast %108 : i32 to index
      %393 = memref.load %arg5[%392] : memref<64xf32, #tpu.memory_space<smem>>
      memref.store %109, %arg5[%392] : memref<64xf32, #tpu.memory_space<smem>>
    } else {
    }
    %113 = arith.extui %110 : i1 to i32
    %114 = arith.addi %108, %113 : i32
    %c19 = arith.constant 19 : index
    %115 = memref.load %arg1[%c19] : memref<64xf32, #tpu.memory_space<smem>>
    %116 = arith.cmpf ogt, %115, %0 : f32
    %117 = arith.extui %116 : i1 to i32
    %c0_i32_20 = arith.constant 0 : i32
    %118 = arith.cmpi ne, %117, %c0_i32_20 : i32
    scf.if %118 {
      %c38_66 = arith.constant 38 : index
      %386 = memref.load %arg2[%c38_66] : memref<128xi32, #tpu.memory_space<smem>>
      %387 = arith.index_cast %114 : i32 to index
      %388 = memref.load %arg3[%387] : memref<64xi32, #tpu.memory_space<smem>>
      memref.store %386, %arg3[%387] : memref<64xi32, #tpu.memory_space<smem>>
      %c39_67 = arith.constant 39 : index
      %389 = memref.load %arg2[%c39_67] : memref<128xi32, #tpu.memory_space<smem>>
      %390 = arith.index_cast %114 : i32 to index
      %391 = memref.load %arg4[%390] : memref<64xi32, #tpu.memory_space<smem>>
      memref.store %389, %arg4[%390] : memref<64xi32, #tpu.memory_space<smem>>
      %392 = arith.index_cast %114 : i32 to index
      %393 = memref.load %arg5[%392] : memref<64xf32, #tpu.memory_space<smem>>
      memref.store %115, %arg5[%392] : memref<64xf32, #tpu.memory_space<smem>>
    } else {
    }
    %119 = arith.extui %116 : i1 to i32
    %120 = arith.addi %114, %119 : i32
    %c20 = arith.constant 20 : index
    %121 = memref.load %arg1[%c20] : memref<64xf32, #tpu.memory_space<smem>>
    %122 = arith.cmpf ogt, %121, %0 : f32
    %123 = arith.extui %122 : i1 to i32
    %c0_i32_21 = arith.constant 0 : i32
    %124 = arith.cmpi ne, %123, %c0_i32_21 : i32
    scf.if %124 {
      %c40_66 = arith.constant 40 : index
      %386 = memref.load %arg2[%c40_66] : memref<128xi32, #tpu.memory_space<smem>>
      %387 = arith.index_cast %120 : i32 to index
      %388 = memref.load %arg3[%387] : memref<64xi32, #tpu.memory_space<smem>>
      memref.store %386, %arg3[%387] : memref<64xi32, #tpu.memory_space<smem>>
      %c41_67 = arith.constant 41 : index
      %389 = memref.load %arg2[%c41_67] : memref<128xi32, #tpu.memory_space<smem>>
      %390 = arith.index_cast %120 : i32 to index
      %391 = memref.load %arg4[%390] : memref<64xi32, #tpu.memory_space<smem>>
      memref.store %389, %arg4[%390] : memref<64xi32, #tpu.memory_space<smem>>
      %392 = arith.index_cast %120 : i32 to index
      %393 = memref.load %arg5[%392] : memref<64xf32, #tpu.memory_space<smem>>
      memref.store %121, %arg5[%392] : memref<64xf32, #tpu.memory_space<smem>>
    } else {
    }
    %125 = arith.extui %122 : i1 to i32
    %126 = arith.addi %120, %125 : i32
    %c21 = arith.constant 21 : index
    %127 = memref.load %arg1[%c21] : memref<64xf32, #tpu.memory_space<smem>>
    %128 = arith.cmpf ogt, %127, %0 : f32
    %129 = arith.extui %128 : i1 to i32
    %c0_i32_22 = arith.constant 0 : i32
    %130 = arith.cmpi ne, %129, %c0_i32_22 : i32
    scf.if %130 {
      %c42_66 = arith.constant 42 : index
      %386 = memref.load %arg2[%c42_66] : memref<128xi32, #tpu.memory_space<smem>>
      %387 = arith.index_cast %126 : i32 to index
      %388 = memref.load %arg3[%387] : memref<64xi32, #tpu.memory_space<smem>>
      memref.store %386, %arg3[%387] : memref<64xi32, #tpu.memory_space<smem>>
      %c43_67 = arith.constant 43 : index
      %389 = memref.load %arg2[%c43_67] : memref<128xi32, #tpu.memory_space<smem>>
      %390 = arith.index_cast %126 : i32 to index
      %391 = memref.load %arg4[%390] : memref<64xi32, #tpu.memory_space<smem>>
      memref.store %389, %arg4[%390] : memref<64xi32, #tpu.memory_space<smem>>
      %392 = arith.index_cast %126 : i32 to index
      %393 = memref.load %arg5[%392] : memref<64xf32, #tpu.memory_space<smem>>
      memref.store %127, %arg5[%392] : memref<64xf32, #tpu.memory_space<smem>>
    } else {
    }
    %131 = arith.extui %128 : i1 to i32
    %132 = arith.addi %126, %131 : i32
    %c22 = arith.constant 22 : index
    %133 = memref.load %arg1[%c22] : memref<64xf32, #tpu.memory_space<smem>>
    %134 = arith.cmpf ogt, %133, %0 : f32
    %135 = arith.extui %134 : i1 to i32
    %c0_i32_23 = arith.constant 0 : i32
    %136 = arith.cmpi ne, %135, %c0_i32_23 : i32
    scf.if %136 {
      %c44_66 = arith.constant 44 : index
      %386 = memref.load %arg2[%c44_66] : memref<128xi32, #tpu.memory_space<smem>>
      %387 = arith.index_cast %132 : i32 to index
      %388 = memref.load %arg3[%387] : memref<64xi32, #tpu.memory_space<smem>>
      memref.store %386, %arg3[%387] : memref<64xi32, #tpu.memory_space<smem>>
      %c45_67 = arith.constant 45 : index
      %389 = memref.load %arg2[%c45_67] : memref<128xi32, #tpu.memory_space<smem>>
      %390 = arith.index_cast %132 : i32 to index
      %391 = memref.load %arg4[%390] : memref<64xi32, #tpu.memory_space<smem>>
      memref.store %389, %arg4[%390] : memref<64xi32, #tpu.memory_space<smem>>
      %392 = arith.index_cast %132 : i32 to index
      %393 = memref.load %arg5[%392] : memref<64xf32, #tpu.memory_space<smem>>
      memref.store %133, %arg5[%392] : memref<64xf32, #tpu.memory_space<smem>>
    } else {
    }
    %137 = arith.extui %134 : i1 to i32
    %138 = arith.addi %132, %137 : i32
    %c23 = arith.constant 23 : index
    %139 = memref.load %arg1[%c23] : memref<64xf32, #tpu.memory_space<smem>>
    %140 = arith.cmpf ogt, %139, %0 : f32
    %141 = arith.extui %140 : i1 to i32
    %c0_i32_24 = arith.constant 0 : i32
    %142 = arith.cmpi ne, %141, %c0_i32_24 : i32
    scf.if %142 {
      %c46_66 = arith.constant 46 : index
      %386 = memref.load %arg2[%c46_66] : memref<128xi32, #tpu.memory_space<smem>>
      %387 = arith.index_cast %138 : i32 to index
      %388 = memref.load %arg3[%387] : memref<64xi32, #tpu.memory_space<smem>>
      memref.store %386, %arg3[%387] : memref<64xi32, #tpu.memory_space<smem>>
      %c47_67 = arith.constant 47 : index
      %389 = memref.load %arg2[%c47_67] : memref<128xi32, #tpu.memory_space<smem>>
      %390 = arith.index_cast %138 : i32 to index
      %391 = memref.load %arg4[%390] : memref<64xi32, #tpu.memory_space<smem>>
      memref.store %389, %arg4[%390] : memref<64xi32, #tpu.memory_space<smem>>
      %392 = arith.index_cast %138 : i32 to index
      %393 = memref.load %arg5[%392] : memref<64xf32, #tpu.memory_space<smem>>
      memref.store %139, %arg5[%392] : memref<64xf32, #tpu.memory_space<smem>>
    } else {
    }
    %143 = arith.extui %140 : i1 to i32
    %144 = arith.addi %138, %143 : i32
    %c24 = arith.constant 24 : index
    %145 = memref.load %arg1[%c24] : memref<64xf32, #tpu.memory_space<smem>>
    %146 = arith.cmpf ogt, %145, %0 : f32
    %147 = arith.extui %146 : i1 to i32
    %c0_i32_25 = arith.constant 0 : i32
    %148 = arith.cmpi ne, %147, %c0_i32_25 : i32
    scf.if %148 {
      %c48_66 = arith.constant 48 : index
      %386 = memref.load %arg2[%c48_66] : memref<128xi32, #tpu.memory_space<smem>>
      %387 = arith.index_cast %144 : i32 to index
      %388 = memref.load %arg3[%387] : memref<64xi32, #tpu.memory_space<smem>>
      memref.store %386, %arg3[%387] : memref<64xi32, #tpu.memory_space<smem>>
      %c49_67 = arith.constant 49 : index
      %389 = memref.load %arg2[%c49_67] : memref<128xi32, #tpu.memory_space<smem>>
      %390 = arith.index_cast %144 : i32 to index
      %391 = memref.load %arg4[%390] : memref<64xi32, #tpu.memory_space<smem>>
      memref.store %389, %arg4[%390] : memref<64xi32, #tpu.memory_space<smem>>
      %392 = arith.index_cast %144 : i32 to index
      %393 = memref.load %arg5[%392] : memref<64xf32, #tpu.memory_space<smem>>
      memref.store %145, %arg5[%392] : memref<64xf32, #tpu.memory_space<smem>>
    } else {
    }
    %149 = arith.extui %146 : i1 to i32
    %150 = arith.addi %144, %149 : i32
    %c25 = arith.constant 25 : index
    %151 = memref.load %arg1[%c25] : memref<64xf32, #tpu.memory_space<smem>>
    %152 = arith.cmpf ogt, %151, %0 : f32
    %153 = arith.extui %152 : i1 to i32
    %c0_i32_26 = arith.constant 0 : i32
    %154 = arith.cmpi ne, %153, %c0_i32_26 : i32
    scf.if %154 {
      %c50_66 = arith.constant 50 : index
      %386 = memref.load %arg2[%c50_66] : memref<128xi32, #tpu.memory_space<smem>>
      %387 = arith.index_cast %150 : i32 to index
      %388 = memref.load %arg3[%387] : memref<64xi32, #tpu.memory_space<smem>>
      memref.store %386, %arg3[%387] : memref<64xi32, #tpu.memory_space<smem>>
      %c51_67 = arith.constant 51 : index
      %389 = memref.load %arg2[%c51_67] : memref<128xi32, #tpu.memory_space<smem>>
      %390 = arith.index_cast %150 : i32 to index
      %391 = memref.load %arg4[%390] : memref<64xi32, #tpu.memory_space<smem>>
      memref.store %389, %arg4[%390] : memref<64xi32, #tpu.memory_space<smem>>
      %392 = arith.index_cast %150 : i32 to index
      %393 = memref.load %arg5[%392] : memref<64xf32, #tpu.memory_space<smem>>
      memref.store %151, %arg5[%392] : memref<64xf32, #tpu.memory_space<smem>>
    } else {
    }
    %155 = arith.extui %152 : i1 to i32
    %156 = arith.addi %150, %155 : i32
    %c26 = arith.constant 26 : index
    %157 = memref.load %arg1[%c26] : memref<64xf32, #tpu.memory_space<smem>>
    %158 = arith.cmpf ogt, %157, %0 : f32
    %159 = arith.extui %158 : i1 to i32
    %c0_i32_27 = arith.constant 0 : i32
    %160 = arith.cmpi ne, %159, %c0_i32_27 : i32
    scf.if %160 {
      %c52_66 = arith.constant 52 : index
      %386 = memref.load %arg2[%c52_66] : memref<128xi32, #tpu.memory_space<smem>>
      %387 = arith.index_cast %156 : i32 to index
      %388 = memref.load %arg3[%387] : memref<64xi32, #tpu.memory_space<smem>>
      memref.store %386, %arg3[%387] : memref<64xi32, #tpu.memory_space<smem>>
      %c53_67 = arith.constant 53 : index
      %389 = memref.load %arg2[%c53_67] : memref<128xi32, #tpu.memory_space<smem>>
      %390 = arith.index_cast %156 : i32 to index
      %391 = memref.load %arg4[%390] : memref<64xi32, #tpu.memory_space<smem>>
      memref.store %389, %arg4[%390] : memref<64xi32, #tpu.memory_space<smem>>
      %392 = arith.index_cast %156 : i32 to index
      %393 = memref.load %arg5[%392] : memref<64xf32, #tpu.memory_space<smem>>
      memref.store %157, %arg5[%392] : memref<64xf32, #tpu.memory_space<smem>>
    } else {
    }
    %161 = arith.extui %158 : i1 to i32
    %162 = arith.addi %156, %161 : i32
    %c27 = arith.constant 27 : index
    %163 = memref.load %arg1[%c27] : memref<64xf32, #tpu.memory_space<smem>>
    %164 = arith.cmpf ogt, %163, %0 : f32
    %165 = arith.extui %164 : i1 to i32
    %c0_i32_28 = arith.constant 0 : i32
    %166 = arith.cmpi ne, %165, %c0_i32_28 : i32
    scf.if %166 {
      %c54_66 = arith.constant 54 : index
      %386 = memref.load %arg2[%c54_66] : memref<128xi32, #tpu.memory_space<smem>>
      %387 = arith.index_cast %162 : i32 to index
      %388 = memref.load %arg3[%387] : memref<64xi32, #tpu.memory_space<smem>>
      memref.store %386, %arg3[%387] : memref<64xi32, #tpu.memory_space<smem>>
      %c55_67 = arith.constant 55 : index
      %389 = memref.load %arg2[%c55_67] : memref<128xi32, #tpu.memory_space<smem>>
      %390 = arith.index_cast %162 : i32 to index
      %391 = memref.load %arg4[%390] : memref<64xi32, #tpu.memory_space<smem>>
      memref.store %389, %arg4[%390] : memref<64xi32, #tpu.memory_space<smem>>
      %392 = arith.index_cast %162 : i32 to index
      %393 = memref.load %arg5[%392] : memref<64xf32, #tpu.memory_space<smem>>
      memref.store %163, %arg5[%392] : memref<64xf32, #tpu.memory_space<smem>>
    } else {
    }
    %167 = arith.extui %164 : i1 to i32
    %168 = arith.addi %162, %167 : i32
    %c28 = arith.constant 28 : index
    %169 = memref.load %arg1[%c28] : memref<64xf32, #tpu.memory_space<smem>>
    %170 = arith.cmpf ogt, %169, %0 : f32
    %171 = arith.extui %170 : i1 to i32
    %c0_i32_29 = arith.constant 0 : i32
    %172 = arith.cmpi ne, %171, %c0_i32_29 : i32
    scf.if %172 {
      %c56_66 = arith.constant 56 : index
      %386 = memref.load %arg2[%c56_66] : memref<128xi32, #tpu.memory_space<smem>>
      %387 = arith.index_cast %168 : i32 to index
      %388 = memref.load %arg3[%387] : memref<64xi32, #tpu.memory_space<smem>>
      memref.store %386, %arg3[%387] : memref<64xi32, #tpu.memory_space<smem>>
      %c57_67 = arith.constant 57 : index
      %389 = memref.load %arg2[%c57_67] : memref<128xi32, #tpu.memory_space<smem>>
      %390 = arith.index_cast %168 : i32 to index
      %391 = memref.load %arg4[%390] : memref<64xi32, #tpu.memory_space<smem>>
      memref.store %389, %arg4[%390] : memref<64xi32, #tpu.memory_space<smem>>
      %392 = arith.index_cast %168 : i32 to index
      %393 = memref.load %arg5[%392] : memref<64xf32, #tpu.memory_space<smem>>
      memref.store %169, %arg5[%392] : memref<64xf32, #tpu.memory_space<smem>>
    } else {
    }
    %173 = arith.extui %170 : i1 to i32
    %174 = arith.addi %168, %173 : i32
    %c29 = arith.constant 29 : index
    %175 = memref.load %arg1[%c29] : memref<64xf32, #tpu.memory_space<smem>>
    %176 = arith.cmpf ogt, %175, %0 : f32
    %177 = arith.extui %176 : i1 to i32
    %c0_i32_30 = arith.constant 0 : i32
    %178 = arith.cmpi ne, %177, %c0_i32_30 : i32
    scf.if %178 {
      %c58_66 = arith.constant 58 : index
      %386 = memref.load %arg2[%c58_66] : memref<128xi32, #tpu.memory_space<smem>>
      %387 = arith.index_cast %174 : i32 to index
      %388 = memref.load %arg3[%387] : memref<64xi32, #tpu.memory_space<smem>>
      memref.store %386, %arg3[%387] : memref<64xi32, #tpu.memory_space<smem>>
      %c59_67 = arith.constant 59 : index
      %389 = memref.load %arg2[%c59_67] : memref<128xi32, #tpu.memory_space<smem>>
      %390 = arith.index_cast %174 : i32 to index
      %391 = memref.load %arg4[%390] : memref<64xi32, #tpu.memory_space<smem>>
      memref.store %389, %arg4[%390] : memref<64xi32, #tpu.memory_space<smem>>
      %392 = arith.index_cast %174 : i32 to index
      %393 = memref.load %arg5[%392] : memref<64xf32, #tpu.memory_space<smem>>
      memref.store %175, %arg5[%392] : memref<64xf32, #tpu.memory_space<smem>>
    } else {
    }
    %179 = arith.extui %176 : i1 to i32
    %180 = arith.addi %174, %179 : i32
    %c30 = arith.constant 30 : index
    %181 = memref.load %arg1[%c30] : memref<64xf32, #tpu.memory_space<smem>>
    %182 = arith.cmpf ogt, %181, %0 : f32
    %183 = arith.extui %182 : i1 to i32
    %c0_i32_31 = arith.constant 0 : i32
    %184 = arith.cmpi ne, %183, %c0_i32_31 : i32
    scf.if %184 {
      %c60_66 = arith.constant 60 : index
      %386 = memref.load %arg2[%c60_66] : memref<128xi32, #tpu.memory_space<smem>>
      %387 = arith.index_cast %180 : i32 to index
      %388 = memref.load %arg3[%387] : memref<64xi32, #tpu.memory_space<smem>>
      memref.store %386, %arg3[%387] : memref<64xi32, #tpu.memory_space<smem>>
      %c61_67 = arith.constant 61 : index
      %389 = memref.load %arg2[%c61_67] : memref<128xi32, #tpu.memory_space<smem>>
      %390 = arith.index_cast %180 : i32 to index
      %391 = memref.load %arg4[%390] : memref<64xi32, #tpu.memory_space<smem>>
      memref.store %389, %arg4[%390] : memref<64xi32, #tpu.memory_space<smem>>
      %392 = arith.index_cast %180 : i32 to index
      %393 = memref.load %arg5[%392] : memref<64xf32, #tpu.memory_space<smem>>
      memref.store %181, %arg5[%392] : memref<64xf32, #tpu.memory_space<smem>>
    } else {
    }
    %185 = arith.extui %182 : i1 to i32
    %186 = arith.addi %180, %185 : i32
    %c31 = arith.constant 31 : index
    %187 = memref.load %arg1[%c31] : memref<64xf32, #tpu.memory_space<smem>>
    %188 = arith.cmpf ogt, %187, %0 : f32
    %189 = arith.extui %188 : i1 to i32
    %c0_i32_32 = arith.constant 0 : i32
    %190 = arith.cmpi ne, %189, %c0_i32_32 : i32
    scf.if %190 {
      %c62_66 = arith.constant 62 : index
      %386 = memref.load %arg2[%c62_66] : memref<128xi32, #tpu.memory_space<smem>>
      %387 = arith.index_cast %186 : i32 to index
      %388 = memref.load %arg3[%387] : memref<64xi32, #tpu.memory_space<smem>>
      memref.store %386, %arg3[%387] : memref<64xi32, #tpu.memory_space<smem>>
      %c63_67 = arith.constant 63 : index
      %389 = memref.load %arg2[%c63_67] : memref<128xi32, #tpu.memory_space<smem>>
      %390 = arith.index_cast %186 : i32 to index
      %391 = memref.load %arg4[%390] : memref<64xi32, #tpu.memory_space<smem>>
      memref.store %389, %arg4[%390] : memref<64xi32, #tpu.memory_space<smem>>
      %392 = arith.index_cast %186 : i32 to index
      %393 = memref.load %arg5[%392] : memref<64xf32, #tpu.memory_space<smem>>
      memref.store %187, %arg5[%392] : memref<64xf32, #tpu.memory_space<smem>>
    } else {
    }
    %191 = arith.extui %188 : i1 to i32
    %192 = arith.addi %186, %191 : i32
    %c32 = arith.constant 32 : index
    %193 = memref.load %arg1[%c32] : memref<64xf32, #tpu.memory_space<smem>>
    %194 = arith.cmpf ogt, %193, %0 : f32
    %195 = arith.extui %194 : i1 to i32
    %c0_i32_33 = arith.constant 0 : i32
    %196 = arith.cmpi ne, %195, %c0_i32_33 : i32
    scf.if %196 {
      %c64 = arith.constant 64 : index
      %386 = memref.load %arg2[%c64] : memref<128xi32, #tpu.memory_space<smem>>
      %387 = arith.index_cast %192 : i32 to index
      %388 = memref.load %arg3[%387] : memref<64xi32, #tpu.memory_space<smem>>
      memref.store %386, %arg3[%387] : memref<64xi32, #tpu.memory_space<smem>>
      %c65 = arith.constant 65 : index
      %389 = memref.load %arg2[%c65] : memref<128xi32, #tpu.memory_space<smem>>
      %390 = arith.index_cast %192 : i32 to index
      %391 = memref.load %arg4[%390] : memref<64xi32, #tpu.memory_space<smem>>
      memref.store %389, %arg4[%390] : memref<64xi32, #tpu.memory_space<smem>>
      %392 = arith.index_cast %192 : i32 to index
      %393 = memref.load %arg5[%392] : memref<64xf32, #tpu.memory_space<smem>>
      memref.store %193, %arg5[%392] : memref<64xf32, #tpu.memory_space<smem>>
    } else {
    }
    %197 = arith.extui %194 : i1 to i32
    %198 = arith.addi %192, %197 : i32
    %c33 = arith.constant 33 : index
    %199 = memref.load %arg1[%c33] : memref<64xf32, #tpu.memory_space<smem>>
    %200 = arith.cmpf ogt, %199, %0 : f32
    %201 = arith.extui %200 : i1 to i32
    %c0_i32_34 = arith.constant 0 : i32
    %202 = arith.cmpi ne, %201, %c0_i32_34 : i32
    scf.if %202 {
      %c66 = arith.constant 66 : index
      %386 = memref.load %arg2[%c66] : memref<128xi32, #tpu.memory_space<smem>>
      %387 = arith.index_cast %198 : i32 to index
      %388 = memref.load %arg3[%387] : memref<64xi32, #tpu.memory_space<smem>>
      memref.store %386, %arg3[%387] : memref<64xi32, #tpu.memory_space<smem>>
      %c67 = arith.constant 67 : index
      %389 = memref.load %arg2[%c67] : memref<128xi32, #tpu.memory_space<smem>>
      %390 = arith.index_cast %198 : i32 to index
      %391 = memref.load %arg4[%390] : memref<64xi32, #tpu.memory_space<smem>>
      memref.store %389, %arg4[%390] : memref<64xi32, #tpu.memory_space<smem>>
      %392 = arith.index_cast %198 : i32 to index
      %393 = memref.load %arg5[%392] : memref<64xf32, #tpu.memory_space<smem>>
      memref.store %199, %arg5[%392] : memref<64xf32, #tpu.memory_space<smem>>
    } else {
    }
    %203 = arith.extui %200 : i1 to i32
    %204 = arith.addi %198, %203 : i32
    %c34 = arith.constant 34 : index
    %205 = memref.load %arg1[%c34] : memref<64xf32, #tpu.memory_space<smem>>
    %206 = arith.cmpf ogt, %205, %0 : f32
    %207 = arith.extui %206 : i1 to i32
    %c0_i32_35 = arith.constant 0 : i32
    %208 = arith.cmpi ne, %207, %c0_i32_35 : i32
    scf.if %208 {
      %c68 = arith.constant 68 : index
      %386 = memref.load %arg2[%c68] : memref<128xi32, #tpu.memory_space<smem>>
      %387 = arith.index_cast %204 : i32 to index
      %388 = memref.load %arg3[%387] : memref<64xi32, #tpu.memory_space<smem>>
      memref.store %386, %arg3[%387] : memref<64xi32, #tpu.memory_space<smem>>
      %c69 = arith.constant 69 : index
      %389 = memref.load %arg2[%c69] : memref<128xi32, #tpu.memory_space<smem>>
      %390 = arith.index_cast %204 : i32 to index
      %391 = memref.load %arg4[%390] : memref<64xi32, #tpu.memory_space<smem>>
      memref.store %389, %arg4[%390] : memref<64xi32, #tpu.memory_space<smem>>
      %392 = arith.index_cast %204 : i32 to index
      %393 = memref.load %arg5[%392] : memref<64xf32, #tpu.memory_space<smem>>
      memref.store %205, %arg5[%392] : memref<64xf32, #tpu.memory_space<smem>>
    } else {
    }
    %209 = arith.extui %206 : i1 to i32
    %210 = arith.addi %204, %209 : i32
    %c35 = arith.constant 35 : index
    %211 = memref.load %arg1[%c35] : memref<64xf32, #tpu.memory_space<smem>>
    %212 = arith.cmpf ogt, %211, %0 : f32
    %213 = arith.extui %212 : i1 to i32
    %c0_i32_36 = arith.constant 0 : i32
    %214 = arith.cmpi ne, %213, %c0_i32_36 : i32
    scf.if %214 {
      %c70 = arith.constant 70 : index
      %386 = memref.load %arg2[%c70] : memref<128xi32, #tpu.memory_space<smem>>
      %387 = arith.index_cast %210 : i32 to index
      %388 = memref.load %arg3[%387] : memref<64xi32, #tpu.memory_space<smem>>
      memref.store %386, %arg3[%387] : memref<64xi32, #tpu.memory_space<smem>>
      %c71 = arith.constant 71 : index
      %389 = memref.load %arg2[%c71] : memref<128xi32, #tpu.memory_space<smem>>
      %390 = arith.index_cast %210 : i32 to index
      %391 = memref.load %arg4[%390] : memref<64xi32, #tpu.memory_space<smem>>
      memref.store %389, %arg4[%390] : memref<64xi32, #tpu.memory_space<smem>>
      %392 = arith.index_cast %210 : i32 to index
      %393 = memref.load %arg5[%392] : memref<64xf32, #tpu.memory_space<smem>>
      memref.store %211, %arg5[%392] : memref<64xf32, #tpu.memory_space<smem>>
    } else {
    }
    %215 = arith.extui %212 : i1 to i32
    %216 = arith.addi %210, %215 : i32
    %c36 = arith.constant 36 : index
    %217 = memref.load %arg1[%c36] : memref<64xf32, #tpu.memory_space<smem>>
    %218 = arith.cmpf ogt, %217, %0 : f32
    %219 = arith.extui %218 : i1 to i32
    %c0_i32_37 = arith.constant 0 : i32
    %220 = arith.cmpi ne, %219, %c0_i32_37 : i32
    scf.if %220 {
      %c72 = arith.constant 72 : index
      %386 = memref.load %arg2[%c72] : memref<128xi32, #tpu.memory_space<smem>>
      %387 = arith.index_cast %216 : i32 to index
      %388 = memref.load %arg3[%387] : memref<64xi32, #tpu.memory_space<smem>>
      memref.store %386, %arg3[%387] : memref<64xi32, #tpu.memory_space<smem>>
      %c73 = arith.constant 73 : index
      %389 = memref.load %arg2[%c73] : memref<128xi32, #tpu.memory_space<smem>>
      %390 = arith.index_cast %216 : i32 to index
      %391 = memref.load %arg4[%390] : memref<64xi32, #tpu.memory_space<smem>>
      memref.store %389, %arg4[%390] : memref<64xi32, #tpu.memory_space<smem>>
      %392 = arith.index_cast %216 : i32 to index
      %393 = memref.load %arg5[%392] : memref<64xf32, #tpu.memory_space<smem>>
      memref.store %217, %arg5[%392] : memref<64xf32, #tpu.memory_space<smem>>
    } else {
    }
    %221 = arith.extui %218 : i1 to i32
    %222 = arith.addi %216, %221 : i32
    %c37 = arith.constant 37 : index
    %223 = memref.load %arg1[%c37] : memref<64xf32, #tpu.memory_space<smem>>
    %224 = arith.cmpf ogt, %223, %0 : f32
    %225 = arith.extui %224 : i1 to i32
    %c0_i32_38 = arith.constant 0 : i32
    %226 = arith.cmpi ne, %225, %c0_i32_38 : i32
    scf.if %226 {
      %c74 = arith.constant 74 : index
      %386 = memref.load %arg2[%c74] : memref<128xi32, #tpu.memory_space<smem>>
      %387 = arith.index_cast %222 : i32 to index
      %388 = memref.load %arg3[%387] : memref<64xi32, #tpu.memory_space<smem>>
      memref.store %386, %arg3[%387] : memref<64xi32, #tpu.memory_space<smem>>
      %c75 = arith.constant 75 : index
      %389 = memref.load %arg2[%c75] : memref<128xi32, #tpu.memory_space<smem>>
      %390 = arith.index_cast %222 : i32 to index
      %391 = memref.load %arg4[%390] : memref<64xi32, #tpu.memory_space<smem>>
      memref.store %389, %arg4[%390] : memref<64xi32, #tpu.memory_space<smem>>
      %392 = arith.index_cast %222 : i32 to index
      %393 = memref.load %arg5[%392] : memref<64xf32, #tpu.memory_space<smem>>
      memref.store %223, %arg5[%392] : memref<64xf32, #tpu.memory_space<smem>>
    } else {
    }
    %227 = arith.extui %224 : i1 to i32
    %228 = arith.addi %222, %227 : i32
    %c38 = arith.constant 38 : index
    %229 = memref.load %arg1[%c38] : memref<64xf32, #tpu.memory_space<smem>>
    %230 = arith.cmpf ogt, %229, %0 : f32
    %231 = arith.extui %230 : i1 to i32
    %c0_i32_39 = arith.constant 0 : i32
    %232 = arith.cmpi ne, %231, %c0_i32_39 : i32
    scf.if %232 {
      %c76 = arith.constant 76 : index
      %386 = memref.load %arg2[%c76] : memref<128xi32, #tpu.memory_space<smem>>
      %387 = arith.index_cast %228 : i32 to index
      %388 = memref.load %arg3[%387] : memref<64xi32, #tpu.memory_space<smem>>
      memref.store %386, %arg3[%387] : memref<64xi32, #tpu.memory_space<smem>>
      %c77 = arith.constant 77 : index
      %389 = memref.load %arg2[%c77] : memref<128xi32, #tpu.memory_space<smem>>
      %390 = arith.index_cast %228 : i32 to index
      %391 = memref.load %arg4[%390] : memref<64xi32, #tpu.memory_space<smem>>
      memref.store %389, %arg4[%390] : memref<64xi32, #tpu.memory_space<smem>>
      %392 = arith.index_cast %228 : i32 to index
      %393 = memref.load %arg5[%392] : memref<64xf32, #tpu.memory_space<smem>>
      memref.store %229, %arg5[%392] : memref<64xf32, #tpu.memory_space<smem>>
    } else {
    }
    %233 = arith.extui %230 : i1 to i32
    %234 = arith.addi %228, %233 : i32
    %c39 = arith.constant 39 : index
    %235 = memref.load %arg1[%c39] : memref<64xf32, #tpu.memory_space<smem>>
    %236 = arith.cmpf ogt, %235, %0 : f32
    %237 = arith.extui %236 : i1 to i32
    %c0_i32_40 = arith.constant 0 : i32
    %238 = arith.cmpi ne, %237, %c0_i32_40 : i32
    scf.if %238 {
      %c78 = arith.constant 78 : index
      %386 = memref.load %arg2[%c78] : memref<128xi32, #tpu.memory_space<smem>>
      %387 = arith.index_cast %234 : i32 to index
      %388 = memref.load %arg3[%387] : memref<64xi32, #tpu.memory_space<smem>>
      memref.store %386, %arg3[%387] : memref<64xi32, #tpu.memory_space<smem>>
      %c79 = arith.constant 79 : index
      %389 = memref.load %arg2[%c79] : memref<128xi32, #tpu.memory_space<smem>>
      %390 = arith.index_cast %234 : i32 to index
      %391 = memref.load %arg4[%390] : memref<64xi32, #tpu.memory_space<smem>>
      memref.store %389, %arg4[%390] : memref<64xi32, #tpu.memory_space<smem>>
      %392 = arith.index_cast %234 : i32 to index
      %393 = memref.load %arg5[%392] : memref<64xf32, #tpu.memory_space<smem>>
      memref.store %235, %arg5[%392] : memref<64xf32, #tpu.memory_space<smem>>
    } else {
    }
    %239 = arith.extui %236 : i1 to i32
    %240 = arith.addi %234, %239 : i32
    %c40 = arith.constant 40 : index
    %241 = memref.load %arg1[%c40] : memref<64xf32, #tpu.memory_space<smem>>
    %242 = arith.cmpf ogt, %241, %0 : f32
    %243 = arith.extui %242 : i1 to i32
    %c0_i32_41 = arith.constant 0 : i32
    %244 = arith.cmpi ne, %243, %c0_i32_41 : i32
    scf.if %244 {
      %c80 = arith.constant 80 : index
      %386 = memref.load %arg2[%c80] : memref<128xi32, #tpu.memory_space<smem>>
      %387 = arith.index_cast %240 : i32 to index
      %388 = memref.load %arg3[%387] : memref<64xi32, #tpu.memory_space<smem>>
      memref.store %386, %arg3[%387] : memref<64xi32, #tpu.memory_space<smem>>
      %c81 = arith.constant 81 : index
      %389 = memref.load %arg2[%c81] : memref<128xi32, #tpu.memory_space<smem>>
      %390 = arith.index_cast %240 : i32 to index
      %391 = memref.load %arg4[%390] : memref<64xi32, #tpu.memory_space<smem>>
      memref.store %389, %arg4[%390] : memref<64xi32, #tpu.memory_space<smem>>
      %392 = arith.index_cast %240 : i32 to index
      %393 = memref.load %arg5[%392] : memref<64xf32, #tpu.memory_space<smem>>
      memref.store %241, %arg5[%392] : memref<64xf32, #tpu.memory_space<smem>>
    } else {
    }
    %245 = arith.extui %242 : i1 to i32
    %246 = arith.addi %240, %245 : i32
    %c41 = arith.constant 41 : index
    %247 = memref.load %arg1[%c41] : memref<64xf32, #tpu.memory_space<smem>>
    %248 = arith.cmpf ogt, %247, %0 : f32
    %249 = arith.extui %248 : i1 to i32
    %c0_i32_42 = arith.constant 0 : i32
    %250 = arith.cmpi ne, %249, %c0_i32_42 : i32
    scf.if %250 {
      %c82 = arith.constant 82 : index
      %386 = memref.load %arg2[%c82] : memref<128xi32, #tpu.memory_space<smem>>
      %387 = arith.index_cast %246 : i32 to index
      %388 = memref.load %arg3[%387] : memref<64xi32, #tpu.memory_space<smem>>
      memref.store %386, %arg3[%387] : memref<64xi32, #tpu.memory_space<smem>>
      %c83 = arith.constant 83 : index
      %389 = memref.load %arg2[%c83] : memref<128xi32, #tpu.memory_space<smem>>
      %390 = arith.index_cast %246 : i32 to index
      %391 = memref.load %arg4[%390] : memref<64xi32, #tpu.memory_space<smem>>
      memref.store %389, %arg4[%390] : memref<64xi32, #tpu.memory_space<smem>>
      %392 = arith.index_cast %246 : i32 to index
      %393 = memref.load %arg5[%392] : memref<64xf32, #tpu.memory_space<smem>>
      memref.store %247, %arg5[%392] : memref<64xf32, #tpu.memory_space<smem>>
    } else {
    }
    %251 = arith.extui %248 : i1 to i32
    %252 = arith.addi %246, %251 : i32
    %c42 = arith.constant 42 : index
    %253 = memref.load %arg1[%c42] : memref<64xf32, #tpu.memory_space<smem>>
    %254 = arith.cmpf ogt, %253, %0 : f32
    %255 = arith.extui %254 : i1 to i32
    %c0_i32_43 = arith.constant 0 : i32
    %256 = arith.cmpi ne, %255, %c0_i32_43 : i32
    scf.if %256 {
      %c84 = arith.constant 84 : index
      %386 = memref.load %arg2[%c84] : memref<128xi32, #tpu.memory_space<smem>>
      %387 = arith.index_cast %252 : i32 to index
      %388 = memref.load %arg3[%387] : memref<64xi32, #tpu.memory_space<smem>>
      memref.store %386, %arg3[%387] : memref<64xi32, #tpu.memory_space<smem>>
      %c85 = arith.constant 85 : index
      %389 = memref.load %arg2[%c85] : memref<128xi32, #tpu.memory_space<smem>>
      %390 = arith.index_cast %252 : i32 to index
      %391 = memref.load %arg4[%390] : memref<64xi32, #tpu.memory_space<smem>>
      memref.store %389, %arg4[%390] : memref<64xi32, #tpu.memory_space<smem>>
      %392 = arith.index_cast %252 : i32 to index
      %393 = memref.load %arg5[%392] : memref<64xf32, #tpu.memory_space<smem>>
      memref.store %253, %arg5[%392] : memref<64xf32, #tpu.memory_space<smem>>
    } else {
    }
    %257 = arith.extui %254 : i1 to i32
    %258 = arith.addi %252, %257 : i32
    %c43 = arith.constant 43 : index
    %259 = memref.load %arg1[%c43] : memref<64xf32, #tpu.memory_space<smem>>
    %260 = arith.cmpf ogt, %259, %0 : f32
    %261 = arith.extui %260 : i1 to i32
    %c0_i32_44 = arith.constant 0 : i32
    %262 = arith.cmpi ne, %261, %c0_i32_44 : i32
    scf.if %262 {
      %c86 = arith.constant 86 : index
      %386 = memref.load %arg2[%c86] : memref<128xi32, #tpu.memory_space<smem>>
      %387 = arith.index_cast %258 : i32 to index
      %388 = memref.load %arg3[%387] : memref<64xi32, #tpu.memory_space<smem>>
      memref.store %386, %arg3[%387] : memref<64xi32, #tpu.memory_space<smem>>
      %c87 = arith.constant 87 : index
      %389 = memref.load %arg2[%c87] : memref<128xi32, #tpu.memory_space<smem>>
      %390 = arith.index_cast %258 : i32 to index
      %391 = memref.load %arg4[%390] : memref<64xi32, #tpu.memory_space<smem>>
      memref.store %389, %arg4[%390] : memref<64xi32, #tpu.memory_space<smem>>
      %392 = arith.index_cast %258 : i32 to index
      %393 = memref.load %arg5[%392] : memref<64xf32, #tpu.memory_space<smem>>
      memref.store %259, %arg5[%392] : memref<64xf32, #tpu.memory_space<smem>>
    } else {
    }
    %263 = arith.extui %260 : i1 to i32
    %264 = arith.addi %258, %263 : i32
    %c44 = arith.constant 44 : index
    %265 = memref.load %arg1[%c44] : memref<64xf32, #tpu.memory_space<smem>>
    %266 = arith.cmpf ogt, %265, %0 : f32
    %267 = arith.extui %266 : i1 to i32
    %c0_i32_45 = arith.constant 0 : i32
    %268 = arith.cmpi ne, %267, %c0_i32_45 : i32
    scf.if %268 {
      %c88 = arith.constant 88 : index
      %386 = memref.load %arg2[%c88] : memref<128xi32, #tpu.memory_space<smem>>
      %387 = arith.index_cast %264 : i32 to index
      %388 = memref.load %arg3[%387] : memref<64xi32, #tpu.memory_space<smem>>
      memref.store %386, %arg3[%387] : memref<64xi32, #tpu.memory_space<smem>>
      %c89 = arith.constant 89 : index
      %389 = memref.load %arg2[%c89] : memref<128xi32, #tpu.memory_space<smem>>
      %390 = arith.index_cast %264 : i32 to index
      %391 = memref.load %arg4[%390] : memref<64xi32, #tpu.memory_space<smem>>
      memref.store %389, %arg4[%390] : memref<64xi32, #tpu.memory_space<smem>>
      %392 = arith.index_cast %264 : i32 to index
      %393 = memref.load %arg5[%392] : memref<64xf32, #tpu.memory_space<smem>>
      memref.store %265, %arg5[%392] : memref<64xf32, #tpu.memory_space<smem>>
    } else {
    }
    %269 = arith.extui %266 : i1 to i32
    %270 = arith.addi %264, %269 : i32
    %c45 = arith.constant 45 : index
    %271 = memref.load %arg1[%c45] : memref<64xf32, #tpu.memory_space<smem>>
    %272 = arith.cmpf ogt, %271, %0 : f32
    %273 = arith.extui %272 : i1 to i32
    %c0_i32_46 = arith.constant 0 : i32
    %274 = arith.cmpi ne, %273, %c0_i32_46 : i32
    scf.if %274 {
      %c90 = arith.constant 90 : index
      %386 = memref.load %arg2[%c90] : memref<128xi32, #tpu.memory_space<smem>>
      %387 = arith.index_cast %270 : i32 to index
      %388 = memref.load %arg3[%387] : memref<64xi32, #tpu.memory_space<smem>>
      memref.store %386, %arg3[%387] : memref<64xi32, #tpu.memory_space<smem>>
      %c91 = arith.constant 91 : index
      %389 = memref.load %arg2[%c91] : memref<128xi32, #tpu.memory_space<smem>>
      %390 = arith.index_cast %270 : i32 to index
      %391 = memref.load %arg4[%390] : memref<64xi32, #tpu.memory_space<smem>>
      memref.store %389, %arg4[%390] : memref<64xi32, #tpu.memory_space<smem>>
      %392 = arith.index_cast %270 : i32 to index
      %393 = memref.load %arg5[%392] : memref<64xf32, #tpu.memory_space<smem>>
      memref.store %271, %arg5[%392] : memref<64xf32, #tpu.memory_space<smem>>
    } else {
    }
    %275 = arith.extui %272 : i1 to i32
    %276 = arith.addi %270, %275 : i32
    %c46 = arith.constant 46 : index
    %277 = memref.load %arg1[%c46] : memref<64xf32, #tpu.memory_space<smem>>
    %278 = arith.cmpf ogt, %277, %0 : f32
    %279 = arith.extui %278 : i1 to i32
    %c0_i32_47 = arith.constant 0 : i32
    %280 = arith.cmpi ne, %279, %c0_i32_47 : i32
    scf.if %280 {
      %c92 = arith.constant 92 : index
      %386 = memref.load %arg2[%c92] : memref<128xi32, #tpu.memory_space<smem>>
      %387 = arith.index_cast %276 : i32 to index
      %388 = memref.load %arg3[%387] : memref<64xi32, #tpu.memory_space<smem>>
      memref.store %386, %arg3[%387] : memref<64xi32, #tpu.memory_space<smem>>
      %c93 = arith.constant 93 : index
      %389 = memref.load %arg2[%c93] : memref<128xi32, #tpu.memory_space<smem>>
      %390 = arith.index_cast %276 : i32 to index
      %391 = memref.load %arg4[%390] : memref<64xi32, #tpu.memory_space<smem>>
      memref.store %389, %arg4[%390] : memref<64xi32, #tpu.memory_space<smem>>
      %392 = arith.index_cast %276 : i32 to index
      %393 = memref.load %arg5[%392] : memref<64xf32, #tpu.memory_space<smem>>
      memref.store %277, %arg5[%392] : memref<64xf32, #tpu.memory_space<smem>>
    } else {
    }
    %281 = arith.extui %278 : i1 to i32
    %282 = arith.addi %276, %281 : i32
    %c47 = arith.constant 47 : index
    %283 = memref.load %arg1[%c47] : memref<64xf32, #tpu.memory_space<smem>>
    %284 = arith.cmpf ogt, %283, %0 : f32
    %285 = arith.extui %284 : i1 to i32
    %c0_i32_48 = arith.constant 0 : i32
    %286 = arith.cmpi ne, %285, %c0_i32_48 : i32
    scf.if %286 {
      %c94 = arith.constant 94 : index
      %386 = memref.load %arg2[%c94] : memref<128xi32, #tpu.memory_space<smem>>
      %387 = arith.index_cast %282 : i32 to index
      %388 = memref.load %arg3[%387] : memref<64xi32, #tpu.memory_space<smem>>
      memref.store %386, %arg3[%387] : memref<64xi32, #tpu.memory_space<smem>>
      %c95 = arith.constant 95 : index
      %389 = memref.load %arg2[%c95] : memref<128xi32, #tpu.memory_space<smem>>
      %390 = arith.index_cast %282 : i32 to index
      %391 = memref.load %arg4[%390] : memref<64xi32, #tpu.memory_space<smem>>
      memref.store %389, %arg4[%390] : memref<64xi32, #tpu.memory_space<smem>>
      %392 = arith.index_cast %282 : i32 to index
      %393 = memref.load %arg5[%392] : memref<64xf32, #tpu.memory_space<smem>>
      memref.store %283, %arg5[%392] : memref<64xf32, #tpu.memory_space<smem>>
    } else {
    }
    %287 = arith.extui %284 : i1 to i32
    %288 = arith.addi %282, %287 : i32
    %c48 = arith.constant 48 : index
    %289 = memref.load %arg1[%c48] : memref<64xf32, #tpu.memory_space<smem>>
    %290 = arith.cmpf ogt, %289, %0 : f32
    %291 = arith.extui %290 : i1 to i32
    %c0_i32_49 = arith.constant 0 : i32
    %292 = arith.cmpi ne, %291, %c0_i32_49 : i32
    scf.if %292 {
      %c96 = arith.constant 96 : index
      %386 = memref.load %arg2[%c96] : memref<128xi32, #tpu.memory_space<smem>>
      %387 = arith.index_cast %288 : i32 to index
      %388 = memref.load %arg3[%387] : memref<64xi32, #tpu.memory_space<smem>>
      memref.store %386, %arg3[%387] : memref<64xi32, #tpu.memory_space<smem>>
      %c97 = arith.constant 97 : index
      %389 = memref.load %arg2[%c97] : memref<128xi32, #tpu.memory_space<smem>>
      %390 = arith.index_cast %288 : i32 to index
      %391 = memref.load %arg4[%390] : memref<64xi32, #tpu.memory_space<smem>>
      memref.store %389, %arg4[%390] : memref<64xi32, #tpu.memory_space<smem>>
      %392 = arith.index_cast %288 : i32 to index
      %393 = memref.load %arg5[%392] : memref<64xf32, #tpu.memory_space<smem>>
      memref.store %289, %arg5[%392] : memref<64xf32, #tpu.memory_space<smem>>
    } else {
    }
    %293 = arith.extui %290 : i1 to i32
    %294 = arith.addi %288, %293 : i32
    %c49 = arith.constant 49 : index
    %295 = memref.load %arg1[%c49] : memref<64xf32, #tpu.memory_space<smem>>
    %296 = arith.cmpf ogt, %295, %0 : f32
    %297 = arith.extui %296 : i1 to i32
    %c0_i32_50 = arith.constant 0 : i32
    %298 = arith.cmpi ne, %297, %c0_i32_50 : i32
    scf.if %298 {
      %c98 = arith.constant 98 : index
      %386 = memref.load %arg2[%c98] : memref<128xi32, #tpu.memory_space<smem>>
      %387 = arith.index_cast %294 : i32 to index
      %388 = memref.load %arg3[%387] : memref<64xi32, #tpu.memory_space<smem>>
      memref.store %386, %arg3[%387] : memref<64xi32, #tpu.memory_space<smem>>
      %c99 = arith.constant 99 : index
      %389 = memref.load %arg2[%c99] : memref<128xi32, #tpu.memory_space<smem>>
      %390 = arith.index_cast %294 : i32 to index
      %391 = memref.load %arg4[%390] : memref<64xi32, #tpu.memory_space<smem>>
      memref.store %389, %arg4[%390] : memref<64xi32, #tpu.memory_space<smem>>
      %392 = arith.index_cast %294 : i32 to index
      %393 = memref.load %arg5[%392] : memref<64xf32, #tpu.memory_space<smem>>
      memref.store %295, %arg5[%392] : memref<64xf32, #tpu.memory_space<smem>>
    } else {
    }
    %299 = arith.extui %296 : i1 to i32
    %300 = arith.addi %294, %299 : i32
    %c50 = arith.constant 50 : index
    %301 = memref.load %arg1[%c50] : memref<64xf32, #tpu.memory_space<smem>>
    %302 = arith.cmpf ogt, %301, %0 : f32
    %303 = arith.extui %302 : i1 to i32
    %c0_i32_51 = arith.constant 0 : i32
    %304 = arith.cmpi ne, %303, %c0_i32_51 : i32
    scf.if %304 {
      %c100 = arith.constant 100 : index
      %386 = memref.load %arg2[%c100] : memref<128xi32, #tpu.memory_space<smem>>
      %387 = arith.index_cast %300 : i32 to index
      %388 = memref.load %arg3[%387] : memref<64xi32, #tpu.memory_space<smem>>
      memref.store %386, %arg3[%387] : memref<64xi32, #tpu.memory_space<smem>>
      %c101 = arith.constant 101 : index
      %389 = memref.load %arg2[%c101] : memref<128xi32, #tpu.memory_space<smem>>
      %390 = arith.index_cast %300 : i32 to index
      %391 = memref.load %arg4[%390] : memref<64xi32, #tpu.memory_space<smem>>
      memref.store %389, %arg4[%390] : memref<64xi32, #tpu.memory_space<smem>>
      %392 = arith.index_cast %300 : i32 to index
      %393 = memref.load %arg5[%392] : memref<64xf32, #tpu.memory_space<smem>>
      memref.store %301, %arg5[%392] : memref<64xf32, #tpu.memory_space<smem>>
    } else {
    }
    %305 = arith.extui %302 : i1 to i32
    %306 = arith.addi %300, %305 : i32
    %c51 = arith.constant 51 : index
    %307 = memref.load %arg1[%c51] : memref<64xf32, #tpu.memory_space<smem>>
    %308 = arith.cmpf ogt, %307, %0 : f32
    %309 = arith.extui %308 : i1 to i32
    %c0_i32_52 = arith.constant 0 : i32
    %310 = arith.cmpi ne, %309, %c0_i32_52 : i32
    scf.if %310 {
      %c102 = arith.constant 102 : index
      %386 = memref.load %arg2[%c102] : memref<128xi32, #tpu.memory_space<smem>>
      %387 = arith.index_cast %306 : i32 to index
      %388 = memref.load %arg3[%387] : memref<64xi32, #tpu.memory_space<smem>>
      memref.store %386, %arg3[%387] : memref<64xi32, #tpu.memory_space<smem>>
      %c103 = arith.constant 103 : index
      %389 = memref.load %arg2[%c103] : memref<128xi32, #tpu.memory_space<smem>>
      %390 = arith.index_cast %306 : i32 to index
      %391 = memref.load %arg4[%390] : memref<64xi32, #tpu.memory_space<smem>>
      memref.store %389, %arg4[%390] : memref<64xi32, #tpu.memory_space<smem>>
      %392 = arith.index_cast %306 : i32 to index
      %393 = memref.load %arg5[%392] : memref<64xf32, #tpu.memory_space<smem>>
      memref.store %307, %arg5[%392] : memref<64xf32, #tpu.memory_space<smem>>
    } else {
    }
    %311 = arith.extui %308 : i1 to i32
    %312 = arith.addi %306, %311 : i32
    %c52 = arith.constant 52 : index
    %313 = memref.load %arg1[%c52] : memref<64xf32, #tpu.memory_space<smem>>
    %314 = arith.cmpf ogt, %313, %0 : f32
    %315 = arith.extui %314 : i1 to i32
    %c0_i32_53 = arith.constant 0 : i32
    %316 = arith.cmpi ne, %315, %c0_i32_53 : i32
    scf.if %316 {
      %c104 = arith.constant 104 : index
      %386 = memref.load %arg2[%c104] : memref<128xi32, #tpu.memory_space<smem>>
      %387 = arith.index_cast %312 : i32 to index
      %388 = memref.load %arg3[%387] : memref<64xi32, #tpu.memory_space<smem>>
      memref.store %386, %arg3[%387] : memref<64xi32, #tpu.memory_space<smem>>
      %c105 = arith.constant 105 : index
      %389 = memref.load %arg2[%c105] : memref<128xi32, #tpu.memory_space<smem>>
      %390 = arith.index_cast %312 : i32 to index
      %391 = memref.load %arg4[%390] : memref<64xi32, #tpu.memory_space<smem>>
      memref.store %389, %arg4[%390] : memref<64xi32, #tpu.memory_space<smem>>
      %392 = arith.index_cast %312 : i32 to index
      %393 = memref.load %arg5[%392] : memref<64xf32, #tpu.memory_space<smem>>
      memref.store %313, %arg5[%392] : memref<64xf32, #tpu.memory_space<smem>>
    } else {
    }
    %317 = arith.extui %314 : i1 to i32
    %318 = arith.addi %312, %317 : i32
    %c53 = arith.constant 53 : index
    %319 = memref.load %arg1[%c53] : memref<64xf32, #tpu.memory_space<smem>>
    %320 = arith.cmpf ogt, %319, %0 : f32
    %321 = arith.extui %320 : i1 to i32
    %c0_i32_54 = arith.constant 0 : i32
    %322 = arith.cmpi ne, %321, %c0_i32_54 : i32
    scf.if %322 {
      %c106 = arith.constant 106 : index
      %386 = memref.load %arg2[%c106] : memref<128xi32, #tpu.memory_space<smem>>
      %387 = arith.index_cast %318 : i32 to index
      %388 = memref.load %arg3[%387] : memref<64xi32, #tpu.memory_space<smem>>
      memref.store %386, %arg3[%387] : memref<64xi32, #tpu.memory_space<smem>>
      %c107 = arith.constant 107 : index
      %389 = memref.load %arg2[%c107] : memref<128xi32, #tpu.memory_space<smem>>
      %390 = arith.index_cast %318 : i32 to index
      %391 = memref.load %arg4[%390] : memref<64xi32, #tpu.memory_space<smem>>
      memref.store %389, %arg4[%390] : memref<64xi32, #tpu.memory_space<smem>>
      %392 = arith.index_cast %318 : i32 to index
      %393 = memref.load %arg5[%392] : memref<64xf32, #tpu.memory_space<smem>>
      memref.store %319, %arg5[%392] : memref<64xf32, #tpu.memory_space<smem>>
    } else {
    }
    %323 = arith.extui %320 : i1 to i32
    %324 = arith.addi %318, %323 : i32
    %c54 = arith.constant 54 : index
    %325 = memref.load %arg1[%c54] : memref<64xf32, #tpu.memory_space<smem>>
    %326 = arith.cmpf ogt, %325, %0 : f32
    %327 = arith.extui %326 : i1 to i32
    %c0_i32_55 = arith.constant 0 : i32
    %328 = arith.cmpi ne, %327, %c0_i32_55 : i32
    scf.if %328 {
      %c108 = arith.constant 108 : index
      %386 = memref.load %arg2[%c108] : memref<128xi32, #tpu.memory_space<smem>>
      %387 = arith.index_cast %324 : i32 to index
      %388 = memref.load %arg3[%387] : memref<64xi32, #tpu.memory_space<smem>>
      memref.store %386, %arg3[%387] : memref<64xi32, #tpu.memory_space<smem>>
      %c109 = arith.constant 109 : index
      %389 = memref.load %arg2[%c109] : memref<128xi32, #tpu.memory_space<smem>>
      %390 = arith.index_cast %324 : i32 to index
      %391 = memref.load %arg4[%390] : memref<64xi32, #tpu.memory_space<smem>>
      memref.store %389, %arg4[%390] : memref<64xi32, #tpu.memory_space<smem>>
      %392 = arith.index_cast %324 : i32 to index
      %393 = memref.load %arg5[%392] : memref<64xf32, #tpu.memory_space<smem>>
      memref.store %325, %arg5[%392] : memref<64xf32, #tpu.memory_space<smem>>
    } else {
    }
    %329 = arith.extui %326 : i1 to i32
    %330 = arith.addi %324, %329 : i32
    %c55 = arith.constant 55 : index
    %331 = memref.load %arg1[%c55] : memref<64xf32, #tpu.memory_space<smem>>
    %332 = arith.cmpf ogt, %331, %0 : f32
    %333 = arith.extui %332 : i1 to i32
    %c0_i32_56 = arith.constant 0 : i32
    %334 = arith.cmpi ne, %333, %c0_i32_56 : i32
    scf.if %334 {
      %c110 = arith.constant 110 : index
      %386 = memref.load %arg2[%c110] : memref<128xi32, #tpu.memory_space<smem>>
      %387 = arith.index_cast %330 : i32 to index
      %388 = memref.load %arg3[%387] : memref<64xi32, #tpu.memory_space<smem>>
      memref.store %386, %arg3[%387] : memref<64xi32, #tpu.memory_space<smem>>
      %c111 = arith.constant 111 : index
      %389 = memref.load %arg2[%c111] : memref<128xi32, #tpu.memory_space<smem>>
      %390 = arith.index_cast %330 : i32 to index
      %391 = memref.load %arg4[%390] : memref<64xi32, #tpu.memory_space<smem>>
      memref.store %389, %arg4[%390] : memref<64xi32, #tpu.memory_space<smem>>
      %392 = arith.index_cast %330 : i32 to index
      %393 = memref.load %arg5[%392] : memref<64xf32, #tpu.memory_space<smem>>
      memref.store %331, %arg5[%392] : memref<64xf32, #tpu.memory_space<smem>>
    } else {
    }
    %335 = arith.extui %332 : i1 to i32
    %336 = arith.addi %330, %335 : i32
    %c56 = arith.constant 56 : index
    %337 = memref.load %arg1[%c56] : memref<64xf32, #tpu.memory_space<smem>>
    %338 = arith.cmpf ogt, %337, %0 : f32
    %339 = arith.extui %338 : i1 to i32
    %c0_i32_57 = arith.constant 0 : i32
    %340 = arith.cmpi ne, %339, %c0_i32_57 : i32
    scf.if %340 {
      %c112 = arith.constant 112 : index
      %386 = memref.load %arg2[%c112] : memref<128xi32, #tpu.memory_space<smem>>
      %387 = arith.index_cast %336 : i32 to index
      %388 = memref.load %arg3[%387] : memref<64xi32, #tpu.memory_space<smem>>
      memref.store %386, %arg3[%387] : memref<64xi32, #tpu.memory_space<smem>>
      %c113 = arith.constant 113 : index
      %389 = memref.load %arg2[%c113] : memref<128xi32, #tpu.memory_space<smem>>
      %390 = arith.index_cast %336 : i32 to index
      %391 = memref.load %arg4[%390] : memref<64xi32, #tpu.memory_space<smem>>
      memref.store %389, %arg4[%390] : memref<64xi32, #tpu.memory_space<smem>>
      %392 = arith.index_cast %336 : i32 to index
      %393 = memref.load %arg5[%392] : memref<64xf32, #tpu.memory_space<smem>>
      memref.store %337, %arg5[%392] : memref<64xf32, #tpu.memory_space<smem>>
    } else {
    }
    %341 = arith.extui %338 : i1 to i32
    %342 = arith.addi %336, %341 : i32
    %c57 = arith.constant 57 : index
    %343 = memref.load %arg1[%c57] : memref<64xf32, #tpu.memory_space<smem>>
    %344 = arith.cmpf ogt, %343, %0 : f32
    %345 = arith.extui %344 : i1 to i32
    %c0_i32_58 = arith.constant 0 : i32
    %346 = arith.cmpi ne, %345, %c0_i32_58 : i32
    scf.if %346 {
      %c114 = arith.constant 114 : index
      %386 = memref.load %arg2[%c114] : memref<128xi32, #tpu.memory_space<smem>>
      %387 = arith.index_cast %342 : i32 to index
      %388 = memref.load %arg3[%387] : memref<64xi32, #tpu.memory_space<smem>>
      memref.store %386, %arg3[%387] : memref<64xi32, #tpu.memory_space<smem>>
      %c115 = arith.constant 115 : index
      %389 = memref.load %arg2[%c115] : memref<128xi32, #tpu.memory_space<smem>>
      %390 = arith.index_cast %342 : i32 to index
      %391 = memref.load %arg4[%390] : memref<64xi32, #tpu.memory_space<smem>>
      memref.store %389, %arg4[%390] : memref<64xi32, #tpu.memory_space<smem>>
      %392 = arith.index_cast %342 : i32 to index
      %393 = memref.load %arg5[%392] : memref<64xf32, #tpu.memory_space<smem>>
      memref.store %343, %arg5[%392] : memref<64xf32, #tpu.memory_space<smem>>
    } else {
    }
    %347 = arith.extui %344 : i1 to i32
    %348 = arith.addi %342, %347 : i32
    %c58 = arith.constant 58 : index
    %349 = memref.load %arg1[%c58] : memref<64xf32, #tpu.memory_space<smem>>
    %350 = arith.cmpf ogt, %349, %0 : f32
    %351 = arith.extui %350 : i1 to i32
    %c0_i32_59 = arith.constant 0 : i32
    %352 = arith.cmpi ne, %351, %c0_i32_59 : i32
    scf.if %352 {
      %c116 = arith.constant 116 : index
      %386 = memref.load %arg2[%c116] : memref<128xi32, #tpu.memory_space<smem>>
      %387 = arith.index_cast %348 : i32 to index
      %388 = memref.load %arg3[%387] : memref<64xi32, #tpu.memory_space<smem>>
      memref.store %386, %arg3[%387] : memref<64xi32, #tpu.memory_space<smem>>
      %c117 = arith.constant 117 : index
      %389 = memref.load %arg2[%c117] : memref<128xi32, #tpu.memory_space<smem>>
      %390 = arith.index_cast %348 : i32 to index
      %391 = memref.load %arg4[%390] : memref<64xi32, #tpu.memory_space<smem>>
      memref.store %389, %arg4[%390] : memref<64xi32, #tpu.memory_space<smem>>
      %392 = arith.index_cast %348 : i32 to index
      %393 = memref.load %arg5[%392] : memref<64xf32, #tpu.memory_space<smem>>
      memref.store %349, %arg5[%392] : memref<64xf32, #tpu.memory_space<smem>>
    } else {
    }
    %353 = arith.extui %350 : i1 to i32
    %354 = arith.addi %348, %353 : i32
    %c59 = arith.constant 59 : index
    %355 = memref.load %arg1[%c59] : memref<64xf32, #tpu.memory_space<smem>>
    %356 = arith.cmpf ogt, %355, %0 : f32
    %357 = arith.extui %356 : i1 to i32
    %c0_i32_60 = arith.constant 0 : i32
    %358 = arith.cmpi ne, %357, %c0_i32_60 : i32
    scf.if %358 {
      %c118 = arith.constant 118 : index
      %386 = memref.load %arg2[%c118] : memref<128xi32, #tpu.memory_space<smem>>
      %387 = arith.index_cast %354 : i32 to index
      %388 = memref.load %arg3[%387] : memref<64xi32, #tpu.memory_space<smem>>
      memref.store %386, %arg3[%387] : memref<64xi32, #tpu.memory_space<smem>>
      %c119 = arith.constant 119 : index
      %389 = memref.load %arg2[%c119] : memref<128xi32, #tpu.memory_space<smem>>
      %390 = arith.index_cast %354 : i32 to index
      %391 = memref.load %arg4[%390] : memref<64xi32, #tpu.memory_space<smem>>
      memref.store %389, %arg4[%390] : memref<64xi32, #tpu.memory_space<smem>>
      %392 = arith.index_cast %354 : i32 to index
      %393 = memref.load %arg5[%392] : memref<64xf32, #tpu.memory_space<smem>>
      memref.store %355, %arg5[%392] : memref<64xf32, #tpu.memory_space<smem>>
    } else {
    }
    %359 = arith.extui %356 : i1 to i32
    %360 = arith.addi %354, %359 : i32
    %c60 = arith.constant 60 : index
    %361 = memref.load %arg1[%c60] : memref<64xf32, #tpu.memory_space<smem>>
    %362 = arith.cmpf ogt, %361, %0 : f32
    %363 = arith.extui %362 : i1 to i32
    %c0_i32_61 = arith.constant 0 : i32
    %364 = arith.cmpi ne, %363, %c0_i32_61 : i32
    scf.if %364 {
      %c120 = arith.constant 120 : index
      %386 = memref.load %arg2[%c120] : memref<128xi32, #tpu.memory_space<smem>>
      %387 = arith.index_cast %360 : i32 to index
      %388 = memref.load %arg3[%387] : memref<64xi32, #tpu.memory_space<smem>>
      memref.store %386, %arg3[%387] : memref<64xi32, #tpu.memory_space<smem>>
      %c121 = arith.constant 121 : index
      %389 = memref.load %arg2[%c121] : memref<128xi32, #tpu.memory_space<smem>>
      %390 = arith.index_cast %360 : i32 to index
      %391 = memref.load %arg4[%390] : memref<64xi32, #tpu.memory_space<smem>>
      memref.store %389, %arg4[%390] : memref<64xi32, #tpu.memory_space<smem>>
      %392 = arith.index_cast %360 : i32 to index
      %393 = memref.load %arg5[%392] : memref<64xf32, #tpu.memory_space<smem>>
      memref.store %361, %arg5[%392] : memref<64xf32, #tpu.memory_space<smem>>
    } else {
    }
    %365 = arith.extui %362 : i1 to i32
    %366 = arith.addi %360, %365 : i32
    %c61 = arith.constant 61 : index
    %367 = memref.load %arg1[%c61] : memref<64xf32, #tpu.memory_space<smem>>
    %368 = arith.cmpf ogt, %367, %0 : f32
    %369 = arith.extui %368 : i1 to i32
    %c0_i32_62 = arith.constant 0 : i32
    %370 = arith.cmpi ne, %369, %c0_i32_62 : i32
    scf.if %370 {
      %c122 = arith.constant 122 : index
      %386 = memref.load %arg2[%c122] : memref<128xi32, #tpu.memory_space<smem>>
      %387 = arith.index_cast %366 : i32 to index
      %388 = memref.load %arg3[%387] : memref<64xi32, #tpu.memory_space<smem>>
      memref.store %386, %arg3[%387] : memref<64xi32, #tpu.memory_space<smem>>
      %c123 = arith.constant 123 : index
      %389 = memref.load %arg2[%c123] : memref<128xi32, #tpu.memory_space<smem>>
      %390 = arith.index_cast %366 : i32 to index
      %391 = memref.load %arg4[%390] : memref<64xi32, #tpu.memory_space<smem>>
      memref.store %389, %arg4[%390] : memref<64xi32, #tpu.memory_space<smem>>
      %392 = arith.index_cast %366 : i32 to index
      %393 = memref.load %arg5[%392] : memref<64xf32, #tpu.memory_space<smem>>
      memref.store %367, %arg5[%392] : memref<64xf32, #tpu.memory_space<smem>>
    } else {
    }
    %371 = arith.extui %368 : i1 to i32
    %372 = arith.addi %366, %371 : i32
    %c62 = arith.constant 62 : index
    %373 = memref.load %arg1[%c62] : memref<64xf32, #tpu.memory_space<smem>>
    %374 = arith.cmpf ogt, %373, %0 : f32
    %375 = arith.extui %374 : i1 to i32
    %c0_i32_63 = arith.constant 0 : i32
    %376 = arith.cmpi ne, %375, %c0_i32_63 : i32
    scf.if %376 {
      %c124 = arith.constant 124 : index
      %386 = memref.load %arg2[%c124] : memref<128xi32, #tpu.memory_space<smem>>
      %387 = arith.index_cast %372 : i32 to index
      %388 = memref.load %arg3[%387] : memref<64xi32, #tpu.memory_space<smem>>
      memref.store %386, %arg3[%387] : memref<64xi32, #tpu.memory_space<smem>>
      %c125 = arith.constant 125 : index
      %389 = memref.load %arg2[%c125] : memref<128xi32, #tpu.memory_space<smem>>
      %390 = arith.index_cast %372 : i32 to index
      %391 = memref.load %arg4[%390] : memref<64xi32, #tpu.memory_space<smem>>
      memref.store %389, %arg4[%390] : memref<64xi32, #tpu.memory_space<smem>>
      %392 = arith.index_cast %372 : i32 to index
      %393 = memref.load %arg5[%392] : memref<64xf32, #tpu.memory_space<smem>>
      memref.store %373, %arg5[%392] : memref<64xf32, #tpu.memory_space<smem>>
    } else {
    }
    %377 = arith.extui %374 : i1 to i32
    %378 = arith.addi %372, %377 : i32
    %c63 = arith.constant 63 : index
    %379 = memref.load %arg1[%c63] : memref<64xf32, #tpu.memory_space<smem>>
    %380 = arith.cmpf ogt, %379, %0 : f32
    %381 = arith.extui %380 : i1 to i32
    %c0_i32_64 = arith.constant 0 : i32
    %382 = arith.cmpi ne, %381, %c0_i32_64 : i32
    scf.if %382 {
      %c126 = arith.constant 126 : index
      %386 = memref.load %arg2[%c126] : memref<128xi32, #tpu.memory_space<smem>>
      %387 = arith.index_cast %378 : i32 to index
      %388 = memref.load %arg3[%387] : memref<64xi32, #tpu.memory_space<smem>>
      memref.store %386, %arg3[%387] : memref<64xi32, #tpu.memory_space<smem>>
      %c127 = arith.constant 127 : index
      %389 = memref.load %arg2[%c127] : memref<128xi32, #tpu.memory_space<smem>>
      %390 = arith.index_cast %378 : i32 to index
      %391 = memref.load %arg4[%390] : memref<64xi32, #tpu.memory_space<smem>>
      memref.store %389, %arg4[%390] : memref<64xi32, #tpu.memory_space<smem>>
      %392 = arith.index_cast %378 : i32 to index
      %393 = memref.load %arg5[%392] : memref<64xf32, #tpu.memory_space<smem>>
      memref.store %379, %arg5[%392] : memref<64xf32, #tpu.memory_space<smem>>
    } else {
    }
    %383 = arith.extui %380 : i1 to i32
    %384 = arith.addi %378, %383 : i32
    %c0_65 = arith.constant 0 : index
    %385 = memref.load %arg6[%c0_65] : memref<1xi32, #tpu.memory_space<smem>>
    memref.store %384, %arg6[%c0_65] : memref<1xi32, #tpu.memory_space<smem>>
    return
  }
}

</mosaic_0001>

<bundles_post_ra>
// kernel: _select_correspondences.1
= control target key start
LH: loop header
LB: loop body
LE: loop exit
PB: predicated region body
PF: predicated region fallthrough
CT: control target
= control target key end

     0   :  { %s9785_s0 = inlined_call_operand.<no memory space> [shape: f32[1], index: 0, kind: input, shape index: {}]   ;;  %s9786_s1 = inlined_call_operand.vmem [shape: f32[64], index: 1, kind: input, shape index: {}]   ;;  %s9787_s2 = inlined_call_operand.vmem [shape: s32[128], index: 2, kind: input, shape index: {}]   ;;  %s9788_s3 = inlined_call_operand.vmem [shape: s32[64], index: 3, kind: output, shape index: {0}]   ;;  %s9789_s4 = inlined_call_operand.vmem [shape: s32[64], index: 4, kind: output, shape index: {1}]   ;;  %s9790_s5 = inlined_call_operand.vmem [shape: f32[64], index: 5, kind: output, shape index: {2}]   ;;  %s9791_s6 = inlined_call_operand.hbm [shape: s32[1], index: 6, kind: output, shape index: {3}]  }
   0x1   :  { %10078 = sst [smem:[#allocation134_spill]] %s9788_s3 }
   0x2   :  { %10079 = sst [smem:[#allocation135_spill]] %s9790_s5 }
   0x3   :  { %10080 = sst [smem:[#allocation136_spill]] %s9791_s6 }
   0x4   :  { %13 = vsyncpa [#allocation5], 0 }
   0x5   :  { %14 = vsyncpa [#allocation8], 0 }
   0x6   :  { %15 = vsyncpa [#allocation6], 0 }
   0x7   :  { %16 = vsyncpa [#allocation11], 0 }
   0x8   :  { %17 = vsyncpa [#allocation4], 0  ;;  %s26_s23 = sshll.u32 %s9786_s1, 4  ;;  %s36_s26 = sshll.u32 %s9787_s2, 4  ;;  %s27_s23 = int_to_ptr.vmem [resolvable:$true] %s26_s23  ;;  %s37_s26 = int_to_ptr.vmem [resolvable:$true] %s36_s26 }
   0x9   :  { %s7501_s27 = scalar_lea.vmem %s27_s23, 16  ;;  %p7506_p1 = scmp.lt.s32.totalorder %s27_s23, %s27_s23 }
   0xa   :  { %p7502_p0 = scmp.ne.s32.totalorder %s27_s23, %s7501_s27  ;;  %p7507_p2 = scmp.lt.s32.totalorder %s7501_s27, %s7501_s27 }
   0xc   :  { %p7508_p3 = por %p7507_p2, %p7506_p1 }
   0xe   :  { %p7509_p4 = pnand %p7508_p3, %p7502_p0 }
  0x10   :  { %7512 = shalt.err (!%p7509_p4)
}
  0x11   :  { %s7581_s28 = smov [#allocation3]   ;;  %s7513_s29 = scalar_lea.vmem %s37_s26, 16 }
  0x12   :  { %29 = dma.vmem_to_smem %s27_s23, 16, %s7581_s28, [#allocation5]  }
  0x13   :  { %p7514_p5 = scmp.ne.s32.totalorder %s37_s26, %s7513_s29  ;;  %p7518_p6 = scmp.lt.s32.totalorder %s37_s26, %s37_s26 }
  0x14   :  { %p7519_p7 = scmp.lt.s32.totalorder %s7513_s29, %s7513_s29 }
  0x16   :  { %p7520_p8 = por %p7519_p7, %p7518_p6 }
  0x18   :  { %p7521_p9 = pnand %p7520_p8, %p7514_p5 }
  0x1a   :  { %7524 = shalt.err (!%p7521_p9)
}
  0x1b   :  { %s7582_s1 = smov [#allocation7]  }
  0x1c   :  { %39 = dma.vmem_to_smem %s37_s26, 16, %s7582_s1, [#allocation8]  }
  0x1d   :  { %7571 = dma.done.wait [#allocation5], 16  }
  0x1e   :  { %7572 = vsyncadd [#allocation5], 4294967280 }
  0x1f   :  { %7573 = dma.done.wait [#allocation8], 16  }
  0x20   :  { %7574 = vsyncadd [#allocation8], 4294967280 }
  0x21   :  { %46 = sfence }
  0x22   :  { %s7628_s2 = sld [smem:[#allocation3]]  ;;  %s7113_s30 = sld [smem:[#allocation7 + $0x1]] }
  0x23   :  { %s7630_s7 = sld [smem:[#allocation3 + $0x1]]  ;;  %s7116_s8 = sld [smem:[#allocation7 + $0x3]] }
  0x24   :  { %s7632_s9 = sld [smem:[#allocation3 + $0x2]]  ;;  %s7119_s10 = sld [smem:[#allocation7 + $0x5]] }
  0x25   :  { %s7634_s11 = sld [smem:[#allocation3 + $0x3]]  ;;  %s7122_s12 = sld [smem:[#allocation7 + $0x7]] }
  0x26   :  { %s7636_s13 = sld [smem:[#allocation3 + $0x4]]  ;;  %s7125_s14 = sld [smem:[#allocation7 + $0x9]] }
  0x27   :  { %s7638_s15 = sld [smem:[#allocation3 + $0x5]]  ;;  %s7640_s16 = sld [smem:[#allocation7 + $0xb]] }
  0x28   :  { %p49_p10 = scmp.gt.f32.partialorder %s7628_s2, %s9785_s0  ;;  %s7646_s19 = sld [smem:[#allocation3 + $0x6]] }
  0x29   :  { %p63_p11 = scmp.gt.f32.partialorder %s7630_s7, %s9785_s0  ;;  %s7652_s22 = sld [smem:[#allocation7 + $0xd]] }
  0x2a   :  { %7304 = sst [smem:[#allocation10]] (%p49_p10), %s7113_s30  ;;  %p78_p12 = scmp.gt.f32.partialorder %s7632_s9, %s9785_s0 }
  0x2b   :  { %10081 = sst [smem:[#allocation19_spill]] %s7634_s11  ;;  %p93_p13 = scmp.gt.f32.partialorder %s7634_s11, %s9785_s0 }
  0x2c   :  { %10082 = sst [smem:[#allocation20_spill]] %s7636_s13  ;;  %p108_p0 = scmp.gt.f32.partialorder %s7636_s13, %s9785_s0 }
  0x2d   :  { %10083 = sst [smem:[#allocation21_spill]] %s7638_s15  ;;  %p123_p1 = scmp.gt.f32.partialorder %s7638_s15, %s9785_s0 }
  0x2e   :  { %10084 = sst [smem:[#allocation22_spill]] %s7646_s19  ;;  %p138_p2 = scmp.gt.f32.partialorder %s7646_s19, %s9785_s0 }
  0x2f   :  { %s7668_s29 = scalar_select %p49_p10, 1, 0 }
  0x30   :  { %s75_s18 = scalar_select %p63_p11, 1, 0 }
  0x31   :  { %s71_s21 = scalar_lea.smem [#allocation10], %s7668_s29  ;;  %s7734_s23 = sld [smem:[#allocation3 + $0x7]] }
  0x32   :  { %7307 = sst [smem:[%s71_s21]] (%p63_p11), %s7116_s8  ;;  %s7686_s25 = sadd.s32 %s75_s18, %s7668_s29 }
  0x33   :  { %s86_s28 = scalar_lea.smem [#allocation10], %s7686_s25  ;;  %s7137_s3 = sld [smem:[#allocation7 + $0x11]] }
  0x34   :  { %7310 = sst [smem:[%s86_s28]] (%p78_p12), %s7119_s10 }
  0x35   :  { %s90_s21 = scalar_select %p78_p12, 1, 0 }
  0x36   :  { %s105_s26 = scalar_select %p93_p13, 1, 0 }
  0x37   :  { %s7713_s27 = sadd.s32 %s90_s21, %s7686_s25  ;;  %10086 = sst [smem:[#allocation24_spill]] %s7734_s23 }
  0x38   :  { %s7720_s28 = sadd.s32 %s105_s26, %s7713_s27  ;;  %s101_s17 = scalar_lea.smem [#allocation10], %s7713_s27 }
  0x39   :  { %10085 = sst [smem:[#allocation23_spill]] %s7720_s28  ;;  %s116_s8 = scalar_lea.smem [#allocation10], %s7720_s28 }
  0x3a   :  { %7313 = sst [smem:[%s101_s17]] (%p93_p13), %s7122_s12  ;;  %p153_p3 = scmp.gt.f32.partialorder %s7734_s23, %s9785_s0 }
  0x3b   :  { %7316 = sst [smem:[%s116_s8]] (%p108_p0), %s7125_s14 }
  0x3c   :  { %s120_s1 = scalar_select %p108_p0, 1, 0 }
  0x3d   :  { %s135_s12 = scalar_select %p123_p1, 1, 0 }
  0x3e   :  { %s7747_s17 = sadd.s32 %s120_s1, %s7720_s28  ;;  %s7134_s14 = sld [smem:[#allocation7 + $0xf]] }
  0x3f   :  { %10087 = sst [smem:[#allocation25_spill]] %s7747_s17  ;;  %s7750_s20 = sadd.s32 %s135_s12, %s7747_s17 }
  0x40   :  { %10088 = sst [smem:[#allocation26_spill]] %s7750_s20  ;;  %s131_s30 = scalar_lea.smem [#allocation10], %s7747_s17 }
  0x41   :  { %7319 = sst [smem:[%s131_s30]] (%p123_p1), %s7640_s16  ;;  %s146_s21 = scalar_lea.smem [#allocation10], %s7750_s20 }
  0x42   :  { %7322 = sst [smem:[%s146_s21]] (%p138_p2), %s7652_s22 }
  0x43   :  { %s150_s5 = scalar_select %p138_p2, 1, 0 }
  0x44   :  { %s165_s16 = scalar_select %p153_p3, 1, 0 }
  0x45   :  { %s7781_s30 = sadd.s32 %s150_s5, %s7750_s20  ;;  %s7783_s8 = sld [smem:[#allocation3 + $0x8]] }
  0x46   :  { %10089 = sst [smem:[#allocation27_spill]] %s7781_s30  ;;  %s7786_s22 = sadd.s32 %s165_s16, %s7781_s30 }
  0x47   :  { %10091 = sst [smem:[#allocation29_spill]] %s7786_s22  ;;  %s161_s18 = scalar_lea.smem [#allocation10], %s7781_s30 }
  0x48   :  { %7325 = sst [smem:[%s161_s18]] (%p153_p3), %s7134_s14  ;;  %s176_s21 = scalar_lea.smem [#allocation10], %s7786_s22 }
  0x49   :  { %s7794_s5 = sld [smem:[#allocation3 + $0x9]]  ;;  %s7140_s17 = sld [smem:[#allocation7 + $0x13]] }
  0x4a   :  { %s7796_s24 = sld [smem:[#allocation3 + $0xa]]  ;;  %s7143_s26 = sld [smem:[#allocation7 + $0x15]] }
  0x4b   :  { %10090 = sst [smem:[#allocation28_spill]] %s7783_s8  ;;  %s7798_s1 = sld [smem:[#allocation3 + $0xb]] }
  0x4c   :  { %p10073_p4 = scmp.gt.f32.partialorder %s7783_s8, %s9785_s0  ;;  %s7146_s14 = sld [smem:[#allocation7 + $0x17]] }
  0x4d   :  { %s7804_s16 = sld [smem:[#allocation3 + $0xc]]  ;;  %s7806_s18 = sld [smem:[#allocation7 + $0x19]] }
  0x4e   :  { %7328 = sst [smem:[%s176_s21]] (%p10073_p4), %s7137_s3 }
  0x4f   :  { %10092 = sst [smem:[#allocation30_spill]] %s7794_s5  ;;  %s7814_s30 = sld [smem:[#allocation3 + $0xd]] }
  0x50   :  { %10093 = sst [smem:[#allocation31_spill]] %s7796_s24  ;;  %p9849_p5 = scmp.gt.f32.partialorder %s7794_s5, %s9785_s0 }
  0x51   :  { %10094 = sst [smem:[#allocation32_spill]] %s7798_s1  ;;  %p9841_p6 = scmp.gt.f32.partialorder %s7796_s24, %s9785_s0 }
  0x52   :  { %s180_s12 = scalar_select %p10073_p4, 1, 0 }
  0x53   :  { %10095 = sst [smem:[#allocation33_spill]] %s7804_s16  ;;  %p9817_p7 = scmp.gt.f32.partialorder %s7798_s1, %s9785_s0 }
  0x54   :  { %s7830_s23 = sadd.s32 %s180_s12, %s7786_s22  ;;  %s7152_s19 = sld [smem:[#allocation7 + $0x1b]] }
  0x55   :  { %10096 = sst [smem:[#allocation34_spill]] %s7814_s30  ;;  %s191_s6 = scalar_lea.smem [#allocation10], %s7830_s23 }
  0x56   :  { %10097 = sst [smem:[#allocation35_spill]] %s7830_s23  ;;  %p9840_p8 = scmp.gt.f32.partialorder %s7804_s16, %s9785_s0 }
  0x57   :  { %7331 = sst [smem:[%s191_s6]] (%p9849_p5), %s7140_s17  ;;  %p9824_p9 = scmp.gt.f32.partialorder %s7814_s30, %s9785_s0 }
  0x58   :  { %s195_s3 = scalar_select %p9849_p5, 1, 0 }
  0x59   :  { %s210_s22 = scalar_select %p9841_p6, 1, 0 }
  0x5a   :  { %s7857_s11 = sadd.s32 %s195_s3, %s7830_s23  ;;  %s7878_s3 = sld [smem:[#allocation3 + $0xe]] }
  0x5b   :  { %10098 = sst [smem:[#allocation36_spill]] %s7857_s11  ;;  %s7864_s6 = sadd.s32 %s210_s22, %s7857_s11 }
  0x5c   :  { %10099 = sst [smem:[#allocation37_spill]] %s7864_s6  ;;  %s206_s15 = scalar_lea.smem [#allocation10], %s7857_s11 }
  0x5d   :  { %7334 = sst [smem:[%s206_s15]] (%p9841_p6), %s7143_s26  ;;  %s221_s28 = scalar_lea.smem [#allocation10], %s7864_s6 }
  0x5e   :  { %7337 = sst [smem:[%s221_s28]] (%p9817_p7), %s7146_s14 }
  0x5f   :  { %s225_s10 = scalar_select %p9817_p7, 1, 0 }
  0x60   :  { %10100 = sst [smem:[#allocation38_spill]] %s7878_s3  ;;  %s7155_s14 = sld [smem:[#allocation7 + $0x1d]] }
  0x61   :  { %s240_s26 = scalar_select %p9840_p8, 1, 0 }
  0x62   :  { %s7891_s15 = sadd.s32 %s225_s10, %s7864_s6  ;;  %p9835_p7 = scmp.gt.f32.partialorder %s7878_s3, %s9785_s0 }
  0x63   :  { %10101 = sst [smem:[#allocation39_spill]] %s7891_s15  ;;  %s7894_s8 = sadd.s32 %s240_s26, %s7891_s15 }
  0x64   :  { %10102 = sst [smem:[#allocation40_spill]] %s7894_s8  ;;  %s236_s13 = scalar_lea.smem [#allocation10], %s7891_s15 }
  0x65   :  { %7340 = sst [smem:[%s236_s13]] (%p9840_p8), %s7806_s18  ;;  %s251_s12 = scalar_lea.smem [#allocation10], %s7894_s8 }
  0x66   :  { %7343 = sst [smem:[%s251_s12]] (%p9824_p9), %s7152_s19 }
  0x67   :  { %s255_s15 = scalar_select %p9824_p9, 1, 0 }
  0x68   :  { %s270_s18 = scalar_select %p9835_p7, 1, 0 }
  0x69   :  { %s7924_s13 = sadd.s32 %s255_s15, %s7894_s8  ;;  %s7926_s28 = sld [smem:[#allocation3 + $0xf]] }
  0x6a   :  { %10103 = sst [smem:[#allocation41_spill]] %s7924_s13  ;;  %s7929_s19 = sadd.s32 %s270_s18, %s7924_s13 }
  0x6b   :  { %10105 = sst [smem:[#allocation43_spill]] %s7929_s19  ;;  %s266_s20 = scalar_lea.smem [#allocation10], %s7924_s13 }
  0x6c   :  { %7346 = sst [smem:[%s266_s20]] (%p9835_p7), %s7155_s14  ;;  %s281_s12 = scalar_lea.smem [#allocation10], %s7929_s19 }
  0x6d   :  { %s7158_s1 = sld [smem:[#allocation7 + $0x1f]]  ;;  %s7937_s6 = sld [smem:[#allocation3 + $0x10]] }
  0x6e   :  { %s7161_s15 = sld [smem:[#allocation7 + $0x21]]  ;;  %s7164_s22 = sld [smem:[#allocation7 + $0x23]] }
  0x6f   :  { %10104 = sst [smem:[#allocation42_spill]] %s7926_s28  ;;  %s7939_s21 = sld [smem:[#allocation3 + $0x11]] }
  0x70   :  { %s7941_s10 = sld [smem:[#allocation3 + $0x12]]  ;;  %p9842_p9 = scmp.gt.f32.partialorder %s7926_s28, %s9785_s0 }
  0x71   :  { %s7167_s14 = sld [smem:[#allocation7 + $0x25]]  ;;  %s7947_s18 = sld [smem:[#allocation3 + $0x13]] }
  0x72   :  { %s7949_s20 = sld [smem:[#allocation7 + $0x27]]  ;;  %s7957_s13 = sld [smem:[#allocation3 + $0x14]] }
  0x73   :  { %10106 = sst [smem:[#allocation44_spill]] %s7937_s6  ;;  %p9884_p7 = scmp.gt.f32.partialorder %s7937_s6, %s9785_s0 }
  0x74   :  { %7349 = sst [smem:[%s281_s12]] (%p9842_p9), %s7158_s1 }
  0x75   :  { %10107 = sst [smem:[#allocation45_spill]] %s7939_s21  ;;  %p9876_p8 = scmp.gt.f32.partialorder %s7939_s21, %s9785_s0 }
  0x76   :  { %10108 = sst [smem:[#allocation46_spill]] %s7941_s10  ;;  %p9852_p6 = scmp.gt.f32.partialorder %s7941_s10, %s9785_s0 }
  0x77   :  { %10109 = sst [smem:[#allocation47_spill]] %s7947_s18  ;;  %s7173_s30 = sld [smem:[#allocation7 + $0x29]] }
  0x78   :  { %10110 = sst [smem:[#allocation48_spill]] %s7957_s13  ;;  %p9859_p5 = scmp.gt.f32.partialorder %s7957_s13, %s9785_s0 }
  0x79   :  { %s285_s26 = scalar_select %p9842_p9, 1, 0 }
  0x7a   :  { %p9875_p9 = scmp.gt.f32.partialorder %s7947_s18, %s9785_s0  ;;  %s7179_s10 = sld [smem:[#allocation7 + $0x2d]] }
  0x7b   :  { %s7973_s3 = sadd.s32 %s285_s26, %s7929_s19  ;;  %s8082_s12 = sld [smem:[#allocation3 + $0x18]] }
  0x7c   :  { %10111 = sst [smem:[#allocation49_spill]] %s7973_s3  ;;  %s296_s11 = scalar_lea.smem [#allocation10], %s7973_s3 }
  0x7d   :  { %7352 = sst [smem:[%s296_s11]] (%p9884_p7), %s7161_s15 }
  0x7e   :  { %s300_s1 = scalar_select %p9884_p7, 1, 0 }
  0x7f   :  { %s315_s19 = scalar_select %p9876_p8, 1, 0 }
  0x80   :  { %s8000_s23 = sadd.s32 %s300_s1, %s7973_s3  ;;  %s8021_s1 = sld [smem:[#allocation3 + $0x15]] }
  0x81   :  { %10112 = sst [smem:[#allocation50_spill]] %s8000_s23  ;;  %s8007_s11 = sadd.s32 %s315_s19, %s8000_s23 }
  0x82   :  { %10113 = sst [smem:[#allocation51_spill]] %s8007_s11  ;;  %s311_s16 = scalar_lea.smem [#allocation10], %s8000_s23 }
  0x83   :  { %7355 = sst [smem:[%s311_s16]] (%p9876_p8), %s7164_s22  ;;  %s326_s24 = scalar_lea.smem [#allocation10], %s8007_s11 }
  0x84   :  { %7358 = sst [smem:[%s326_s24]] (%p9852_p6), %s7167_s14 }
  0x85   :  { %s330_s17 = scalar_select %p9852_p6, 1, 0 }
  0x86   :  { %10114 = sst [smem:[#allocation52_spill]] %s8021_s1  ;;  %s7176_s14 = sld [smem:[#allocation7 + $0x2b]] }
  0x87   :  { %s345_s22 = scalar_select %p9875_p9, 1, 0 }
  0x88   :  { %s8034_s16 = sadd.s32 %s330_s17, %s8007_s11  ;;  %p9870_p6 = scmp.gt.f32.partialorder %s8021_s1, %s9785_s0 }
  0x89   :  { %10115 = sst [smem:[#allocation53_spill]] %s8034_s16  ;;  %s8037_s28 = sadd.s32 %s345_s22, %s8034_s16 }
  0x8a   :  { %10116 = sst [smem:[#allocation54_spill]] %s8037_s28  ;;  %s341_s5 = scalar_lea.smem [#allocation10], %s8034_s16 }
  0x8b   :  { %7361 = sst [smem:[%s341_s5]] (%p9875_p9), %s7949_s20  ;;  %s356_s26 = scalar_lea.smem [#allocation10], %s8037_s28 }
  0x8c   :  { %7364 = sst [smem:[%s356_s26]] (%p9859_p5), %s7173_s30  ;;  %p9911_p9 = scmp.gt.f32.partialorder %s8082_s12, %s9785_s0 }
  0x8d   :  { %s360_s16 = scalar_select %p9859_p5, 1, 0 }
  0x8e   :  { %s375_s20 = scalar_select %p9870_p6, 1, 0 }
  0x8f   :  { %s8067_s5 = sadd.s32 %s360_s16, %s8037_s28  ;;  %s8069_s24 = sld [smem:[#allocation3 + $0x16]] }
  0x90   :  { %10117 = sst [smem:[#allocation55_spill]] %s8067_s5  ;;  %s8072_s30 = sadd.s32 %s375_s20, %s8067_s5 }
  0x91   :  { %10119 = sst [smem:[#allocation57_spill]] %s8072_s30  ;;  %s371_s8 = scalar_lea.smem [#allocation10], %s8067_s5 }
  0x92   :  { %7367 = sst [smem:[%s371_s8]] (%p9870_p6), %s7176_s14  ;;  %s386_s26 = scalar_lea.smem [#allocation10], %s8072_s30 }
  0x93   :  { %s8080_s11 = sld [smem:[#allocation3 + $0x17]]  ;;  %10121 = sst [smem:[#allocation59_spill]] %s8082_s12 }
  0x94   :  { %s7182_s16 = sld [smem:[#allocation7 + $0x2f]]  ;;  %s7185_s19 = sld [smem:[#allocation7 + $0x31]] }
  0x95   :  { %10118 = sst [smem:[#allocation56_spill]] %s8069_s24  ;;  %s8084_s17 = sld [smem:[#allocation3 + $0x19]] }
  0x96   :  { %p9877_p5 = scmp.gt.f32.partialorder %s8069_s24, %s9785_s0  ;;  %s7188_s14 = sld [smem:[#allocation7 + $0x33]] }
  0x97   :  { %s8090_s20 = sld [smem:[#allocation3 + $0x1a]]  ;;  %s8092_s8 = sld [smem:[#allocation7 + $0x35]] }
  0x98   :  { %7370 = sst [smem:[%s386_s26]] (%p9877_p5), %s7179_s10 }
  0x99   :  { %10120 = sst [smem:[#allocation58_spill]] %s8080_s11  ;;  %s8100_s5 = sld [smem:[#allocation3 + $0x1b]] }
  0x9a   :  { %s390_s22 = scalar_select %p9877_p5, 1, 0 }
  0x9b   :  { %10122 = sst [smem:[#allocation60_spill]] %s8084_s17  ;;  %p9919_p6 = scmp.gt.f32.partialorder %s8080_s11, %s9785_s0 }
  0x9c   :  { %s8116_s1 = sadd.s32 %s390_s22, %s8072_s30  ;;  %p9887_p8 = scmp.gt.f32.partialorder %s8084_s17, %s9785_s0 }
  0x9d   :  { %10123 = sst [smem:[#allocation61_spill]] %s8090_s20  ;;  %s7194_s13 = sld [smem:[#allocation7 + $0x37]] }
  0x9e   :  { %10125 = sst [smem:[#allocation63_spill]] %s8116_s1  ;;  %s401_s23 = scalar_lea.smem [#allocation10], %s8116_s1 }
  0x9f   :  { %10124 = sst [smem:[#allocation62_spill]] %s8100_s5  ;;  %p9910_p5 = scmp.gt.f32.partialorder %s8090_s20, %s9785_s0 }
  0xa0   :  { %7373 = sst [smem:[%s401_s23]] (%p9919_p6), %s7182_s16  ;;  %p9894_p7 = scmp.gt.f32.partialorder %s8100_s5, %s9785_s0 }
  0xa1   :  { %s405_s10 = scalar_select %p9919_p6, 1, 0 }
  0xa2   :  { %s420_s30 = scalar_select %p9911_p9, 1, 0 }
  0xa3   :  { %s8143_s3 = sadd.s32 %s405_s10, %s8116_s1  ;;  %s8164_s10 = sld [smem:[#allocation3 + $0x1c]] }
  0xa4   :  { %10126 = sst [smem:[#allocation64_spill]] %s8143_s3  ;;  %s8150_s23 = sadd.s32 %s420_s30, %s8143_s3 }
  0xa5   :  { %10127 = sst [smem:[#allocation65_spill]] %s8150_s23  ;;  %s416_s18 = scalar_lea.smem [#allocation10], %s8143_s3 }
  0xa6   :  { %7376 = sst [smem:[%s416_s18]] (%p9911_p9), %s7185_s19  ;;  %s431_s21 = scalar_lea.smem [#allocation10], %s8150_s23 }
  0xa7   :  { %7379 = sst [smem:[%s431_s21]] (%p9887_p8), %s7188_s14 }
  0xa8   :  { %s435_s15 = scalar_select %p9887_p8, 1, 0 }
  0xa9   :  { %10128 = sst [smem:[#allocation66_spill]] %s8164_s10  ;;  %s7197_s14 = sld [smem:[#allocation7 + $0x39]] }
  0xaa   :  { %s450_s19 = scalar_select %p9910_p5, 1, 0 }
  0xab   :  { %s8177_s18 = sadd.s32 %s435_s15, %s8150_s23  ;;  %p9905_p8 = scmp.gt.f32.partialorder %s8164_s10, %s9785_s0 }
  0xac   :  { %10129 = sst [smem:[#allocation67_spill]] %s8177_s18  ;;  %s8180_s24 = sadd.s32 %s450_s19, %s8177_s18 }
  0xad   :  { %10130 = sst [smem:[#allocation68_spill]] %s8180_s24  ;;  %s446_s6 = scalar_lea.smem [#allocation10], %s8177_s18 }
  0xae   :  { %7382 = sst [smem:[%s446_s6]] (%p9910_p5), %s8092_s8  ;;  %s461_s22 = scalar_lea.smem [#allocation10], %s8180_s24 }
  0xaf   :  { %7385 = sst [smem:[%s461_s22]] (%p9894_p7), %s7194_s13 }
  0xb0   :  { %s465_s18 = scalar_select %p9894_p7, 1, 0 }
  0xb1   :  { %s480_s8 = scalar_select %p9905_p8, 1, 0 }
  0xb2   :  { %s8210_s6 = sadd.s32 %s465_s18, %s8180_s24  ;;  %s8212_s21 = sld [smem:[#allocation3 + $0x1d]] }
  0xb3   :  { %10131 = sst [smem:[#allocation69_spill]] %s8210_s6  ;;  %s8215_s13 = sadd.s32 %s480_s8, %s8210_s6 }
  0xb4   :  { %10133 = sst [smem:[#allocation71_spill]] %s8215_s13  ;;  %s476_s28 = scalar_lea.smem [#allocation10], %s8210_s6 }
  0xb5   :  { %7388 = sst [smem:[%s476_s28]] (%p9905_p8), %s7197_s14  ;;  %s491_s22 = scalar_lea.smem [#allocation10], %s8215_s13 }
  0xb6   :  { %s7200_s17 = sld [smem:[#allocation7 + $0x3b]]  ;;  %s8223_s23 = sld [smem:[#allocation3 + $0x1e]] }
  0xb7   :  { %s7203_s18 = sld [smem:[#allocation7 + $0x3d]]  ;;  %s8225_s26 = sld [smem:[#allocation3 + $0x1f]] }
  0xb8   :  { %10132 = sst [smem:[#allocation70_spill]] %s8212_s21  ;;  %s7206_s30 = sld [smem:[#allocation7 + $0x3f]] }
  0xb9   :  { %s8227_s15 = sld [smem:[#allocation3 + $0x20]]  ;;  %p9912_p7 = scmp.gt.f32.partialorder %s8212_s21, %s9785_s0 }
  0xba   :  { %s7209_s14 = sld [smem:[#allocation7 + $0x41]]  ;;  %s8235_s28 = sld [smem:[#allocation7 + $0x43]] }
  0xbb   :  { %s8233_s8 = sld [smem:[#allocation3 + $0x21]]  ;;  %s8243_s6 = sld [smem:[#allocation3 + $0x22]] }
  0xbc   :  { %10134 = sst [smem:[#allocation72_spill]] %s8223_s23  ;;  %p9954_p8 = scmp.gt.f32.partialorder %s8223_s23, %s9785_s0 }
  0xbd   :  { %10135 = sst [smem:[#allocation73_spill]] %s8225_s26  ;;  %p9946_p5 = scmp.gt.f32.partialorder %s8225_s26, %s9785_s0 }
  0xbe   :  { %7391 = sst [smem:[%s491_s22]] (%p9912_p7), %s7200_s17 }
  0xbf   :  { %10136 = sst [smem:[#allocation74_spill]] %s8227_s15  ;;  %p9922_p9 = scmp.gt.f32.partialorder %s8227_s15, %s9785_s0 }
  0xc0   :  { %s495_s19 = scalar_select %p9912_p7, 1, 0 }
  0xc1   :  { %10137 = sst [smem:[#allocation75_spill]] %s8233_s8  ;;  %s7215_s5 = sld [smem:[#allocation7 + $0x45]] }
  0xc2   :  { %10138 = sst [smem:[#allocation76_spill]] %s8243_s6  ;;  %s8259_s10 = sadd.s32 %s495_s19, %s8215_s13 }
  0xc3   :  { %10139 = sst [smem:[#allocation77_spill]] %s8259_s10  ;;  %s506_s3 = scalar_lea.smem [#allocation10], %s8259_s10 }
  0xc4   :  { %7394 = sst [smem:[%s506_s3]] (%p9954_p8), %s7203_s18  ;;  %p9945_p7 = scmp.gt.f32.partialorder %s8233_s8, %s9785_s0 }
  0xc5   :  { %s510_s17 = scalar_select %p9954_p8, 1, 0 }
  0xc6   :  { %s525_s13 = scalar_select %p9946_p5, 1, 0 }
  0xc7   :  { %s8286_s1 = sadd.s32 %s510_s17, %s8259_s10  ;;  %p9929_p6 = scmp.gt.f32.partialorder %s8243_s6, %s9785_s0 }
  0xc8   :  { %10140 = sst [smem:[#allocation78_spill]] %s8286_s1  ;;  %s8293_s3 = sadd.s32 %s525_s13, %s8286_s1 }
  0xc9   :  { %10141 = sst [smem:[#allocation79_spill]] %s8293_s3  ;;  %s521_s20 = scalar_lea.smem [#allocation10], %s8286_s1 }
  0xca   :  { %7397 = sst [smem:[%s521_s20]] (%p9946_p5), %s7206_s30  ;;  %s536_s12 = scalar_lea.smem [#allocation10], %s8293_s3 }
  0xcb   :  { %7400 = sst [smem:[%s536_s12]] (%p9922_p9), %s7209_s14 }
  0xcc   :  { %s8307_s17 = sld [smem:[#allocation3 + $0x23]]  ;;  %s7218_s14 = sld [smem:[#allocation7 + $0x47]] }
  0xcd   :  { %s540_s16 = scalar_select %p9922_p9, 1, 0 }
  0xce   :  { %s555_s30 = scalar_select %p9945_p7, 1, 0 }
  0xcf   :  { %s8320_s20 = sadd.s32 %s540_s16, %s8293_s3  ;;  %s8355_s12 = sld [smem:[#allocation3 + $0x24]] }
  0xd0   :  { %10143 = sst [smem:[#allocation81_spill]] %s8320_s20  ;;  %s8323_s21 = sadd.s32 %s555_s30, %s8320_s20 }
  0xd1   :  { %10144 = sst [smem:[#allocation82_spill]] %s8323_s21  ;;  %s551_s11 = scalar_lea.smem [#allocation10], %s8320_s20 }
  0xd2   :  { %10142 = sst [smem:[#allocation80_spill]] %s8307_s17  ;;  %s566_s19 = scalar_lea.smem [#allocation10], %s8323_s21 }
  0xd3   :  { %7403 = sst [smem:[%s551_s11]] (%p9945_p7), %s8235_s28  ;;  %p9940_p9 = scmp.gt.f32.partialorder %s8307_s17, %s9785_s0 }
  0xd4   :  { %7406 = sst [smem:[%s566_s19]] (%p9929_p6), %s7215_s5 }
  0xd5   :  { %s570_s20 = scalar_select %p9929_p6, 1, 0 }
  0xd6   :  { %s585_s28 = scalar_select %p9940_p9, 1, 0 }
  0xd7   :  { %s8353_s11 = sadd.s32 %s570_s20, %s8323_s21  ;;  %10146 = sst [smem:[#allocation84_spill]] %s8355_s12 }
  0xd8   :  { %10145 = sst [smem:[#allocation83_spill]] %s8353_s11  ;;  %s8358_s5 = sadd.s32 %s585_s28, %s8353_s11 }
  0xd9   :  { %10147 = sst [smem:[#allocation85_spill]] %s8358_s5  ;;  %s581_s24 = scalar_lea.smem [#allocation10], %s8353_s11 }
  0xda   :  { %7409 = sst [smem:[%s581_s24]] (%p9940_p9), %s7218_s14  ;;  %p9947_p6 = scmp.gt.f32.partialorder %s8355_s12, %s9785_s0 }
  0xdb   :  { %s7221_s15 = sld [smem:[#allocation7 + $0x49]]  ;;  %s8366_s3 = sld [smem:[#allocation3 + $0x25]] }
  0xdc   :  { %s7224_s20 = sld [smem:[#allocation7 + $0x4b]]  ;;  %s8368_s22 = sld [smem:[#allocation3 + $0x26]] }
  0xdd   :  { %s7227_s13 = sld [smem:[#allocation7 + $0x4d]]  ;;  %s8370_s16 = sld [smem:[#allocation3 + $0x27]] }
  0xde   :  { %s7230_s14 = sld [smem:[#allocation7 + $0x4f]]  ;;  %s8376_s28 = sld [smem:[#allocation3 + $0x28]] }
  0xdf   :  { %s8378_s24 = sld [smem:[#allocation7 + $0x51]]  ;;  %s596_s19 = scalar_lea.smem [#allocation10], %s8358_s5 }
  0xe0   :  { %s8386_s11 = sld [smem:[#allocation3 + $0x29]]  ;;  %s7236_s6 = sld [smem:[#allocation7 + $0x53]] }
  0xe1   :  { %10148 = sst [smem:[#allocation86_spill]] %s8366_s3  ;;  %p9989_p9 = scmp.gt.f32.partialorder %s8366_s3, %s9785_s0 }
  0xe2   :  { %10149 = sst [smem:[#allocation87_spill]] %s8368_s22  ;;  %p9981_p7 = scmp.gt.f32.partialorder %s8368_s22, %s9785_s0 }
  0xe3   :  { %10150 = sst [smem:[#allocation88_spill]] %s8370_s16  ;;  %p9957_p5 = scmp.gt.f32.partialorder %s8370_s16, %s9785_s0 }
  0xe4   :  { %10151 = sst [smem:[#allocation89_spill]] %s8376_s28  ;;  %s7242_s16 = sld [smem:[#allocation7 + $0x57]] }
  0xe5   :  { %7412 = sst [smem:[%s596_s19]] (%p9947_p6), %s7221_s15 }
  0xe6   :  { %10152 = sst [smem:[#allocation90_spill]] %s8386_s11  ;;  %p9964_p8 = scmp.gt.f32.partialorder %s8386_s11, %s9785_s0 }
  0xe7   :  { %s600_s30 = scalar_select %p9947_p6, 1, 0 }
  0xe8   :  { %p9980_p6 = scmp.gt.f32.partialorder %s8376_s28, %s9785_s0  ;;  %s8511_s19 = sld [smem:[#allocation3 + $0x2d]] }
  0xe9   :  { %s8402_s17 = sadd.s32 %s600_s30, %s8358_s5  ;;  %s7257_s11 = sld [smem:[#allocation7 + $0x61]] }
  0xea   :  { %10153 = sst [smem:[#allocation91_spill]] %s8402_s17  ;;  %s611_s1 = scalar_lea.smem [#allocation10], %s8402_s17 }
  0xeb   :  { %7415 = sst [smem:[%s611_s1]] (%p9989_p9), %s7224_s20 }
  0xec   :  { %s615_s15 = scalar_select %p9989_p9, 1, 0 }
  0xed   :  { %s630_s5 = scalar_select %p9981_p7, 1, 0 }
  0xee   :  { %s8429_s10 = sadd.s32 %s615_s15, %s8402_s17  ;;  %s8450_s15 = sld [smem:[#allocation3 + $0x2a]] }
  0xef   :  { %10154 = sst [smem:[#allocation92_spill]] %s8429_s10  ;;  %s8436_s1 = sadd.s32 %s630_s5, %s8429_s10 }
  0xf0   :  { %10155 = sst [smem:[#allocation93_spill]] %s8436_s1  ;;  %s626_s8 = scalar_lea.smem [#allocation10], %s8429_s10 }
  0xf1   :  { %7418 = sst [smem:[%s626_s8]] (%p9981_p7), %s7227_s13  ;;  %s641_s26 = scalar_lea.smem [#allocation10], %s8436_s1 }
  0xf2   :  { %7421 = sst [smem:[%s641_s26]] (%p9957_p5), %s7230_s14 }
  0xf3   :  { %s645_s18 = scalar_select %p9957_p5, 1, 0 }
  0xf4   :  { %10156 = sst [smem:[#allocation94_spill]] %s8450_s15  ;;  %s7239_s14 = sld [smem:[#allocation7 + $0x55]] }
  0xf5   :  { %s660_s13 = scalar_select %p9980_p6, 1, 0 }
  0xf6   :  { %s8463_s8 = sadd.s32 %s645_s18, %s8436_s1  ;;  %p9975_p5 = scmp.gt.f32.partialorder %s8450_s15, %s9785_s0 }
  0xf7   :  { %10157 = sst [smem:[#allocation95_spill]] %s8463_s8  ;;  %s8466_s12 = sadd.s32 %s660_s13, %s8463_s8 }
  0xf8   :  { %10158 = sst [smem:[#allocation96_spill]] %s8466_s12  ;;  %s656_s23 = scalar_lea.smem [#allocation10], %s8463_s8 }
  0xf9   :  { %7424 = sst [smem:[%s656_s23]] (%p9980_p6), %s8378_s24  ;;  %s671_s30 = scalar_lea.smem [#allocation10], %s8466_s12 }
  0xfa   :  { %7427 = sst [smem:[%s671_s30]] (%p9964_p8), %s7236_s6  ;;  %p10016_p6 = scmp.gt.f32.partialorder %s8511_s19, %s9785_s0 }
  0xfb   :  { %s675_s8 = scalar_select %p9964_p8, 1, 0 }
  0xfc   :  { %s690_s24 = scalar_select %p9975_p5, 1, 0 }
  0xfd   :  { %s8496_s23 = sadd.s32 %s675_s8, %s8466_s12  ;;  %s8498_s26 = sld [smem:[#allocation3 + $0x2b]] }
  0xfe   :  { %10159 = sst [smem:[#allocation97_spill]] %s8496_s23  ;;  %s8501_s6 = sadd.s32 %s690_s24, %s8496_s23 }
  0xff   :  { %10161 = sst [smem:[#allocation99_spill]] %s8501_s6  ;;  %s686_s21 = scalar_lea.smem [#allocation10], %s8496_s23 }
 0x100   :  { %7430 = sst [smem:[%s686_s21]] (%p9975_p5), %s7239_s14  ;;  %s701_s30 = scalar_lea.smem [#allocation10], %s8501_s6 }
 0x101   :  { %s8509_s1 = sld [smem:[#allocation3 + $0x2c]]  ;;  %s7245_s8 = sld [smem:[#allocation7 + $0x59]] }
 0x102   :  { %10163 = sst [smem:[#allocation101_spill]] %s8511_s19  ;;  %s7248_s5 = sld [smem:[#allocation7 + $0x5b]] }
 0x103   :  { %10160 = sst [smem:[#allocation98_spill]] %s8498_s26  ;;  %s8513_s18 = sld [smem:[#allocation3 + $0x2e]] }
 0x104   :  { %p9982_p8 = scmp.gt.f32.partialorder %s8498_s26, %s9785_s0  ;;  %s7251_s14 = sld [smem:[#allocation7 + $0x5d]] }
 0x105   :  { %s8519_s24 = sld [smem:[#allocation3 + $0x2f]]  ;;  %s8529_s23 = sld [smem:[#allocation3 + $0x30]] }
 0x106   :  { %s8521_s21 = sld [smem:[#allocation7 + $0x5f]] }
 0x107   :  { %10162 = sst [smem:[#allocation100_spill]] %s8509_s1  ;;  %p10024_p5 = scmp.gt.f32.partialorder %s8509_s1, %s9785_s0 }
 0x108   :  { %7433 = sst [smem:[%s701_s30]] (%p9982_p8), %s7242_s16 }
 0x109   :  { %10164 = sst [smem:[#allocation102_spill]] %s8513_s18  ;;  %p9992_p7 = scmp.gt.f32.partialorder %s8513_s18, %s9785_s0 }
 0x10a   :  { %s705_s13 = scalar_select %p9982_p8, 1, 0 }
 0x10b   :  { %10165 = sst [smem:[#allocation103_spill]] %s8519_s24  ;;  %p10015_p8 = scmp.gt.f32.partialorder %s8519_s24, %s9785_s0 }
 0x10c   :  { %10166 = sst [smem:[#allocation104_spill]] %s8529_s23  ;;  %s8545_s15 = sadd.s32 %s705_s13, %s8501_s6 }
 0x10d   :  { %10167 = sst [smem:[#allocation105_spill]] %s8545_s15  ;;  %s716_s10 = scalar_lea.smem [#allocation10], %s8545_s15 }
 0x10e   :  { %7436 = sst [smem:[%s716_s10]] (%p10024_p5), %s7245_s8  ;;  %p9999_p9 = scmp.gt.f32.partialorder %s8529_s23, %s9785_s0 }
 0x10f   :  { %s720_s16 = scalar_select %p10024_p5, 1, 0 }
 0x110   :  { %s735_s6 = scalar_select %p10016_p6, 1, 0 }
 0x111   :  { %s8572_s17 = sadd.s32 %s720_s16, %s8545_s15  ;;  %s8593_s16 = sld [smem:[#allocation3 + $0x31]] }
 0x112   :  { %10168 = sst [smem:[#allocation106_spill]] %s8572_s17  ;;  %s8579_s10 = sadd.s32 %s735_s6, %s8572_s17 }
 0x113   :  { %10169 = sst [smem:[#allocation107_spill]] %s8579_s10  ;;  %s731_s28 = scalar_lea.smem [#allocation10], %s8572_s17 }
 0x114   :  { %7439 = sst [smem:[%s731_s28]] (%p10016_p6), %s7248_s5  ;;  %s746_s22 = scalar_lea.smem [#allocation10], %s8579_s10 }
 0x115   :  { %7442 = sst [smem:[%s746_s22]] (%p9992_p7), %s7251_s14 }
 0x116   :  { %s750_s20 = scalar_select %p9992_p7, 1, 0 }
 0x117   :  { %10170 = sst [smem:[#allocation108_spill]] %s8593_s16  ;;  %s7260_s14 = sld [smem:[#allocation7 + $0x63]] }
 0x118   :  { %s765_s5 = scalar_select %p10015_p8, 1, 0 }
 0x119   :  { %s8606_s28 = sadd.s32 %s750_s20, %s8579_s10  ;;  %p10010_p7 = scmp.gt.f32.partialorder %s8593_s16, %s9785_s0 }
 0x11a   :  { %10171 = sst [smem:[#allocation109_spill]] %s8606_s28  ;;  %s8609_s26 = sadd.s32 %s765_s5, %s8606_s28 }
 0x11b   :  { %10172 = sst [smem:[#allocation110_spill]] %s8609_s26  ;;  %s761_s3 = scalar_lea.smem [#allocation10], %s8606_s28 }
 0x11c   :  { %7445 = sst [smem:[%s761_s3]] (%p10015_p8), %s8521_s21  ;;  %s776_s13 = scalar_lea.smem [#allocation10], %s8609_s26 }
 0x11d   :  { %7448 = sst [smem:[%s776_s13]] (%p9999_p9), %s7257_s11 }
 0x11e   :  { %s780_s28 = scalar_select %p9999_p9, 1, 0 }
 0x11f   :  { %s795_s21 = scalar_select %p10010_p7, 1, 0 }
 0x120   :  { %s8639_s3 = sadd.s32 %s780_s28, %s8609_s26  ;;  %s8641_s22 = sld [smem:[#allocation3 + $0x32]] }
 0x121   :  { %10173 = sst [smem:[#allocation111_spill]] %s8639_s3  ;;  %s8644_s11 = sadd.s32 %s795_s21, %s8639_s3 }
 0x122   :  { %10175 = sst [smem:[#allocation113_spill]] %s8644_s11  ;;  %s791_s12 = scalar_lea.smem [#allocation10], %s8639_s3 }
 0x123   :  { %7451 = sst [smem:[%s791_s12]] (%p10010_p7), %s7260_s14  ;;  %s806_s13 = scalar_lea.smem [#allocation10], %s8644_s11 }
 0x124   :  { %s7263_s18 = sld [smem:[#allocation7 + $0x65]]  ;;  %s8652_s10 = sld [smem:[#allocation3 + $0x33]] }
 0x125   :  { %s7266_s28 = sld [smem:[#allocation7 + $0x67]]  ;;  %s8654_s30 = sld [smem:[#allocation3 + $0x34]] }
 0x126   :  { %10174 = sst [smem:[#allocation112_spill]] %s8641_s22  ;;  %s7269_s6 = sld [smem:[#allocation7 + $0x69]] }
 0x127   :  { %s8656_s20 = sld [smem:[#allocation3 + $0x35]]  ;;  %p10017_p9 = scmp.gt.f32.partialorder %s8641_s22, %s9785_s0 }
 0x128   :  { %s7272_s14 = sld [smem:[#allocation7 + $0x6b]]  ;;  %s8662_s21 = sld [smem:[#allocation3 + $0x36]] }
 0x129   :  { %s8664_s12 = sld [smem:[#allocation7 + $0x6d]]  ;;  %s8672_s3 = sld [smem:[#allocation3 + $0x37]] }
 0x12a   :  { %10176 = sst [smem:[#allocation114_spill]] %s8652_s10  ;;  %p10059_p7 = scmp.gt.f32.partialorder %s8652_s10, %s9785_s0 }
 0x12b   :  { %10177 = sst [smem:[#allocation115_spill]] %s8654_s30  ;;  %p10051_p8 = scmp.gt.f32.partialorder %s8654_s30, %s9785_s0 }
 0x12c   :  { %7454 = sst [smem:[%s806_s13]] (%p10017_p9), %s7263_s18 }
 0x12d   :  { %10178 = sst [smem:[#allocation116_spill]] %s8656_s20  ;;  %p10027_p6 = scmp.gt.f32.partialorder %s8656_s20, %s9785_s0 }
 0x12e   :  { %10179 = sst [smem:[#allocation117_spill]] %s8662_s21  ;;  %s7278_s23 = sld [smem:[#allocation7 + $0x6f]] }
 0x12f   :  { %10180 = sst [smem:[#allocation118_spill]] %s8672_s3  ;;  %p10034_p5 = scmp.gt.f32.partialorder %s8672_s3, %s9785_s0 }
 0x130   :  { %s810_s5 = scalar_select %p10017_p9, 1, 0 }
 0x131   :  { %p10050_p9 = scmp.gt.f32.partialorder %s8662_s21, %s9785_s0  ;;  %s7284_s20 = sld [smem:[#allocation7 + $0x73]] }
 0x132   :  { %s8688_s16 = sadd.s32 %s810_s5, %s8644_s11  ;;  %s8797_s13 = sld [smem:[#allocation3 + $0x3b]] }
 0x133   :  { %10181 = sst [smem:[#allocation119_spill]] %s8688_s16  ;;  %s821_s17 = scalar_lea.smem [#allocation10], %s8688_s16 }
 0x134   :  { %7457 = sst [smem:[%s821_s17]] (%p10059_p7), %s7266_s28 }
 0x135   :  { %s825_s18 = scalar_select %p10059_p7, 1, 0 }
 0x136   :  { %s840_s11 = scalar_select %p10051_p8, 1, 0 }
 0x137   :  { %s8715_s15 = sadd.s32 %s825_s18, %s8688_s16  ;;  %s8736_s18 = sld [smem:[#allocation3 + $0x38]] }
 0x138   :  { %10182 = sst [smem:[#allocation120_spill]] %s8715_s15  ;;  %s8722_s17 = sadd.s32 %s840_s11, %s8715_s15 }
 0x139   :  { %10183 = sst [smem:[#allocation121_spill]] %s8722_s17  ;;  %s836_s24 = scalar_lea.smem [#allocation10], %s8715_s15 }
 0x13a   :  { %7460 = sst [smem:[%s836_s24]] (%p10051_p8), %s7269_s6  ;;  %s851_s19 = scalar_lea.smem [#allocation10], %s8722_s17 }
 0x13b   :  { %7463 = sst [smem:[%s851_s19]] (%p10027_p6), %s7272_s14 }
 0x13c   :  { %s855_s8 = scalar_select %p10027_p6, 1, 0 }
 0x13d   :  { %10184 = sst [smem:[#allocation122_spill]] %s8736_s18  ;;  %s7281_s14 = sld [smem:[#allocation7 + $0x71]] }
 0x13e   :  { %s870_s6 = scalar_select %p10050_p9, 1, 0 }
 0x13f   :  { %s8749_s24 = sadd.s32 %s855_s8, %s8722_s17  ;;  %p10045_p6 = scmp.gt.f32.partialorder %s8736_s18, %s9785_s0 }
 0x140   :  { %10185 = sst [smem:[#allocation123_spill]] %s8749_s24  ;;  %s8752_s22 = sadd.s32 %s870_s6, %s8749_s24 }
 0x141   :  { %10186 = sst [smem:[#allocation124_spill]] %s8752_s22  ;;  %s866_s1 = scalar_lea.smem [#allocation10], %s8749_s24 }
 0x142   :  { %7466 = sst [smem:[%s866_s1]] (%p10050_p9), %s8664_s12  ;;  %s881_s5 = scalar_lea.smem [#allocation10], %s8752_s22 }
 0x143   :  { %7469 = sst [smem:[%s881_s5]] (%p10034_p5), %s7278_s23  ;;  %p10070_p9 = scmp.gt.f32.partialorder %s8797_s13, %s9785_s0 }
 0x144   :  { %s885_s24 = scalar_select %p10034_p5, 1, 0 }
 0x145   :  { %s900_s12 = scalar_select %p10045_p6, 1, 0 }
 0x146   :  { %s8782_s1 = sadd.s32 %s885_s24, %s8752_s22  ;;  %s8784_s19 = sld [smem:[#allocation3 + $0x39]] }
 0x147   :  { %10187 = sst [smem:[#allocation125_spill]] %s8782_s1  ;;  %s8787_s23 = sadd.s32 %s900_s12, %s8782_s1 }
 0x148   :  { %10189 = sst [smem:[#allocation127_spill]] %s8787_s23  ;;  %s896_s26 = scalar_lea.smem [#allocation10], %s8782_s1 }
 0x149   :  { %7472 = sst [smem:[%s896_s26]] (%p10045_p6), %s7281_s14  ;;  %s911_s5 = scalar_lea.smem [#allocation10], %s8787_s23 }
 0x14a   :  { %s8795_s17 = sld [smem:[#allocation3 + $0x3a]]  ;;  %s7287_s24 = sld [smem:[#allocation7 + $0x75]] }
 0x14b   :  { %s7290_s11 = sld [smem:[#allocation7 + $0x77]]  ;;  %s8799_s8 = sld [smem:[#allocation3 + $0x3c]] }
 0x14c   :  { %10188 = sst [smem:[#allocation126_spill]] %s8784_s19  ;;  %p10052_p5 = scmp.gt.f32.partialorder %s8784_s19, %s9785_s0 }
 0x14d   :  { %s7293_s14 = sld [smem:[#allocation7 + $0x79]]  ;;  %s8805_s12 = sld [smem:[#allocation3 + $0x3d]] }
 0x14e   :  { %s8807_s26 = sld [smem:[#allocation7 + $0x7b]]  ;;  %s8815_s1 = sld [smem:[#allocation3 + $0x3e]] }
 0x14f   :  { %7475 = sst [smem:[%s911_s5]] (%p10052_p5), %s7284_s20 }
 0x150   :  { %s915_s6 = scalar_select %p10052_p5, 1, 0 }
 0x151   :  { %10190 = sst [smem:[#allocation128_spill]] %s8799_s8  ;;  %p10072_p6 = scmp.gt.f32.partialorder %s8795_s17, %s9785_s0 }
 0x152   :  { %s8831_s18 = sadd.s32 %s915_s6, %s8787_s23  ;;  %p10062_p8 = scmp.gt.f32.partialorder %s8799_s8, %s9785_s0 }
 0x153   :  { %s7299_s3 = sld [smem:[#allocation7 + $0x7d]]  ;;  %s926_s15 = scalar_lea.smem [#allocation10], %s8831_s18 }
 0x154   :  { %7478 = sst [smem:[%s926_s15]] (%p10072_p6), %s7287_s24  ;;  %p10069_p5 = scmp.gt.f32.partialorder %s8805_s12, %s9785_s0 }
 0x155   :  { %s930_s20 = scalar_select %p10072_p6, 1, 0 }
 0x156   :  { %s945_s23 = scalar_select %p10070_p9, 1, 0 }
 0x157   :  { %s8858_s16 = sadd.s32 %s930_s20, %s8831_s18  ;;  %p10071_p7 = scmp.gt.f32.partialorder %s8815_s1, %s9785_s0 }
 0x158   :  { %10191 = sst [smem:[#allocation129_spill]] %s8858_s16  ;;  %s8865_s15 = sadd.s32 %s945_s23, %s8858_s16 }
 0x159   :  { %10192 = sst [smem:[#allocation130_spill]] %s8865_s15  ;;  %s941_s21 = scalar_lea.smem [#allocation10], %s8858_s16 }
 0x15a   :  { %7481 = sst [smem:[%s941_s21]] (%p10070_p9), %s7290_s11  ;;  %s956_s30 = scalar_lea.smem [#allocation10], %s8865_s15 }
 0x15b   :  { %7484 = sst [smem:[%s956_s30]] (%p10062_p8), %s7293_s14  ;;  %s1025_s30 = sshll.u32 %s9789_s4, 4  ;;  %s1026_s30 = int_to_ptr.vmem [resolvable:$true] %s1025_s30 }
 0x15c   :  { %s8879_s20 = sld [smem:[#allocation3 + $0x3f]]  ;;  %s7115_s16 = sld [smem:[#allocation7 + $0x2]] }
 0x15d   :  { %s960_s28 = scalar_select %p10062_p8, 1, 0 }
 0x15e   :  { %s975_s11 = scalar_select %p10069_p5, 1, 0 }
 0x15f   :  { %s8892_s21 = sadd.s32 %s960_s28, %s8865_s15  ;;  %s7302_s19 = sld [smem:[#allocation7 + $0x7f]] }
 0x160   :  { %10194 = sst [smem:[#allocation132_spill]] %s8892_s21  ;;  %s8895_s14 = sadd.s32 %s975_s11, %s8892_s21 }
 0x161   :  { %s971_s10 = scalar_lea.smem [#allocation10], %s8892_s21  ;;  %s986_s6 = scalar_lea.smem [#allocation10], %s8895_s14 }
 0x162   :  { %10193 = sst [smem:[#allocation131_spill]] %s8879_s20  ;;  %p993_p8 = scmp.gt.f32.partialorder %s8879_s20, %s9785_s0 }
 0x163   :  { %7487 = sst [smem:[%s971_s10]] (%p10069_p5), %s8807_s26  ;;  %s7525_s5 = scalar_lea.vmem %s1026_s30, 16 }
 0x164   :  { %7490 = sst [smem:[%s986_s6]] (%p10071_p7), %s7299_s3  ;;  %p7526_p5 = scmp.ne.s32.totalorder %s1026_s30, %s7525_s5 }
 0x165   :  { %s990_s21 = scalar_select %p10071_p7, 1, 0 }
 0x166   :  { %s53_s10 = sld [smem:[#allocation7]]  ;;  %p7530_p9 = scmp.lt.s32.totalorder %s1026_s30, %s1026_s30 }
 0x167   :  { %s8923_s26 = sadd.s32 %s990_s21, %s8895_s14  ;;  %p7531_p7 = scmp.lt.s32.totalorder %s7525_s5, %s7525_s5 }
 0x168   :  { %10195 = sst [smem:[#allocation133_spill]] %s8923_s26  ;;  %s1001_s22 = scalar_lea.smem [#allocation10], %s8923_s26 }
 0x169   :  { %7493 = sst [smem:[%s1001_s22]] (%p993_p8), %s7302_s19  ;;  %p7532_p6 = por %p7531_p7, %p7530_p9 }
 0x16b   :  { %p7533_p4 = pnand %p7532_p6, %p7526_p5 }
 0x16d   :  { %7536 = shalt.err (!%p7533_p4)
}
 0x16e   :  { %s7583_s4 = smov [#allocation10]   ;;  %s10196_s8 = sld [smem:[#allocation19_spill]] }
 0x16f   :  { %1028 = dma.smem_to_vmem %s7583_s4, 16, %s1026_s30, [#allocation11]  }
 0x170   :  { %s10197_s19 = sld [smem:[#allocation23_spill]]  ;;  %7305 = sst [smem:[#allocation12]] (%p49_p10), %s7628_s2 }
 0x171   :  { %s10198_s23 = sld [smem:[#allocation20_spill]]  ;;  %s7118_s28 = sld [smem:[#allocation7 + $0x4]] }
 0x172   :  { %s73_s24 = scalar_lea.smem [#allocation12], %s7668_s29  ;;  %7303 = sst [smem:[#allocation9]] (%p49_p10), %s53_s10 }
 0x173   :  { %7308 = sst [smem:[%s73_s24]] (%p63_p11), %s7630_s7  ;;  %s68_s30 = scalar_lea.smem [#allocation9], %s7668_s29 }
 0x174   :  { %7306 = sst [smem:[%s68_s30]] (%p63_p11), %s7115_s16  ;;  %s88_s11 = scalar_lea.smem [#allocation12], %s7686_s25 }
 0x175   :  { %s7121_s15 = sld [smem:[#allocation7 + $0x6]]  ;;  %s10200_s24 = sld [smem:[#allocation21_spill]] }
 0x176   :  { %s10199_s21 = sld [smem:[#allocation25_spill]]  ;;  %s10201_s2 = sld [smem:[#allocation26_spill]] }
 0x177   :  { %7311 = sst [smem:[%s88_s11]] (%p78_p12), %s7632_s9  ;;  %s83_s3 = scalar_lea.smem [#allocation9], %s7686_s25 }
 0x178   :  { %s7124_s10 = sld [smem:[#allocation7 + $0x8]]  ;;  %s10202_s29 = sld [smem:[#allocation22_spill]] }
 0x179   :  { %7309 = sst [smem:[%s83_s3]] (%p78_p12), %s7118_s28  ;;  %s103_s16 = scalar_lea.smem [#allocation12], %s7713_s27 }
 0x17a   :  { %7314 = sst [smem:[%s103_s16]] (%p93_p13), %s10196_s8  ;;  %s118_s20 = scalar_lea.smem [#allocation12], %s10197_s19 }
 0x17b   :  { %7317 = sst [smem:[%s118_s20]] (%p108_p0), %s10198_s23  ;;  %s98_s9 = scalar_lea.smem [#allocation9], %s7713_s27 }
 0x17c   :  { %s7127_s25 = sld [smem:[#allocation7 + $0xa]]  ;;  %s10203_s22 = sld [smem:[#allocation27_spill]] }
 0x17d   :  { %s10204_s6 = sld [smem:[#allocation24_spill]]  ;;  %s10205_s7 = sld [smem:[#allocation29_spill]] }
 0x17e   :  { %7312 = sst [smem:[%s98_s9]] (%p93_p13), %s7121_s15  ;;  %s113_s5 = scalar_lea.smem [#allocation9], %s10197_s19 }
 0x17f   :  { %s7130_s16 = sld [smem:[#allocation7 + $0xc]]  ;;  %s10206_s30 = sld [smem:[#allocation28_spill]] }
 0x180   :  { %7315 = sst [smem:[%s113_s5]] (%p108_p0), %s7124_s10  ;;  %s133_s20 = scalar_lea.smem [#allocation12], %s10199_s21 }
 0x181   :  { %7320 = sst [smem:[%s133_s20]] (%p123_p1), %s10200_s24  ;;  %s148_s8 = scalar_lea.smem [#allocation12], %s10201_s2 }
 0x182   :  { %7323 = sst [smem:[%s148_s8]] (%p138_p2), %s10202_s29  ;;  %s128_s23 = scalar_lea.smem [#allocation9], %s10199_s21 }
 0x183   :  { %s7133_s19 = sld [smem:[#allocation7 + $0xe]]  ;;  %s10207_s28 = sld [smem:[#allocation35_spill]] }
 0x184   :  { %s10208_s5 = sld [smem:[#allocation30_spill]]  ;;  %s10209_s26 = sld [smem:[#allocation36_spill]] }
 0x185   :  { %7318 = sst [smem:[%s128_s23]] (%p123_p1), %s7127_s25  ;;  %s143_s20 = scalar_lea.smem [#allocation9], %s10201_s2 }
 0x186   :  { %s7136_s4 = sld [smem:[#allocation7 + $0x10]]  ;;  %s10210_s11 = sld [smem:[#allocation31_spill]] }
 0x187   :  { %7321 = sst [smem:[%s143_s20]] (%p138_p2), %s7130_s16  ;;  %s163_s8 = scalar_lea.smem [#allocation12], %s10203_s22 }
 0x188   :  { %7326 = sst [smem:[%s163_s8]] (%p153_p3), %s10204_s6  ;;  %s178_s24 = scalar_lea.smem [#allocation12], %s10205_s7 }
 0x189   :  { %p10211_p10 = scmp.gt.f32.partialorder %s10206_s30, %s9785_s0  ;;  %s7139_s2 = sld [smem:[#allocation7 + $0x12]] }
 0x18a   :  { %s10212_s10 = sld [smem:[#allocation37_spill]]  ;;  %s158_s29 = scalar_lea.smem [#allocation9], %s10203_s22 }
 0x18b   :  { %7329 = sst [smem:[%s178_s24]] (%p10211_p10), %s10206_s30  ;;  %s173_s21 = scalar_lea.smem [#allocation9], %s10205_s7 }
 0x18c   :  { %s10213_s20 = sld [smem:[#allocation32_spill]]  ;;  %s10214_s27 = sld [smem:[#allocation39_spill]] }
 0x18d   :  { %7324 = sst [smem:[%s158_s29]] (%p153_p3), %s7133_s19  ;;  %p10216_p11 = pmov %p10211_p10 }
 0x18e   :  { %s7142_s15 = sld [smem:[#allocation7 + $0x14]]  ;;  %s10215_s8 = sld [smem:[#allocation33_spill]] }
 0x18f   :  { %7327 = sst [smem:[%s173_s21]] (%p10216_p11), %s7136_s4  ;;  %s193_s24 = scalar_lea.smem [#allocation12], %s10207_s28 }
 0x190   :  { %p10217_p12 = scmp.gt.f32.partialorder %s10208_s5, %s9785_s0  ;;  %s208_s6 = scalar_lea.smem [#allocation12], %s10209_s26 }
 0x191   :  { %p10218_p13 = scmp.gt.f32.partialorder %s10210_s11, %s9785_s0  ;;  %s7145_s7 = sld [smem:[#allocation7 + $0x16]] }
 0x192   :  { %7332 = sst [smem:[%s193_s24]] (%p10217_p12), %s10208_s5  ;;  %s188_s30 = scalar_lea.smem [#allocation9], %s10207_s28 }
 0x193   :  { %7335 = sst [smem:[%s208_s6]] (%p10218_p13), %s10210_s11  ;;  %p10220_p0 = pmov %p10217_p12 }
 0x194   :  { %s10219_s16 = sld [smem:[#allocation40_spill]]  ;;  %s10221_s21 = sld [smem:[#allocation34_spill]] }
 0x195   :  { %7330 = sst [smem:[%s188_s30]] (%p10220_p0), %s7139_s2  ;;  %s203_s22 = scalar_lea.smem [#allocation9], %s10209_s26 }
 0x196   :  { %s10222_s9 = sld [smem:[#allocation41_spill]]  ;;  %s7148_s25 = sld [smem:[#allocation7 + $0x18]] }
 0x197   :  { %s10223_s24 = sld [smem:[#allocation38_spill]]  ;;  %p10224_p1 = pmov %p10218_p13 }
 0x198   :  { %s223_s6 = scalar_lea.smem [#allocation12], %s10212_s10  ;;  %p10225_p2 = scmp.gt.f32.partialorder %s10213_s20, %s9785_s0 }
 0x199   :  { %7333 = sst [smem:[%s203_s22]] (%p10224_p1), %s7142_s15  ;;  %s238_s5 = scalar_lea.smem [#allocation12], %s10214_s27 }
 0x19a   :  { %7338 = sst [smem:[%s223_s6]] (%p10225_p2), %s10213_s20  ;;  %p10226_p3 = scmp.gt.f32.partialorder %s10215_s8, %s9785_s0 }
 0x19b   :  { %s7151_s26 = sld [smem:[#allocation7 + $0x1a]]  ;;  %s10227_s4 = sld [smem:[#allocation43_spill]] }
 0x19c   :  { %7341 = sst [smem:[%s238_s5]] (%p10226_p3), %s10215_s8  ;;  %s218_s11 = scalar_lea.smem [#allocation9], %s10212_s10 }
 0x19d   :  { %p10228_p4 = pmov %p10225_p2  ;;  %s10229_s22 = sld [smem:[#allocation42_spill]] }
 0x19e   :  { %s10230_s23 = sld [smem:[#allocation49_spill]]  ;;  %s7154_s19 = sld [smem:[#allocation7 + $0x1c]] }
 0x19f   :  { %7336 = sst [smem:[%s218_s11]] (%p10228_p4), %s7145_s7  ;;  %s233_s28 = scalar_lea.smem [#allocation9], %s10214_s27 }
 0x1a0   :  { %s10231_s6 = sld [smem:[#allocation44_spill]]  ;;  %p10232_p5 = pmov %p10226_p3 }
 0x1a1   :  { %s253_s5 = scalar_lea.smem [#allocation12], %s10219_s16  ;;  %p10233_p6 = scmp.gt.f32.partialorder %s10221_s21, %s9785_s0 }
 0x1a2   :  { %7339 = sst [smem:[%s233_s28]] (%p10232_p5), %s7148_s25  ;;  %s268_s20 = scalar_lea.smem [#allocation12], %s10222_s9 }
 0x1a3   :  { %7344 = sst [smem:[%s253_s5]] (%p10233_p6), %s10221_s21  ;;  %p10234_p7 = scmp.gt.f32.partialorder %s10223_s24, %s9785_s0 }
 0x1a4   :  { %s7157_s27 = sld [smem:[#allocation7 + $0x1e]]  ;;  %s10235_s15 = sld [smem:[#allocation50_spill]] }
 0x1a5   :  { %7347 = sst [smem:[%s268_s20]] (%p10234_p7), %s10223_s24  ;;  %s248_s8 = scalar_lea.smem [#allocation9], %s10219_s16 }
 0x1a6   :  { %p10236_p9 = pmov %p10233_p6  ;;  %s10237_s28 = sld [smem:[#allocation45_spill]] }
 0x1a7   :  { %s10238_s29 = sld [smem:[#allocation51_spill]]  ;;  %s10239_s5 = sld [smem:[#allocation46_spill]] }
 0x1a8   :  { %7342 = sst [smem:[%s248_s8]] (%p10236_p9), %s7151_s26  ;;  %s263_s10 = scalar_lea.smem [#allocation9], %s10222_s9 }
 0x1a9   :  { %s7160_s2 = sld [smem:[#allocation7 + $0x20]]  ;;  %p10240_p10 = pmov %p10234_p7 }
 0x1aa   :  { %s283_s20 = scalar_lea.smem [#allocation12], %s10227_s4  ;;  %p10241_p11 = scmp.gt.f32.partialorder %s10229_s22, %s9785_s0 }
 0x1ab   :  { %7345 = sst [smem:[%s263_s10]] (%p10240_p10), %s7154_s19  ;;  %s298_s21 = scalar_lea.smem [#allocation12], %s10230_s23 }
 0x1ac   :  { %7350 = sst [smem:[%s283_s20]] (%p10241_p11), %s10229_s22  ;;  %p10242_p12 = scmp.gt.f32.partialorder %s10231_s6, %s9785_s0 }
 0x1ad   :  { %s7163_s9 = sld [smem:[#allocation7 + $0x22]]  ;;  %s278_s24 = scalar_lea.smem [#allocation9], %s10227_s4 }
 0x1ae   :  { %7353 = sst [smem:[%s298_s21]] (%p10242_p12), %s10231_s6  ;;  %p10244_p13 = pmov %p10241_p11 }
 0x1af   :  { %s10243_s25 = sld [smem:[#allocation53_spill]]  ;;  %s10245_s10 = sld [smem:[#allocation47_spill]] }
 0x1b0   :  { %7348 = sst [smem:[%s278_s24]] (%p10244_p13), %s7157_s27  ;;  %s293_s16 = scalar_lea.smem [#allocation9], %s10230_s23 }
 0x1b1   :  { %s10246_s30 = sld [smem:[#allocation54_spill]]  ;;  %s7166_s7 = sld [smem:[#allocation7 + $0x24]] }
 0x1b2   :  { %s10247_s20 = sld [smem:[#allocation48_spill]]  ;;  %p10248_p0 = pmov %p10242_p12 }
 0x1b3   :  { %s313_s21 = scalar_lea.smem [#allocation12], %s10235_s15  ;;  %p10249_p1 = scmp.gt.f32.partialorder %s10237_s28, %s9785_s0 }
 0x1b4   :  { %7351 = sst [smem:[%s293_s16]] (%p10248_p0), %s7160_s2  ;;  %s328_s22 = scalar_lea.smem [#allocation12], %s10238_s29 }
 0x1b5   :  { %7356 = sst [smem:[%s313_s21]] (%p10249_p1), %s10237_s28  ;;  %p10250_p2 = scmp.gt.f32.partialorder %s10239_s5, %s9785_s0 }
 0x1b6   :  { %s7169_s23 = sld [smem:[#allocation7 + $0x26]]  ;;  %s10251_s19 = sld [smem:[#allocation55_spill]] }
 0x1b7   :  { %7359 = sst [smem:[%s328_s22]] (%p10250_p2), %s10239_s5  ;;  %s308_s6 = scalar_lea.smem [#allocation9], %s10235_s15 }
 0x1b8   :  { %p10252_p3 = pmov %p10249_p1  ;;  %s10253_s16 = sld [smem:[#allocation52_spill]] }
 0x1b9   :  { %s10254_s11 = sld [smem:[#allocation57_spill]]  ;;  %s7172_s26 = sld [smem:[#allocation7 + $0x28]] }
 0x1ba   :  { %7354 = sst [smem:[%s308_s6]] (%p10252_p3), %s7163_s9  ;;  %s323_s4 = scalar_lea.smem [#allocation9], %s10238_s29 }
 0x1bb   :  { %s10255_s21 = sld [smem:[#allocation56_spill]]  ;;  %p10256_p4 = pmov %p10250_p2 }
 0x1bc   :  { %s343_s22 = scalar_lea.smem [#allocation12], %s10243_s25  ;;  %p10257_p5 = scmp.gt.f32.partialorder %s10245_s10, %s9785_s0 }
 0x1bd   :  { %7357 = sst [smem:[%s323_s4]] (%p10256_p4), %s7166_s7  ;;  %s358_s28 = scalar_lea.smem [#allocation12], %s10246_s30 }
 0x1be   :  { %7362 = sst [smem:[%s343_s22]] (%p10257_p5), %s10245_s10  ;;  %p10258_p6 = scmp.gt.f32.partialorder %s10247_s20, %s9785_s0 }
 0x1bf   :  { %s7175_s29 = sld [smem:[#allocation7 + $0x2a]]  ;;  %s10259_s2 = sld [smem:[#allocation63_spill]] }
 0x1c0   :  { %7365 = sst [smem:[%s358_s28]] (%p10258_p6), %s10247_s20  ;;  %s338_s5 = scalar_lea.smem [#allocation9], %s10243_s25 }
 0x1c1   :  { %p10260_p7 = pmov %p10257_p5  ;;  %s10261_s4 = sld [smem:[#allocation58_spill]] }
 0x1c2   :  { %s10262_s8 = sld [smem:[#allocation64_spill]]  ;;  %s7178_s27 = sld [smem:[#allocation7 + $0x2c]] }
 0x1c3   :  { %7360 = sst [smem:[%s338_s5]] (%p10260_p7), %s7169_s23  ;;  %s353_s15 = scalar_lea.smem [#allocation9], %s10246_s30 }
 0x1c4   :  { %s10263_s22 = sld [smem:[#allocation59_spill]]  ;;  %p10264_p9 = pmov %p10258_p6 }
 0x1c5   :  { %s373_s28 = scalar_lea.smem [#allocation12], %s10251_s19  ;;  %p10265_p10 = scmp.gt.f32.partialorder %s10253_s16, %s9785_s0 }
 0x1c6   :  { %7363 = sst [smem:[%s353_s15]] (%p10264_p9), %s7172_s26  ;;  %s388_s10 = scalar_lea.smem [#allocation12], %s10254_s11 }
 0x1c7   :  { %7368 = sst [smem:[%s373_s28]] (%p10265_p10), %s10253_s16  ;;  %p10266_p11 = scmp.gt.f32.partialorder %s10255_s21, %s9785_s0 }
 0x1c8   :  { %s7181_s30 = sld [smem:[#allocation7 + $0x2e]]  ;;  %s368_s20 = scalar_lea.smem [#allocation9], %s10251_s19 }
 0x1c9   :  { %7371 = sst [smem:[%s388_s10]] (%p10266_p11), %s10255_s21  ;;  %p10268_p12 = pmov %p10265_p10 }
 0x1ca   :  { %s10267_s7 = sld [smem:[#allocation65_spill]]  ;;  %s10269_s15 = sld [smem:[#allocation60_spill]] }
 0x1cb   :  { %7366 = sst [smem:[%s368_s20]] (%p10268_p12), %s7175_s29  ;;  %s383_s25 = scalar_lea.smem [#allocation9], %s10254_s11 }
 0x1cc   :  { %s10270_s24 = sld [smem:[#allocation67_spill]]  ;;  %s10271_s28 = sld [smem:[#allocation61_spill]] }
 0x1cd   :  { %s7184_s9 = sld [smem:[#allocation7 + $0x30]]  ;;  %p10272_p13 = pmov %p10266_p11 }
 0x1ce   :  { %s403_s10 = scalar_lea.smem [#allocation12], %s10259_s2  ;;  %p10273_p0 = scmp.gt.f32.partialorder %s10261_s4, %s9785_s0 }
 0x1cf   :  { %7369 = sst [smem:[%s383_s25]] (%p10272_p13), %s7178_s27  ;;  %s418_s16 = scalar_lea.smem [#allocation12], %s10262_s8 }
 0x1d0   :  { %7374 = sst [smem:[%s403_s10]] (%p10273_p0), %s10261_s4  ;;  %p10274_p1 = scmp.gt.f32.partialorder %s10263_s22, %s9785_s0 }
 0x1d1   :  { %s7187_s11 = sld [smem:[#allocation7 + $0x32]]  ;;  %s10275_s26 = sld [smem:[#allocation68_spill]] }
 0x1d2   :  { %7377 = sst [smem:[%s418_s16]] (%p10274_p1), %s10263_s22  ;;  %s398_s21 = scalar_lea.smem [#allocation9], %s10259_s2 }
 0x1d3   :  { %p10276_p2 = pmov %p10273_p0  ;;  %s10277_s25 = sld [smem:[#allocation62_spill]] }
 0x1d4   :  { %s10278_s6 = sld [smem:[#allocation69_spill]]  ;;  %s7190_s23 = sld [smem:[#allocation7 + $0x34]] }
 0x1d5   :  { %7372 = sst [smem:[%s398_s21]] (%p10276_p2), %s7181_s30  ;;  %s413_s19 = scalar_lea.smem [#allocation9], %s10262_s8 }
 0x1d6   :  { %s10279_s10 = sld [smem:[#allocation66_spill]]  ;;  %p10280_p3 = pmov %p10274_p1 }
 0x1d7   :  { %s433_s16 = scalar_lea.smem [#allocation12], %s10267_s7  ;;  %p10281_p4 = scmp.gt.f32.partialorder %s10269_s15, %s9785_s0 }
 0x1d8   :  { %7375 = sst [smem:[%s413_s19]] (%p10280_p3), %s7184_s9  ;;  %s448_s4 = scalar_lea.smem [#allocation12], %s10270_s24 }
 0x1d9   :  { %7380 = sst [smem:[%s433_s16]] (%p10281_p4), %s10269_s15  ;;  %p10282_p5 = scmp.gt.f32.partialorder %s10271_s28, %s9785_s0 }
 0x1da   :  { %s7193_s8 = sld [smem:[#allocation7 + $0x36]]  ;;  %s10283_s27 = sld [smem:[#allocation71_spill]] }
 0x1db   :  { %7383 = sst [smem:[%s448_s4]] (%p10282_p5), %s10271_s28  ;;  %s428_s22 = scalar_lea.smem [#allocation9], %s10267_s7 }
 0x1dc   :  { %p10284_p6 = pmov %p10281_p4  ;;  %s10285_s19 = sld [smem:[#allocation70_spill]] }
 0x1dd   :  { %s10286_s5 = sld [smem:[#allocation77_spill]]  ;;  %s7196_s29 = sld [smem:[#allocation7 + $0x38]] }
 0x1de   :  { %7378 = sst [smem:[%s428_s22]] (%p10284_p6), %s7187_s11  ;;  %s443_s2 = scalar_lea.smem [#allocation9], %s10270_s24 }
 0x1df   :  { %s10287_s16 = sld [smem:[#allocation72_spill]]  ;;  %p10288_p7 = pmov %p10282_p5 }
 0x1e0   :  { %s463_s4 = scalar_lea.smem [#allocation12], %s10275_s26  ;;  %p10289_p9 = scmp.gt.f32.partialorder %s10277_s25, %s9785_s0 }
 0x1e1   :  { %7381 = sst [smem:[%s443_s2]] (%p10288_p7), %s7190_s23  ;;  %s478_s15 = scalar_lea.smem [#allocation12], %s10278_s6 }
 0x1e2   :  { %7386 = sst [smem:[%s463_s4]] (%p10289_p9), %s10277_s25  ;;  %p10290_p10 = scmp.gt.f32.partialorder %s10279_s10, %s9785_s0 }
 0x1e3   :  { %s7199_s24 = sld [smem:[#allocation7 + $0x3a]]  ;;  %s10291_s9 = sld [smem:[#allocation78_spill]] }
 0x1e4   :  { %7389 = sst [smem:[%s478_s15]] (%p10290_p10), %s10279_s10  ;;  %s458_s28 = scalar_lea.smem [#allocation9], %s10275_s26 }
 0x1e5   :  { %p10292_p11 = pmov %p10289_p9  ;;  %s10293_s2 = sld [smem:[#allocation73_spill]] }
 0x1e6   :  { %s10294_s20 = sld [smem:[#allocation79_spill]]  ;;  %s10295_s4 = sld [smem:[#allocation74_spill]] }
 0x1e7   :  { %7384 = sst [smem:[%s458_s28]] (%p10292_p11), %s7193_s8  ;;  %s473_s7 = scalar_lea.smem [#allocation9], %s10278_s6 }
 0x1e8   :  { %s7202_s30 = sld [smem:[#allocation7 + $0x3c]]  ;;  %p10296_p12 = pmov %p10290_p10 }
 0x1e9   :  { %s493_s15 = scalar_lea.smem [#allocation12], %s10283_s27  ;;  %p10297_p13 = scmp.gt.f32.partialorder %s10285_s19, %s9785_s0 }
 0x1ea   :  { %7387 = sst [smem:[%s473_s7]] (%p10296_p12), %s7196_s29  ;;  %s508_s25 = scalar_lea.smem [#allocation12], %s10286_s5 }
 0x1eb   :  { %7392 = sst [smem:[%s493_s15]] (%p10297_p13), %s10285_s19  ;;  %p10298_p0 = scmp.gt.f32.partialorder %s10287_s16, %s9785_s0 }
 0x1ec   :  { %s7205_s6 = sld [smem:[#allocation7 + $0x3e]]  ;;  %s488_s10 = scalar_lea.smem [#allocation9], %s10283_s27 }
 0x1ed   :  { %7395 = sst [smem:[%s508_s25]] (%p10298_p0), %s10287_s16  ;;  %p10300_p1 = pmov %p10297_p13 }
 0x1ee   :  { %s10299_s23 = sld [smem:[#allocation81_spill]]  ;;  %s10301_s7 = sld [smem:[#allocation75_spill]] }
 0x1ef   :  { %7390 = sst [smem:[%s488_s10]] (%p10300_p1), %s7199_s24  ;;  %s503_s26 = scalar_lea.smem [#allocation9], %s10286_s5 }
 0x1f0   :  { %s10302_s21 = sld [smem:[#allocation82_spill]]  ;;  %s7208_s11 = sld [smem:[#allocation7 + $0x40]] }
 0x1f1   :  { %s10303_s15 = sld [smem:[#allocation76_spill]]  ;;  %p10304_p2 = pmov %p10298_p0 }
 0x1f2   :  { %s523_s25 = scalar_lea.smem [#allocation12], %s10291_s9  ;;  %p10305_p3 = scmp.gt.f32.partialorder %s10293_s2, %s9785_s0 }
 0x1f3   :  { %7393 = sst [smem:[%s503_s26]] (%p10304_p2), %s7202_s30  ;;  %s538_s19 = scalar_lea.smem [#allocation12], %s10294_s20 }
 0x1f4   :  { %7398 = sst [smem:[%s523_s25]] (%p10305_p3), %s10293_s2  ;;  %p10306_p4 = scmp.gt.f32.partialorder %s10295_s4, %s9785_s0 }
 0x1f5   :  { %s7211_s5 = sld [smem:[#allocation7 + $0x42]]  ;;  %s10307_s29 = sld [smem:[#allocation83_spill]] }
 0x1f6   :  { %7401 = sst [smem:[%s538_s19]] (%p10306_p4), %s10295_s4  ;;  %s518_s16 = scalar_lea.smem [#allocation9], %s10291_s9 }
 0x1f7   :  { %p10308_p5 = pmov %p10305_p3  ;;  %s10309_s26 = sld [smem:[#allocation80_spill]] }
 0x1f8   :  { %s10310_s22 = sld [smem:[#allocation85_spill]]  ;;  %s7214_s8 = sld [smem:[#allocation7 + $0x44]] }
 0x1f9   :  { %7396 = sst [smem:[%s518_s16]] (%p10308_p5), %s7205_s6  ;;  %s533_s27 = scalar_lea.smem [#allocation9], %s10294_s20 }
 0x1fa   :  { %s10311_s25 = sld [smem:[#allocation84_spill]]  ;;  %p10312_p6 = pmov %p10306_p4 }
 0x1fb   :  { %s553_s19 = scalar_lea.smem [#allocation12], %s10299_s23  ;;  %p10313_p7 = scmp.gt.f32.partialorder %s10301_s7, %s9785_s0 }
 0x1fc   :  { %7399 = sst [smem:[%s533_s27]] (%p10312_p6), %s7208_s11  ;;  %s568_s2 = scalar_lea.smem [#allocation12], %s10302_s21 }
 0x1fd   :  { %7404 = sst [smem:[%s553_s19]] (%p10313_p7), %s10301_s7  ;;  %p10314_p9 = scmp.gt.f32.partialorder %s10303_s15, %s9785_s0 }
 0x1fe   :  { %s7217_s20 = sld [smem:[#allocation7 + $0x46]]  ;;  %s10315_s30 = sld [smem:[#allocation91_spill]] }
 0x1ff   :  { %7407 = sst [smem:[%s568_s2]] (%p10314_p9), %s10303_s15  ;;  %s548_s4 = scalar_lea.smem [#allocation9], %s10299_s23 }
 0x200   :  { %p10316_p10 = pmov %p10313_p7  ;;  %s10317_s27 = sld [smem:[#allocation86_spill]] }
 0x201   :  { %s10318_s28 = sld [smem:[#allocation92_spill]]  ;;  %s7220_s24 = sld [smem:[#allocation7 + $0x48]] }
 0x202   :  { %7402 = sst [smem:[%s548_s4]] (%p10316_p10), %s7211_s5  ;;  %s563_s9 = scalar_lea.smem [#allocation9], %s10302_s21 }
 0x203   :  { %s10319_s19 = sld [smem:[#allocation87_spill]]  ;;  %p10320_p11 = pmov %p10314_p9 }
 0x204   :  { %s583_s2 = scalar_lea.smem [#allocation12], %s10307_s29  ;;  %p10321_p12 = scmp.gt.f32.partialorder %s10309_s26, %s9785_s0 }
 0x205   :  { %7405 = sst [smem:[%s563_s9]] (%p10320_p11), %s7214_s8  ;;  %s598_s7 = scalar_lea.smem [#allocation12], %s10310_s22 }
 0x206   :  { %7410 = sst [smem:[%s583_s2]] (%p10321_p12), %s10309_s26  ;;  %p10322_p13 = scmp.gt.f32.partialorder %s10311_s25, %s9785_s0 }
 0x207   :  { %s7223_s21 = sld [smem:[#allocation7 + $0x4a]]  ;;  %s578_s15 = scalar_lea.smem [#allocation9], %s10307_s29 }
 0x208   :  { %7413 = sst [smem:[%s598_s7]] (%p10322_p13), %s10311_s25  ;;  %p10324_p0 = pmov %p10321_p12 }
 0x209   :  { %s10323_s11 = sld [smem:[#allocation93_spill]]  ;;  %s10325_s9 = sld [smem:[#allocation88_spill]] }
 0x20a   :  { %7408 = sst [smem:[%s578_s15]] (%p10324_p0), %s7217_s20  ;;  %s593_s23 = scalar_lea.smem [#allocation9], %s10310_s22 }
 0x20b   :  { %s10326_s10 = sld [smem:[#allocation95_spill]]  ;;  %s10327_s2 = sld [smem:[#allocation89_spill]] }
 0x20c   :  { %s7226_s6 = sld [smem:[#allocation7 + $0x4c]]  ;;  %p10328_p1 = pmov %p10322_p13 }
 0x20d   :  { %s613_s7 = scalar_lea.smem [#allocation12], %s10315_s30  ;;  %p10329_p2 = scmp.gt.f32.partialorder %s10317_s27, %s9785_s0 }
 0x20e   :  { %7411 = sst [smem:[%s593_s23]] (%p10328_p1), %s7220_s24  ;;  %s628_s26 = scalar_lea.smem [#allocation12], %s10318_s28 }
 0x20f   :  { %7416 = sst [smem:[%s613_s7]] (%p10329_p2), %s10317_s27  ;;  %p10330_p3 = scmp.gt.f32.partialorder %s10319_s19, %s9785_s0 }
 0x210   :  { %s7229_s22 = sld [smem:[#allocation7 + $0x4e]]  ;;  %s10331_s8 = sld [smem:[#allocation96_spill]] }
 0x211   :  { %7419 = sst [smem:[%s628_s26]] (%p10330_p3), %s10319_s19  ;;  %s608_s25 = scalar_lea.smem [#allocation9], %s10315_s30 }
 0x212   :  { %p10332_p4 = pmov %p10329_p2  ;;  %s10333_s23 = sld [smem:[#allocation90_spill]] }
 0x213   :  { %s10334_s16 = sld [smem:[#allocation97_spill]]  ;;  %s7232_s5 = sld [smem:[#allocation7 + $0x50]] }
 0x214   :  { %7414 = sst [smem:[%s608_s25]] (%p10332_p4), %s7223_s21  ;;  %s623_s29 = scalar_lea.smem [#allocation9], %s10318_s28 }
 0x215   :  { %s10335_s7 = sld [smem:[#allocation94_spill]]  ;;  %p10336_p5 = pmov %p10330_p3 }
 0x216   :  { %s643_s26 = scalar_lea.smem [#allocation12], %s10323_s11  ;;  %p10337_p6 = scmp.gt.f32.partialorder %s10325_s9, %s9785_s0 }
 0x217   :  { %7417 = sst [smem:[%s623_s29]] (%p10336_p5), %s7226_s6  ;;  %s658_s27 = scalar_lea.smem [#allocation12], %s10326_s10 }
 0x218   :  { %7422 = sst [smem:[%s643_s26]] (%p10337_p6), %s10325_s9  ;;  %p10338_p7 = scmp.gt.f32.partialorder %s10327_s2, %s9785_s0 }
 0x219   :  { %s7235_s28 = sld [smem:[#allocation7 + $0x52]]  ;;  %s10339_s24 = sld [smem:[#allocation99_spill]] }
 0x21a   :  { %7425 = sst [smem:[%s658_s27]] (%p10338_p7), %s10327_s2  ;;  %s638_s19 = scalar_lea.smem [#allocation9], %s10323_s11 }
 0x21b   :  { %p10340_p9 = pmov %p10337_p6  ;;  %s10341_s29 = sld [smem:[#allocation98_spill]] }
 0x21c   :  { %s10342_s4 = sld [smem:[#allocation105_spill]]  ;;  %s7238_s20 = sld [smem:[#allocation7 + $0x54]] }
 0x21d   :  { %7420 = sst [smem:[%s638_s19]] (%p10340_p9), %s7229_s22  ;;  %s653_s30 = scalar_lea.smem [#allocation9], %s10326_s10 }
 0x21e   :  { %s10343_s26 = sld [smem:[#allocation100_spill]]  ;;  %p10344_p10 = pmov %p10338_p7 }
 0x21f   :  { %s673_s27 = scalar_lea.smem [#allocation12], %s10331_s8  ;;  %p10345_p11 = scmp.gt.f32.partialorder %s10333_s23, %s9785_s0 }
 0x220   :  { %7423 = sst [smem:[%s653_s30]] (%p10344_p10), %s7232_s5  ;;  %s688_s9 = scalar_lea.smem [#allocation12], %s10334_s16 }
 0x221   :  { %7428 = sst [smem:[%s673_s27]] (%p10345_p11), %s10333_s23  ;;  %p10346_p12 = scmp.gt.f32.partialorder %s10335_s7, %s9785_s0 }
 0x222   :  { %s7241_s10 = sld [smem:[#allocation7 + $0x56]]  ;;  %s10347_s6 = sld [smem:[#allocation106_spill]] }
 0x223   :  { %7431 = sst [smem:[%s688_s9]] (%p10346_p12), %s10335_s7  ;;  %s668_s2 = scalar_lea.smem [#allocation9], %s10331_s8 }
 0x224   :  { %p10348_p13 = pmov %p10345_p11  ;;  %s10349_s30 = sld [smem:[#allocation101_spill]] }
 0x225   :  { %s10350_s15 = sld [smem:[#allocation107_spill]]  ;;  %s10351_s27 = sld [smem:[#allocation102_spill]] }
 0x226   :  { %7426 = sst [smem:[%s668_s2]] (%p10348_p13), %s7235_s28  ;;  %s683_s11 = scalar_lea.smem [#allocation9], %s10334_s16 }
 0x227   :  { %s7244_s21 = sld [smem:[#allocation7 + $0x58]]  ;;  %p10352_p0 = pmov %p10346_p12 }
 0x228   :  { %s703_s9 = scalar_lea.smem [#allocation12], %s10339_s24  ;;  %p10353_p1 = scmp.gt.f32.partialorder %s10341_s29, %s9785_s0 }
 0x229   :  { %7429 = sst [smem:[%s683_s11]] (%p10352_p0), %s7238_s20  ;;  %s718_s23 = scalar_lea.smem [#allocation12], %s10342_s4 }
 0x22a   :  { %7434 = sst [smem:[%s703_s9]] (%p10353_p1), %s10341_s29  ;;  %p10354_p2 = scmp.gt.f32.partialorder %s10343_s26, %s9785_s0 }
 0x22b   :  { %s7247_s16 = sld [smem:[#allocation7 + $0x5a]]  ;;  %s698_s7 = scalar_lea.smem [#allocation9], %s10339_s24 }
 0x22c   :  { %7437 = sst [smem:[%s718_s23]] (%p10354_p2), %s10343_s26  ;;  %p10356_p3 = pmov %p10353_p1 }
 0x22d   :  { %s10355_s5 = sld [smem:[#allocation109_spill]]  ;;  %s10357_s11 = sld [smem:[#allocation103_spill]] }
 0x22e   :  { %7432 = sst [smem:[%s698_s7]] (%p10356_p3), %s7241_s10  ;;  %s713_s8 = scalar_lea.smem [#allocation9], %s10342_s4 }
 0x22f   :  { %s10358_s25 = sld [smem:[#allocation110_spill]]  ;;  %s7250_s22 = sld [smem:[#allocation7 + $0x5c]] }
 0x230   :  { %s10359_s9 = sld [smem:[#allocation104_spill]]  ;;  %p10360_p4 = pmov %p10354_p2 }
 0x231   :  { %s733_s23 = scalar_lea.smem [#allocation12], %s10347_s6  ;;  %p10361_p5 = scmp.gt.f32.partialorder %s10349_s30, %s9785_s0 }
 0x232   :  { %7435 = sst [smem:[%s713_s8]] (%p10360_p4), %s7244_s21  ;;  %s748_s29 = scalar_lea.smem [#allocation12], %s10350_s15 }
 0x233   :  { %7440 = sst [smem:[%s733_s23]] (%p10361_p5), %s10349_s30  ;;  %p10362_p6 = scmp.gt.f32.partialorder %s10351_s27, %s9785_s0 }
 0x234   :  { %s7253_s4 = sld [smem:[#allocation7 + $0x5e]]  ;;  %s10363_s20 = sld [smem:[#allocation111_spill]] }
 0x235   :  { %7443 = sst [smem:[%s748_s29]] (%p10362_p6), %s10351_s27  ;;  %s728_s26 = scalar_lea.smem [#allocation9], %s10347_s6 }
 0x236   :  { %p10364_p7 = pmov %p10361_p5  ;;  %s10365_s8 = sld [smem:[#allocation108_spill]] }
 0x237   :  { %s10366_s19 = sld [smem:[#allocation113_spill]]  ;;  %s7256_s28 = sld [smem:[#allocation7 + $0x60]] }
 0x238   :  { %7438 = sst [smem:[%s728_s26]] (%p10364_p7), %s7247_s16  ;;  %s743_s24 = scalar_lea.smem [#allocation9], %s10350_s15 }
 0x239   :  { %s10367_s23 = sld [smem:[#allocation112_spill]]  ;;  %p10368_p9 = pmov %p10362_p6 }
 0x23a   :  { %s763_s29 = scalar_lea.smem [#allocation12], %s10355_s5  ;;  %p10369_p10 = scmp.gt.f32.partialorder %s10357_s11, %s9785_s0 }
 0x23b   :  { %7441 = sst [smem:[%s743_s24]] (%p10368_p9), %s7250_s22  ;;  %s778_s30 = scalar_lea.smem [#allocation12], %s10358_s25 }
 0x23c   :  { %7446 = sst [smem:[%s763_s29]] (%p10369_p10), %s10357_s11  ;;  %p10370_p11 = scmp.gt.f32.partialorder %s10359_s9, %s9785_s0 }
 0x23d   :  { %s7259_s15 = sld [smem:[#allocation7 + $0x62]]  ;;  %s10371_s21 = sld [smem:[#allocation119_spill]] }
 0x23e   :  { %7449 = sst [smem:[%s778_s30]] (%p10370_p11), %s10359_s9  ;;  %s758_s27 = scalar_lea.smem [#allocation9], %s10355_s5 }
 0x23f   :  { %p10372_p12 = pmov %p10369_p10  ;;  %s10373_s24 = sld [smem:[#allocation114_spill]] }
 0x240   :  { %s10374_s2 = sld [smem:[#allocation120_spill]]  ;;  %s7262_s10 = sld [smem:[#allocation7 + $0x64]] }
 0x241   :  { %7444 = sst [smem:[%s758_s27]] (%p10372_p12), %s7253_s4  ;;  %s773_s6 = scalar_lea.smem [#allocation9], %s10358_s25 }
 0x242   :  { %s10375_s29 = sld [smem:[#allocation115_spill]]  ;;  %p10376_p13 = pmov %p10370_p11 }
 0x243   :  { %s793_s30 = scalar_lea.smem [#allocation12], %s10363_s20  ;;  %p10377_p0 = scmp.gt.f32.partialorder %s10365_s8, %s9785_s0 }
 0x244   :  { %7447 = sst [smem:[%s773_s6]] (%p10376_p13), %s7256_s28  ;;  %s808_s11 = scalar_lea.smem [#allocation12], %s10366_s19 }
 0x245   :  { %7452 = sst [smem:[%s793_s30]] (%p10377_p0), %s10365_s8  ;;  %p10378_p1 = scmp.gt.f32.partialorder %s10367_s23, %s9785_s0 }
 0x246   :  { %s7265_s25 = sld [smem:[#allocation7 + $0x66]]  ;;  %s788_s9 = scalar_lea.smem [#allocation9], %s10363_s20 }
 0x247   :  { %7455 = sst [smem:[%s808_s11]] (%p10378_p1), %s10367_s23  ;;  %p10380_p2 = pmov %p10377_p0 }
 0x248   :  { %s10379_s22 = sld [smem:[#allocation121_spill]]  ;;  %s10381_s6 = sld [smem:[#allocation116_spill]] }
 0x249   :  { %7450 = sst [smem:[%s788_s9]] (%p10380_p2), %s7259_s15  ;;  %s803_s5 = scalar_lea.smem [#allocation9], %s10366_s19 }
 0x24a   :  { %s10382_s7 = sld [smem:[#allocation123_spill]]  ;;  %s10383_s30 = sld [smem:[#allocation117_spill]] }
 0x24b   :  { %s7268_s16 = sld [smem:[#allocation7 + $0x68]]  ;;  %p10384_p3 = pmov %p10378_p1 }
 0x24c   :  { %s823_s11 = scalar_lea.smem [#allocation12], %s10371_s21  ;;  %p10385_p4 = scmp.gt.f32.partialorder %s10373_s24, %s9785_s0 }
 0x24d   :  { %7453 = sst [smem:[%s803_s5]] (%p10384_p3), %s7262_s10  ;;  %s838_s8 = scalar_lea.smem [#allocation12], %s10374_s2 }
 0x24e   :  { %7458 = sst [smem:[%s823_s11]] (%p10385_p4), %s10373_s24  ;;  %p10386_p5 = scmp.gt.f32.partialorder %s10375_s29, %s9785_s0 }
 0x24f   :  { %s7271_s19 = sld [smem:[#allocation7 + $0x6a]]  ;;  %s10387_s28 = sld [smem:[#allocation124_spill]] }
 0x250   :  { %7461 = sst [smem:[%s838_s8]] (%p10386_p5), %s10375_s29  ;;  %s818_s23 = scalar_lea.smem [#allocation9], %s10371_s21 }
 0x251   :  { %p10388_p6 = pmov %p10385_p4  ;;  %s10389_s5 = sld [smem:[#allocation118_spill]] }
 0x252   :  { %s10390_s26 = sld [smem:[#allocation125_spill]]  ;;  %s7274_s4 = sld [smem:[#allocation7 + $0x6c]] }
 0x253   :  { %7456 = sst [smem:[%s818_s23]] (%p10388_p6), %s7265_s25  ;;  %s833_s20 = scalar_lea.smem [#allocation9], %s10374_s2 }
 0x254   :  { %s10391_s11 = sld [smem:[#allocation122_spill]]  ;;  %p10392_p7 = pmov %p10386_p5 }
 0x255   :  { %s853_s8 = scalar_lea.smem [#allocation12], %s10379_s22  ;;  %p10393_p9 = scmp.gt.f32.partialorder %s10381_s6, %s9785_s0 }
 0x256   :  { %7459 = sst [smem:[%s833_s20]] (%p10392_p7), %s7268_s16  ;;  %s868_s24 = scalar_lea.smem [#allocation12], %s10382_s7 }
 0x257   :  { %7464 = sst [smem:[%s853_s8]] (%p10393_p9), %s10381_s6  ;;  %p10394_p10 = scmp.gt.f32.partialorder %s10383_s30, %s9785_s0 }
 0x258   :  { %s7277_s2 = sld [smem:[#allocation7 + $0x6e]]  ;;  %s10395_s10 = sld [smem:[#allocation127_spill]] }
 0x259   :  { %7467 = sst [smem:[%s868_s24]] (%p10394_p10), %s10383_s30  ;;  %s848_s29 = scalar_lea.smem [#allocation9], %s10379_s22 }
 0x25a   :  { %p10396_p11 = pmov %p10393_p9  ;;  %s10397_s20 = sld [smem:[#allocation126_spill]] }
 0x25b   :  { %s7280_s27 = sld [smem:[#allocation7 + $0x70]]  ;;  %s863_s15 = scalar_lea.smem [#allocation9], %s10382_s7 }
 0x25c   :  { %7462 = sst [smem:[%s848_s29]] (%p10396_p11), %s7271_s19  ;;  %p10398_p12 = pmov %p10394_p10 }
 0x25d   :  { %s883_s9 = scalar_lea.smem [#allocation12], %s10387_s28  ;;  %p10399_p13 = scmp.gt.f32.partialorder %s10389_s5, %s9785_s0 }
 0x25e   :  { %7465 = sst [smem:[%s863_s15]] (%p10398_p12), %s7274_s4  ;;  %s898_s6 = scalar_lea.smem [#allocation12], %s10390_s26 }
 0x25f   :  { %7470 = sst [smem:[%s883_s9]] (%p10399_p13), %s10389_s5  ;;  %p10400_p0 = scmp.gt.f32.partialorder %s10391_s11, %s9785_s0 }
 0x260   :  { %s7283_s7 = sld [smem:[#allocation7 + $0x72]]  ;;  %s10401_s23 = sld [smem:[#allocation129_spill]] }
 0x261   :  { %7473 = sst [smem:[%s898_s6]] (%p10400_p0), %s10391_s11  ;;  %s878_s30 = scalar_lea.smem [#allocation9], %s10387_s28 }
 0x262   :  { %p10402_p1 = pmov %p10399_p13  ;;  %s10403_s16 = sld [smem:[#allocation130_spill]] }
 0x263   :  { %s7286_s3 = sld [smem:[#allocation7 + $0x74]]  ;;  %s10404_s15 = sld [smem:[#allocation128_spill]] }
 0x264   :  { %7468 = sst [smem:[%s878_s30]] (%p10402_p1), %s7277_s2  ;;  %s893_s8 = scalar_lea.smem [#allocation9], %s10390_s26 }
 0x265   :  { %p10405_p2 = pmov %p10400_p0  ;;  %s913_s22 = scalar_lea.smem [#allocation12], %s10395_s10 }
 0x266   :  { %p10406_p3 = scmp.gt.f32.partialorder %s10397_s20, %s9785_s0  ;;  %s928_s5 = scalar_lea.smem [#allocation12], %s8831_s18 }
 0x267   :  { %7471 = sst [smem:[%s893_s8]] (%p10405_p2), %s7280_s27  ;;  %p10407_p4 = scmp.gt.f32.partialorder %s8795_s17, %s9785_s0 }
 0x268   :  { %7476 = sst [smem:[%s913_s22]] (%p10406_p3), %s10397_s20  ;;  %s908_s11 = scalar_lea.smem [#allocation9], %s10395_s10 }
 0x269   :  { %7479 = sst [smem:[%s928_s5]] (%p10407_p4), %s8795_s17  ;;  %p10409_p5 = pmov %p10406_p3 }
 0x26a   :  { %s7289_s26 = sld [smem:[#allocation7 + $0x76]]  ;;  %s10408_s19 = sld [smem:[#allocation132_spill]] }
 0x26b   :  { %7474 = sst [smem:[%s908_s11]] (%p10409_p5), %s7283_s7  ;;  %s923_s4 = scalar_lea.smem [#allocation9], %s8831_s18 }
 0x26c   :  { %s7292_s30 = sld [smem:[#allocation7 + $0x78]]  ;;  %p10410_p6 = pmov %p10407_p4 }
 0x26d   :  { %s943_s21 = scalar_lea.smem [#allocation12], %s10401_s23  ;;  %p10411_p7 = scmp.gt.f32.partialorder %s8797_s13, %s9785_s0 }
 0x26e   :  { %7477 = sst [smem:[%s923_s4]] (%p10410_p6), %s7286_s3  ;;  %s958_s20 = scalar_lea.smem [#allocation12], %s10403_s16 }
 0x26f   :  { %7482 = sst [smem:[%s943_s21]] (%p10411_p7), %s8797_s13  ;;  %p10412_p9 = scmp.gt.f32.partialorder %s10404_s15, %s9785_s0 }
 0x270   :  { %s7295_s18 = sld [smem:[#allocation7 + $0x7a]]  ;;  %s938_s28 = scalar_lea.smem [#allocation9], %s10401_s23 }
 0x271   :  { %7485 = sst [smem:[%s958_s20]] (%p10412_p9), %s10404_s15  ;;  %p10413_p10 = pmov %p10411_p7 }
 0x272   :  { %s10414_s24 = sld [smem:[#allocation133_spill]]  ;;  %s10415_s5 = sld [smem:[#allocation131_spill]] }
 0x273   :  { %7480 = sst [smem:[%s938_s28]] (%p10413_p10), %s7289_s26  ;;  %s953_s6 = scalar_lea.smem [#allocation9], %s10403_s16 }
 0x274   :  { %s7298_s2 = sld [smem:[#allocation7 + $0x7c]]  ;;  %p10416_p11 = pmov %p10412_p9 }
 0x275   :  { %s973_s25 = scalar_lea.smem [#allocation12], %s10408_s19  ;;  %p10417_p12 = scmp.gt.f32.partialorder %s8805_s12, %s9785_s0 }
 0x276   :  { %7483 = sst [smem:[%s953_s6]] (%p10416_p11), %s7292_s30  ;;  %s988_s13 = scalar_lea.smem [#allocation12], %s8895_s14 }
 0x277   :  { %7488 = sst [smem:[%s973_s25]] (%p10417_p12), %s8805_s12  ;;  %p10418_p13 = scmp.gt.f32.partialorder %s8815_s1, %s9785_s0 }
 0x278   :  { %s7301_s16 = sld [smem:[#allocation7 + $0x7e]]  ;;  %s968_s8 = scalar_lea.smem [#allocation9], %s10408_s19 }
 0x279   :  { %7491 = sst [smem:[%s988_s13]] (%p10418_p13), %s8815_s1  ;;  %p10419_p0 = pmov %p10417_p12 }
 0x27a   :  { %s10420_s9 = sld [smem:[#allocation134_spill]]  ;;  %s983_s7 = scalar_lea.smem [#allocation9], %s8895_s14 }
 0x27b   :  { %7486 = sst [smem:[%s968_s8]] (%p10419_p0), %s7295_s18  ;;  %p10421_p1 = pmov %p10418_p13 }
 0x27c   :  { %s1003_s17 = scalar_lea.smem [#allocation12], %s10414_s24  ;;  %s998_s11 = scalar_lea.smem [#allocation9], %s10414_s24 }
 0x27d   :  { %7489 = sst [smem:[%s983_s7]] (%p10421_p1), %s7298_s2 }
 0x27e   :  { %7494 = sst [smem:[%s1003_s17]] (%p993_p8), %s10415_s5 }
 0x27f   :  { %s1005_s18 = scalar_select %p993_p8, 1, 0 }
 0x280   :  { %s1015_s20 = sshll.u32 %s10420_s9, 4  ;;  %7492 = sst [smem:[%s998_s11]] (%p993_p8), %s7301_s16  ;;  %s1016_s20 = int_to_ptr.vmem [resolvable:$true] %s1015_s20 }
 0x281   :  { %s10422_s25 = sld [smem:[#allocation135_spill]]  ;;  %s1006_s4 = sadd.s32 %s1005_s18, %s10414_s24 }
 0x282   :  { %1008 = sst [smem:[#allocation13]] %s1006_s4  ;;  %s7537_s13 = scalar_lea.vmem %s1016_s20, 16 }
 0x283   :  { %p7538_p2 = scmp.ne.s32.totalorder %s1016_s20, %s7537_s13  ;;  %p7542_p3 = scmp.lt.s32.totalorder %s1016_s20, %s1016_s20 }
 0x284   :  { %p7543_p4 = scmp.lt.s32.totalorder %s7537_s13, %s7537_s13 }
 0x286   :  { %p7544_p5 = por %p7543_p4, %p7542_p3 }
 0x287   :  { %s1035_s23 = sshll.u32 %s10422_s25, 4  ;;  %s1036_s23 = int_to_ptr.vmem [resolvable:$true] %s1035_s23 }
 0x288   :  { %p7545_p6 = pnand %p7544_p5, %p7538_p2 }
 0x28a   :  { %7548 = shalt.err (!%p7545_p6)
}
 0x28b   :  { %s7584_s26 = smov [#allocation9]   ;;  %s7549_s29 = scalar_lea.vmem %s1036_s23, 16 }
 0x28c   :  { %1018 = dma.smem_to_vmem %s7584_s26, 16, %s1016_s20, [#allocation6]  }
 0x28d   :  { %p7550_p7 = scmp.ne.s32.totalorder %s1036_s23, %s7549_s29  ;;  %p7554_p9 = scmp.lt.s32.totalorder %s1036_s23, %s1036_s23 }
 0x28e   :  { %p7555_p8 = scmp.lt.s32.totalorder %s7549_s29, %s7549_s29 }
 0x290   :  { %p7556_p10 = por %p7555_p8, %p7554_p9 }
 0x292   :  { %p7557_p11 = pnand %p7556_p10, %p7550_p7 }
 0x294   :  { %7560 = shalt.err (!%p7557_p11)
}
 0x295   :  { %s7585_s0 = smov [#allocation12]   ;;  %s10423_s16 = sld [smem:[#allocation136_spill]] }
 0x296   :  { %1038 = dma.smem_to_vmem %s7585_s0, 16, %s1036_s23, [#allocation11]  }
 0x29b   :  { %s7561_s8 = scalar_lea.hbm %s10423_s16, 16 }
 0x29c   :  { %p7562_p12 = scmp.ne.s32.totalorder %s10423_s16, %s7561_s8  ;;  %p7565_p13 = scmp.lt.u32.totalorder %s7561_s8, %s10423_s16 }
 0x29e   :  { %p7567_p0 = pnand %p7565_p13, %p7562_p12 }
 0x2a0   :  { %7570 = shalt.err (!%p7567_p0)
}
 0x2a1   :  { %s7586_s9 = smov [#allocation13]  }
 0x2a2   :  { %1046 = dma.smem_to_hbm %s7586_s9, 16, %s10423_s16, [#allocation4]  }
 0x2a3   :  { %7575 = dma.done.wait [#allocation6], 16  }
 0x2a4   :  { %7576 = vsyncadd [#allocation6], 4294967280 }
 0x2a5   :  { %7577 = dma.done.wait [#allocation11], 32  }
 0x2a6   :  { %7578 = vsyncadd [#allocation11], 4294967264 }
 0x2a7   :  { %7579 = dma.done.wait [#allocation4], 16  }
 0x2a8   :  { %7580 = vsyncadd [#allocation4], 4294967280 }
 0x2a9   :  { %1059 = sfence }
 0x2aa   :  { %1060 = vsyncpa [#allocation4], 1 }
 0x2ab   :  { %1061 = vsyncpa [#allocation5], 1 }
 0x2ac   :  { %1062 = vsyncpa [#allocation8], 1 }
 0x2ad   :  { %1063 = vsyncpa [#allocation6], 1 }
 0x2ae   :  { %1064 = vsyncpa [#allocation11], 1 }

</bundles_post_ra>
